<compile_context>
chip_gen: v6e
topology: v6e:2x2x1
jax: 0.10.0
libtpu: 0.0.40
codegen_flags: <defaults>
</compile_context>

<pallas_src>
import functools

import jax
import jax.numpy as jnp
from jax.experimental import pallas as pl
from jax.experimental.pallas import tpu as pltpu


def group_kernel(x_ref, neigh_ref, center_ref, w_ref, dist_ref, fsel_ref, *,
                 num_group, group_size):
    """Batched (in-sublanes) FPS + KNN grouping, fully VMEM-resident.

    x_ref     : (Bt, 3, N)      points, channels-first (N on lanes)
    neigh_ref : (Bt, 3, M*G)    centered neighborhoods, lane-dense, column = m*G + g
    center_ref: (Bt, 3, G)      FPS centers, channels-first
    w_ref     : (Bt, M*G, N)    scratch: onehot(knn) - onehot(fps) gather/center matrix
    dist_ref  : (Bt, G, N)      scratch: squared distances center -> every point
    fsel_ref  : (Bt, G, N)      scratch: one-hot of each FPS center
    """
    xt = x_ref[...]                                     # (Bt, 3, N)
    bt = xt.shape[0]
    n = xt.shape[-1]
    x = xt[:, 0, :]                                     # (Bt, N)
    y = xt[:, 1, :]
    z = xt[:, 2, :]

    lane = jax.lax.broadcasted_iota(jnp.int32, (bt, n), 1)
    lane_g = jax.lax.broadcasted_iota(jnp.int32, (bt, num_group, n), 2)

    # ------------- furthest point sampling (pointnet2: first index is 0) -------------
    mindist = jnp.full((bt, n), 1e10, jnp.float32)
    cur = jnp.zeros((bt, 1), jnp.int32)                 # current selected index per batch
    c_l = []
    for g in range(num_group):                          # static unroll, G is small
        sel = lane == cur                               # one-hot (Bt, N)
        # fused exact coordinate extraction: ONE row-reduction over the (Bt*3, N) tile
        c = jnp.sum(jnp.where(sel[:, None, :], xt, 0.0), axis=-1, keepdims=True)  # (Bt,3,1)
        cx = c[:, 0, :]                                 # (Bt, 1)
        cy = c[:, 1, :]
        cz = c[:, 2, :]
        d = (x - cx) ** 2 + (y - cy) ** 2 + (z - cz) ** 2                          # (Bt, N)
        c_l.append(c)
        dist_ref[:, g, :] = d
        fsel_ref[:, g, :] = jnp.where(sel, 1.0, 0.0)
        if g + 1 < num_group:                           # final argmax is never used -> skip
            mindist = jnp.minimum(mindist, d)
            mx = jnp.max(mindist, axis=-1, keepdims=True)
            # argmax with lowest-index tie-break, built from min/max reductions only
            cur = jnp.min(jnp.where(mindist >= mx, lane, n), axis=-1, keepdims=True)

    center_ref[...] = jnp.concatenate(c_l, axis=-1)     # (Bt, 3, G)

    # ------------- KNN: iteratively extract the group_size nearest per center -------------
    dist = dist_ref[...]                                # (Bt, G, N)
    fps_sel = fsel_ref[...]                             # (Bt, G, N)
    for k in range(group_size):                         # static unroll, ascending distance
        rmin = jnp.min(dist, axis=-1, keepdims=True)                                # (Bt,G,1)
        idx = jnp.min(jnp.where(dist <= rmin, lane_g, n), axis=-1, keepdims=True)   # (Bt,G,1)
        sel = lane_g == idx                                                         # (Bt,G,N)
        dist = jnp.where(sel, jnp.float32(1e30), dist)  # exclude picked point
        # combined gather + centering matrix row block (columns k*G .. k*G+G-1)
        w_ref[:, k * num_group:(k + 1) * num_group, :] = jnp.where(sel, 1.0, 0.0) - fps_sel

    # ------------- one MXU pass per batch row: gather + center in a single matmul -------------
    w = w_ref[...]                                      # (Bt, M*G, N)
    for b in range(bt):                                 # Bt <= 8, static
        neigh_ref[b] = jax.lax.dot_general(
            xt[b], w[b],
            dimension_numbers=(((1,), (1,)), ((), ())),
            preferred_element_type=jnp.float32)         # (3, M*G), column = m*G + g


def old_group_forward(xyz, num_group, group_size, batch_tile=8):
    """xyz: (B, N, 3)  ->  (neighborhood (B, G, M, 3), center (B, G, 3))."""
    b, n, _ = xyz.shape
    bt = min(b, batch_tile)                             # batches packed into sublanes
    nb = -(-b // bt)
    b_pad = nb * bt
    gm = num_group * group_size

    xt = jnp.transpose(xyz, (0, 2, 1)).astype(jnp.float32)      # (B, 3, N) lane-dense layout
    if b_pad != b:
        xt = jnp.pad(xt, ((0, b_pad - b), (0, 0), (0, 0)))

    kernel = functools.partial(group_kernel, num_group=num_group, group_size=group_size)
    neigh_ch, center_ch = pl.pallas_call(
        kernel,
        grid=(nb,),
        in_specs=[pl.BlockSpec((bt, 3, n), lambda i: (i, 0, 0))],
        out_specs=(
            pl.BlockSpec((bt, 3, gm), lambda i: (i, 0, 0)),
            pl.BlockSpec((bt, 3, num_group), lambda i: (i, 0, 0)),
        ),
        out_shape=(
            jax.ShapeDtypeStruct((b_pad, 3, gm), jnp.float32),
            jax.ShapeDtypeStruct((b_pad, 3, num_group), jnp.float32),
        ),
        scratch_shapes=[
            pltpu.VMEM((bt, gm, n), jnp.float32),        # W: onehot(knn) - onehot(fps)
            pltpu.VMEM((bt, num_group, n), jnp.float32),  # dist
            pltpu.VMEM((bt, num_group, n), jnp.float32),  # fps one-hots
        ],
        compiler_params=pltpu.CompilerParams(dimension_semantics=("parallel",)),
    )(xt)

    neigh_ch = neigh_ch[:b]                              # (B, 3, M*G), column = m*G + g
    center_ch = center_ch[:b]                            # (B, 3, G)

    # layout plumbing only (lane-dense kernel outputs -> reference layouts)
    neighborhood = jnp.transpose(
        neigh_ch.reshape(b, 3, group_size, num_group), (0, 3, 2, 1))   # (B, G, M, 3)
    center = jnp.transpose(center_ch, (0, 2, 1))                        # (B, G, 3)
    return neighborhood, center


if __name__ == "__main__":
    NUM_GROUP, GROUP_SIZE = 8, 16          # OldGroup(num_group=8, group_size=16)
    BATCH, NUM_POINTS = 2, 128             # B N 3 input point cloud

    key = jax.random.PRNGKey(0)
    xyz = jax.random.normal(key, (BATCH, NUM_POINTS, 3), jnp.float32)

    neighborhood, center = old_group_forward(xyz, NUM_GROUP, GROUP_SIZE)
    jax.block_until_ready((neighborhood, center))

    assert neighborhood.shape == (BATCH, NUM_GROUP, GROUP_SIZE, 3)
    assert center.shape == (BATCH, NUM_GROUP, 3)

    # sanity: nearest neighbour of each center is the center itself -> zero offset
    assert float(jnp.max(jnp.abs(neighborhood[:, :, 0, :]))) < 1e-6
    # sanity: every FPS center is an actual input point
    d = jnp.min(jnp.sum((xyz[:, None, :, :] - center[:, :, None, :]) ** 2, axis=-1), axis=-1)
    assert float(jnp.max(d)) < 1e-10
    # sanity: FPS starts at point 0 (pointnet2 semantics)
    assert float(jnp.max(jnp.abs(center[:, 0, :] - xyz[:, 0, :]))) < 1e-6
    # sanity: each neighborhood offset + its center reproduces an exact input point
    recon = neighborhood + center[:, :, None, :]
    dr = jnp.min(jnp.sum((recon[:, :, :, None, :] - xyz[:, None, None, :, :]) ** 2, axis=-1), axis=-1)
    assert float(jnp.max(dr)) < 1e-6

    print("KERNEL_OK")
</pallas_src>

<mosaic_0001>
module attributes {stable_mosaic.version = 11 : i64} {
  func.func @group_kernel(%arg0: i32, %arg1: memref<2x3x128xf32, #tpu.memory_space<vmem>>, %arg2: memref<2x3x128xf32, #tpu.memory_space<vmem>>, %arg3: memref<2x3x8xf32, #tpu.memory_space<vmem>>, %arg4: memref<2x128x128xf32, #tpu.memory_space<vmem>>, %arg5: memref<2x8x128xf32, #tpu.memory_space<vmem>>, %arg6: memref<2x8x128xf32, #tpu.memory_space<vmem>>) attributes {dimension_semantics = [#tpu.dimension_semantics<parallel>], iteration_bounds = array<i64: 1>, scalar_prefetch = 0 : i64, scratch_operands = 3 : i64, tpu.core_type = #tpu.core_type<tc>, window_params = [{transform_indices = @transform_0, window_bounds = array<i64: 2, 3, 128>}, {transform_indices = @transform_1, window_bounds = array<i64: 2, 3, 128>}, {transform_indices = @transform_2, window_bounds = array<i64: 2, 3, 8>}]} {
    %c0 = arith.constant 0 : index
    %c0_0 = arith.constant 0 : index
    %c0_1 = arith.constant 0 : index
    %0 = vector.load %arg1[%c0, %c0_0, %c0_1] : memref<2x3x128xf32, #tpu.memory_space<vmem>>, vector<2x3x128xf32>
    %1 = vector.extract_strided_slice %0 {offsets = [0, 0, 0], sizes = [2, 1, 128], strides = [1, 1, 1]} : vector<2x3x128xf32> to vector<2x1x128xf32>
    %2 = vector.shape_cast %1 : vector<2x1x128xf32> to vector<2x128xf32>
    %3 = vector.extract_strided_slice %0 {offsets = [0, 1, 0], sizes = [2, 1, 128], strides = [1, 1, 1]} : vector<2x3x128xf32> to vector<2x1x128xf32>
    %4 = vector.shape_cast %3 : vector<2x1x128xf32> to vector<2x128xf32>
    %5 = vector.extract_strided_slice %0 {offsets = [0, 2, 0], sizes = [2, 1, 128], strides = [1, 1, 1]} : vector<2x3x128xf32> to vector<2x1x128xf32>
    %6 = vector.shape_cast %5 : vector<2x1x128xf32> to vector<2x128xf32>
    %7 = tpu.iota {dimensions = array<i32: 1>} : vector<2x128xi32>
    %8 = tpu.iota {dimensions = array<i32: 2>} : vector<2x8x128xi32>
    %cst = arith.constant 1.000000e+10 : f32
    %9 = vector.broadcast %cst : f32 to vector<2x128xf32>
    %c0_i32 = arith.constant 0 : i32
    %10 = vector.broadcast %c0_i32 : i32 to vector<2x1xi32>
    %11 = vector.broadcast %10 : vector<2x1xi32> to vector<2x128xi32>
    %12 = arith.cmpi eq, %7, %11 : vector<2x128xi32>
    %13 = vector.shape_cast %12 : vector<2x128xi1> to vector<2x1x128xi1>
    %cst_2 = arith.constant 0.000000e+00 : f32
    %14 = vector.shape_cast %13 : vector<2x1x128xi1> to vector<2x1x128xi1>
    %15 = vector.broadcast %14 : vector<2x1x128xi1> to vector<2x3x128xi1>
    %16 = vector.broadcast %cst_2 : f32 to vector<2x3x128xf32>
    %17 = arith.select %15, %0, %16 : vector<2x3x128xi1>, vector<2x3x128xf32>
    %cst_3 = arith.constant dense<0.000000e+00> : vector<2x3xf32>
    %18 = vector.multi_reduction <add>, %17, %cst_3 [2] : vector<2x3x128xf32> to vector<2x3xf32>
    %19 = vector.shape_cast %18 : vector<2x3xf32> to vector<2x3x1xf32>
    %20 = vector.extract_strided_slice %19 {offsets = [0, 0, 0], sizes = [2, 1, 1], strides = [1, 1, 1]} : vector<2x3x1xf32> to vector<2x1x1xf32>
    %21 = vector.shape_cast %20 : vector<2x1x1xf32> to vector<2x1xf32>
    %22 = vector.extract_strided_slice %19 {offsets = [0, 1, 0], sizes = [2, 1, 1], strides = [1, 1, 1]} : vector<2x3x1xf32> to vector<2x1x1xf32>
    %23 = vector.shape_cast %22 : vector<2x1x1xf32> to vector<2x1xf32>
    %24 = vector.extract_strided_slice %19 {offsets = [0, 2, 0], sizes = [2, 1, 1], strides = [1, 1, 1]} : vector<2x3x1xf32> to vector<2x1x1xf32>
    %25 = vector.shape_cast %24 : vector<2x1x1xf32> to vector<2x1xf32>
    %26 = vector.broadcast %21 : vector<2x1xf32> to vector<2x128xf32>
    %27 = arith.subf %2, %26 : vector<2x128xf32>
    %28 = arith.mulf %27, %27 : vector<2x128xf32>
    %29 = vector.broadcast %23 : vector<2x1xf32> to vector<2x128xf32>
    %30 = arith.subf %4, %29 : vector<2x128xf32>
    %31 = arith.mulf %30, %30 : vector<2x128xf32>
    %32 = arith.addf %28, %31 : vector<2x128xf32>
    %33 = vector.broadcast %25 : vector<2x1xf32> to vector<2x128xf32>
    %34 = arith.subf %6, %33 : vector<2x128xf32>
    %35 = arith.mulf %34, %34 : vector<2x128xf32>
    %36 = arith.addf %32, %35 : vector<2x128xf32>
    %c0_4 = arith.constant 0 : index
    %c0_5 = arith.constant 0 : index
    %c0_6 = arith.constant 0 : index
    %37 = vector.load %arg5[%c0_4, %c0_5, %c0_6] : memref<2x8x128xf32, #tpu.memory_space<vmem>>, vector<2x1x128xf32>
    %38 = vector.shape_cast %37 : vector<2x1x128xf32> to vector<2x128xf32>
    %39 = vector.shape_cast %36 : vector<2x128xf32> to vector<2x1x128xf32>
    tpu.vector_store %arg5[%c0_4, %c0_5, %c0_6], %39 {strides = array<i32>} : memref<2x8x128xf32, #tpu.memory_space<vmem>>, vector<2x1x128xf32>,
    %cst_7 = arith.constant 1.000000e+00 : f32
    %cst_8 = arith.constant 0.000000e+00 : f32
    %40 = vector.broadcast %cst_7 : f32 to vector<2x128xf32>
    %41 = vector.broadcast %cst_8 : f32 to vector<2x128xf32>
    %42 = arith.select %12, %40, %41 : vector<2x128xi1>, vector<2x128xf32>
    %c0_9 = arith.constant 0 : index
    %c0_10 = arith.constant 0 : index
    %c0_11 = arith.constant 0 : index
    %43 = vector.load %arg6[%c0_9, %c0_10, %c0_11] : memref<2x8x128xf32, #tpu.memory_space<vmem>>, vector<2x1x128xf32>
    %44 = vector.shape_cast %43 : vector<2x1x128xf32> to vector<2x128xf32>
    %45 = vector.shape_cast %42 : vector<2x128xf32> to vector<2x1x128xf32>
    tpu.vector_store %arg6[%c0_9, %c0_10, %c0_11], %45 {strides = array<i32>} : memref<2x8x128xf32, #tpu.memory_space<vmem>>, vector<2x1x128xf32>,
    %46 = arith.minimumf %9, %36 : vector<2x128xf32>
    %cst_12 = arith.constant dense<0xFF800000> : vector<2xf32>
    %47 = vector.multi_reduction <maximumf>, %46, %cst_12 [1] : vector<2x128xf32> to vector<2xf32>
    %48 = vector.shape_cast %47 : vector<2xf32> to vector<2x1xf32>
    %49 = vector.broadcast %48 : vector<2x1xf32> to vector<2x128xf32>
    %50 = arith.cmpf oge, %46, %49 : vector<2x128xf32>
    %c128_i32 = arith.constant 128 : i32
    %51 = vector.broadcast %c128_i32 : i32 to vector<2x128xi32>
    %52 = arith.select %50, %7, %51 : vector<2x128xi1>, vector<2x128xi32>
    %cst_13 = arith.constant dense<2147483647> : vector<2xi32>
    %53 = vector.multi_reduction <minsi>, %52, %cst_13 [1] : vector<2x128xi32> to vector<2xi32>
    %54 = vector.shape_cast %53 : vector<2xi32> to vector<2x1xi32>
    %55 = vector.broadcast %54 : vector<2x1xi32> to vector<2x128xi32>
    %56 = arith.cmpi eq, %7, %55 : vector<2x128xi32>
    %57 = vector.shape_cast %56 : vector<2x128xi1> to vector<2x1x128xi1>
    %cst_14 = arith.constant 0.000000e+00 : f32
    %58 = vector.shape_cast %57 : vector<2x1x128xi1> to vector<2x1x128xi1>
    %59 = vector.broadcast %58 : vector<2x1x128xi1> to vector<2x3x128xi1>
    %60 = vector.broadcast %cst_14 : f32 to vector<2x3x128xf32>
    %61 = arith.select %59, %0, %60 : vector<2x3x128xi1>, vector<2x3x128xf32>
    %cst_15 = arith.constant dense<0.000000e+00> : vector<2x3xf32>
    %62 = vector.multi_reduction <add>, %61, %cst_15 [2] : vector<2x3x128xf32> to vector<2x3xf32>
    %63 = vector.shape_cast %62 : vector<2x3xf32> to vector<2x3x1xf32>
    %64 = vector.extract_strided_slice %63 {offsets = [0, 0, 0], sizes = [2, 1, 1], strides = [1, 1, 1]} : vector<2x3x1xf32> to vector<2x1x1xf32>
    %65 = vector.shape_cast %64 : vector<2x1x1xf32> to vector<2x1xf32>
    %66 = vector.extract_strided_slice %63 {offsets = [0, 1, 0], sizes = [2, 1, 1], strides = [1, 1, 1]} : vector<2x3x1xf32> to vector<2x1x1xf32>
    %67 = vector.shape_cast %66 : vector<2x1x1xf32> to vector<2x1xf32>
    %68 = vector.extract_strided_slice %63 {offsets = [0, 2, 0], sizes = [2, 1, 1], strides = [1, 1, 1]} : vector<2x3x1xf32> to vector<2x1x1xf32>
    %69 = vector.shape_cast %68 : vector<2x1x1xf32> to vector<2x1xf32>
    %70 = vector.broadcast %65 : vector<2x1xf32> to vector<2x128xf32>
    %71 = arith.subf %2, %70 : vector<2x128xf32>
    %72 = arith.mulf %71, %71 : vector<2x128xf32>
    %73 = vector.broadcast %67 : vector<2x1xf32> to vector<2x128xf32>
    %74 = arith.subf %4, %73 : vector<2x128xf32>
    %75 = arith.mulf %74, %74 : vector<2x128xf32>
    %76 = arith.addf %72, %75 : vector<2x128xf32>
    %77 = vector.broadcast %69 : vector<2x1xf32> to vector<2x128xf32>
    %78 = arith.subf %6, %77 : vector<2x128xf32>
    %79 = arith.mulf %78, %78 : vector<2x128xf32>
    %80 = arith.addf %76, %79 : vector<2x128xf32>
    %c0_16 = arith.constant 0 : index
    %c1 = arith.constant 1 : index
    %c0_17 = arith.constant 0 : index
    %81 = vector.load %arg5[%c0_16, %c1, %c0_17] : memref<2x8x128xf32, #tpu.memory_space<vmem>>, vector<2x1x128xf32>
    %82 = vector.shape_cast %81 : vector<2x1x128xf32> to vector<2x128xf32>
    %83 = vector.shape_cast %80 : vector<2x128xf32> to vector<2x1x128xf32>
    tpu.vector_store %arg5[%c0_16, %c1, %c0_17], %83 {strides = array<i32>} : memref<2x8x128xf32, #tpu.memory_space<vmem>>, vector<2x1x128xf32>,
    %cst_18 = arith.constant 1.000000e+00 : f32
    %cst_19 = arith.constant 0.000000e+00 : f32
    %84 = vector.broadcast %cst_18 : f32 to vector<2x128xf32>
    %85 = vector.broadcast %cst_19 : f32 to vector<2x128xf32>
    %86 = arith.select %56, %84, %85 : vector<2x128xi1>, vector<2x128xf32>
    %c0_20 = arith.constant 0 : index
    %c1_21 = arith.constant 1 : index
    %c0_22 = arith.constant 0 : index
    %87 = vector.load %arg6[%c0_20, %c1_21, %c0_22] : memref<2x8x128xf32, #tpu.memory_space<vmem>>, vector<2x1x128xf32>
    %88 = vector.shape_cast %87 : vector<2x1x128xf32> to vector<2x128xf32>
    %89 = vector.shape_cast %86 : vector<2x128xf32> to vector<2x1x128xf32>
    tpu.vector_store %arg6[%c0_20, %c1_21, %c0_22], %89 {strides = array<i32>} : memref<2x8x128xf32, #tpu.memory_space<vmem>>, vector<2x1x128xf32>,
    %90 = arith.minimumf %46, %80 : vector<2x128xf32>
    %cst_23 = arith.constant dense<0xFF800000> : vector<2xf32>
    %91 = vector.multi_reduction <maximumf>, %90, %cst_23 [1] : vector<2x128xf32> to vector<2xf32>
    %92 = vector.shape_cast %91 : vector<2xf32> to vector<2x1xf32>
    %93 = vector.broadcast %92 : vector<2x1xf32> to vector<2x128xf32>
    %94 = arith.cmpf oge, %90, %93 : vector<2x128xf32>
    %c128_i32_24 = arith.constant 128 : i32
    %95 = vector.broadcast %c128_i32_24 : i32 to vector<2x128xi32>
    %96 = arith.select %94, %7, %95 : vector<2x128xi1>, vector<2x128xi32>
    %cst_25 = arith.constant dense<2147483647> : vector<2xi32>
    %97 = vector.multi_reduction <minsi>, %96, %cst_25 [1] : vector<2x128xi32> to vector<2xi32>
    %98 = vector.shape_cast %97 : vector<2xi32> to vector<2x1xi32>
    %99 = vector.broadcast %98 : vector<2x1xi32> to vector<2x128xi32>
    %100 = arith.cmpi eq, %7, %99 : vector<2x128xi32>
    %101 = vector.shape_cast %100 : vector<2x128xi1> to vector<2x1x128xi1>
    %cst_26 = arith.constant 0.000000e+00 : f32
    %102 = vector.shape_cast %101 : vector<2x1x128xi1> to vector<2x1x128xi1>
    %103 = vector.broadcast %102 : vector<2x1x128xi1> to vector<2x3x128xi1>
    %104 = vector.broadcast %cst_26 : f32 to vector<2x3x128xf32>
    %105 = arith.select %103, %0, %104 : vector<2x3x128xi1>, vector<2x3x128xf32>
    %cst_27 = arith.constant dense<0.000000e+00> : vector<2x3xf32>
    %106 = vector.multi_reduction <add>, %105, %cst_27 [2] : vector<2x3x128xf32> to vector<2x3xf32>
    %107 = vector.shape_cast %106 : vector<2x3xf32> to vector<2x3x1xf32>
    %108 = vector.extract_strided_slice %107 {offsets = [0, 0, 0], sizes = [2, 1, 1], strides = [1, 1, 1]} : vector<2x3x1xf32> to vector<2x1x1xf32>
    %109 = vector.shape_cast %108 : vector<2x1x1xf32> to vector<2x1xf32>
    %110 = vector.extract_strided_slice %107 {offsets = [0, 1, 0], sizes = [2, 1, 1], strides = [1, 1, 1]} : vector<2x3x1xf32> to vector<2x1x1xf32>
    %111 = vector.shape_cast %110 : vector<2x1x1xf32> to vector<2x1xf32>
    %112 = vector.extract_strided_slice %107 {offsets = [0, 2, 0], sizes = [2, 1, 1], strides = [1, 1, 1]} : vector<2x3x1xf32> to vector<2x1x1xf32>
    %113 = vector.shape_cast %112 : vector<2x1x1xf32> to vector<2x1xf32>
    %114 = vector.broadcast %109 : vector<2x1xf32> to vector<2x128xf32>
    %115 = arith.subf %2, %114 : vector<2x128xf32>
    %116 = arith.mulf %115, %115 : vector<2x128xf32>
    %117 = vector.broadcast %111 : vector<2x1xf32> to vector<2x128xf32>
    %118 = arith.subf %4, %117 : vector<2x128xf32>
    %119 = arith.mulf %118, %118 : vector<2x128xf32>
    %120 = arith.addf %116, %119 : vector<2x128xf32>
    %121 = vector.broadcast %113 : vector<2x1xf32> to vector<2x128xf32>
    %122 = arith.subf %6, %121 : vector<2x128xf32>
    %123 = arith.mulf %122, %122 : vector<2x128xf32>
    %124 = arith.addf %120, %123 : vector<2x128xf32>
    %c0_28 = arith.constant 0 : index
    %c2 = arith.constant 2 : index
    %c0_29 = arith.constant 0 : index
    %125 = vector.load %arg5[%c0_28, %c2, %c0_29] : memref<2x8x128xf32, #tpu.memory_space<vmem>>, vector<2x1x128xf32>
    %126 = vector.shape_cast %125 : vector<2x1x128xf32> to vector<2x128xf32>
    %127 = vector.shape_cast %124 : vector<2x128xf32> to vector<2x1x128xf32>
    tpu.vector_store %arg5[%c0_28, %c2, %c0_29], %127 {strides = array<i32>} : memref<2x8x128xf32, #tpu.memory_space<vmem>>, vector<2x1x128xf32>,
    %cst_30 = arith.constant 1.000000e+00 : f32
    %cst_31 = arith.constant 0.000000e+00 : f32
    %128 = vector.broadcast %cst_30 : f32 to vector<2x128xf32>
    %129 = vector.broadcast %cst_31 : f32 to vector<2x128xf32>
    %130 = arith.select %100, %128, %129 : vector<2x128xi1>, vector<2x128xf32>
    %c0_32 = arith.constant 0 : index
    %c2_33 = arith.constant 2 : index
    %c0_34 = arith.constant 0 : index
    %131 = vector.load %arg6[%c0_32, %c2_33, %c0_34] : memref<2x8x128xf32, #tpu.memory_space<vmem>>, vector<2x1x128xf32>
    %132 = vector.shape_cast %131 : vector<2x1x128xf32> to vector<2x128xf32>
    %133 = vector.shape_cast %130 : vector<2x128xf32> to vector<2x1x128xf32>
    tpu.vector_store %arg6[%c0_32, %c2_33, %c0_34], %133 {strides = array<i32>} : memref<2x8x128xf32, #tpu.memory_space<vmem>>, vector<2x1x128xf32>,
    %134 = arith.minimumf %90, %124 : vector<2x128xf32>
    %cst_35 = arith.constant dense<0xFF800000> : vector<2xf32>
    %135 = vector.multi_reduction <maximumf>, %134, %cst_35 [1] : vector<2x128xf32> to vector<2xf32>
    %136 = vector.shape_cast %135 : vector<2xf32> to vector<2x1xf32>
    %137 = vector.broadcast %136 : vector<2x1xf32> to vector<2x128xf32>
    %138 = arith.cmpf oge, %134, %137 : vector<2x128xf32>
    %c128_i32_36 = arith.constant 128 : i32
    %139 = vector.broadcast %c128_i32_36 : i32 to vector<2x128xi32>
    %140 = arith.select %138, %7, %139 : vector<2x128xi1>, vector<2x128xi32>
    %cst_37 = arith.constant dense<2147483647> : vector<2xi32>
    %141 = vector.multi_reduction <minsi>, %140, %cst_37 [1] : vector<2x128xi32> to vector<2xi32>
    %142 = vector.shape_cast %141 : vector<2xi32> to vector<2x1xi32>
    %143 = vector.broadcast %142 : vector<2x1xi32> to vector<2x128xi32>
    %144 = arith.cmpi eq, %7, %143 : vector<2x128xi32>
    %145 = vector.shape_cast %144 : vector<2x128xi1> to vector<2x1x128xi1>
    %cst_38 = arith.constant 0.000000e+00 : f32
    %146 = vector.shape_cast %145 : vector<2x1x128xi1> to vector<2x1x128xi1>
    %147 = vector.broadcast %146 : vector<2x1x128xi1> to vector<2x3x128xi1>
    %148 = vector.broadcast %cst_38 : f32 to vector<2x3x128xf32>
    %149 = arith.select %147, %0, %148 : vector<2x3x128xi1>, vector<2x3x128xf32>
    %cst_39 = arith.constant dense<0.000000e+00> : vector<2x3xf32>
    %150 = vector.multi_reduction <add>, %149, %cst_39 [2] : vector<2x3x128xf32> to vector<2x3xf32>
    %151 = vector.shape_cast %150 : vector<2x3xf32> to vector<2x3x1xf32>
    %152 = vector.extract_strided_slice %151 {offsets = [0, 0, 0], sizes = [2, 1, 1], strides = [1, 1, 1]} : vector<2x3x1xf32> to vector<2x1x1xf32>
    %153 = vector.shape_cast %152 : vector<2x1x1xf32> to vector<2x1xf32>
    %154 = vector.extract_strided_slice %151 {offsets = [0, 1, 0], sizes = [2, 1, 1], strides = [1, 1, 1]} : vector<2x3x1xf32> to vector<2x1x1xf32>
    %155 = vector.shape_cast %154 : vector<2x1x1xf32> to vector<2x1xf32>
    %156 = vector.extract_strided_slice %151 {offsets = [0, 2, 0], sizes = [2, 1, 1], strides = [1, 1, 1]} : vector<2x3x1xf32> to vector<2x1x1xf32>
    %157 = vector.shape_cast %156 : vector<2x1x1xf32> to vector<2x1xf32>
    %158 = vector.broadcast %153 : vector<2x1xf32> to vector<2x128xf32>
    %159 = arith.subf %2, %158 : vector<2x128xf32>
    %160 = arith.mulf %159, %159 : vector<2x128xf32>
    %161 = vector.broadcast %155 : vector<2x1xf32> to vector<2x128xf32>
    %162 = arith.subf %4, %161 : vector<2x128xf32>
    %163 = arith.mulf %162, %162 : vector<2x128xf32>
    %164 = arith.addf %160, %163 : vector<2x128xf32>
    %165 = vector.broadcast %157 : vector<2x1xf32> to vector<2x128xf32>
    %166 = arith.subf %6, %165 : vector<2x128xf32>
    %167 = arith.mulf %166, %166 : vector<2x128xf32>
    %168 = arith.addf %164, %167 : vector<2x128xf32>
    %c0_40 = arith.constant 0 : index
    %c3 = arith.constant 3 : index
    %c0_41 = arith.constant 0 : index
    %169 = vector.load %arg5[%c0_40, %c3, %c0_41] : memref<2x8x128xf32, #tpu.memory_space<vmem>>, vector<2x1x128xf32>
    %170 = vector.shape_cast %169 : vector<2x1x128xf32> to vector<2x128xf32>
    %171 = vector.shape_cast %168 : vector<2x128xf32> to vector<2x1x128xf32>
    tpu.vector_store %arg5[%c0_40, %c3, %c0_41], %171 {strides = array<i32>} : memref<2x8x128xf32, #tpu.memory_space<vmem>>, vector<2x1x128xf32>,
    %cst_42 = arith.constant 1.000000e+00 : f32
    %cst_43 = arith.constant 0.000000e+00 : f32
    %172 = vector.broadcast %cst_42 : f32 to vector<2x128xf32>
    %173 = vector.broadcast %cst_43 : f32 to vector<2x128xf32>
    %174 = arith.select %144, %172, %173 : vector<2x128xi1>, vector<2x128xf32>
    %c0_44 = arith.constant 0 : index
    %c3_45 = arith.constant 3 : index
    %c0_46 = arith.constant 0 : index
    %175 = vector.load %arg6[%c0_44, %c3_45, %c0_46] : memref<2x8x128xf32, #tpu.memory_space<vmem>>, vector<2x1x128xf32>
    %176 = vector.shape_cast %175 : vector<2x1x128xf32> to vector<2x128xf32>
    %177 = vector.shape_cast %174 : vector<2x128xf32> to vector<2x1x128xf32>
    tpu.vector_store %arg6[%c0_44, %c3_45, %c0_46], %177 {strides = array<i32>} : memref<2x8x128xf32, #tpu.memory_space<vmem>>, vector<2x1x128xf32>,
    %178 = arith.minimumf %134, %168 : vector<2x128xf32>
    %cst_47 = arith.constant dense<0xFF800000> : vector<2xf32>
    %179 = vector.multi_reduction <maximumf>, %178, %cst_47 [1] : vector<2x128xf32> to vector<2xf32>
    %180 = vector.shape_cast %179 : vector<2xf32> to vector<2x1xf32>
    %181 = vector.broadcast %180 : vector<2x1xf32> to vector<2x128xf32>
    %182 = arith.cmpf oge, %178, %181 : vector<2x128xf32>
    %c128_i32_48 = arith.constant 128 : i32
    %183 = vector.broadcast %c128_i32_48 : i32 to vector<2x128xi32>
    %184 = arith.select %182, %7, %183 : vector<2x128xi1>, vector<2x128xi32>
    %cst_49 = arith.constant dense<2147483647> : vector<2xi32>
    %185 = vector.multi_reduction <minsi>, %184, %cst_49 [1] : vector<2x128xi32> to vector<2xi32>
    %186 = vector.shape_cast %185 : vector<2xi32> to vector<2x1xi32>
    %187 = vector.broadcast %186 : vector<2x1xi32> to vector<2x128xi32>
    %188 = arith.cmpi eq, %7, %187 : vector<2x128xi32>
    %189 = vector.shape_cast %188 : vector<2x128xi1> to vector<2x1x128xi1>
    %cst_50 = arith.constant 0.000000e+00 : f32
    %190 = vector.shape_cast %189 : vector<2x1x128xi1> to vector<2x1x128xi1>
    %191 = vector.broadcast %190 : vector<2x1x128xi1> to vector<2x3x128xi1>
    %192 = vector.broadcast %cst_50 : f32 to vector<2x3x128xf32>
    %193 = arith.select %191, %0, %192 : vector<2x3x128xi1>, vector<2x3x128xf32>
    %cst_51 = arith.constant dense<0.000000e+00> : vector<2x3xf32>
    %194 = vector.multi_reduction <add>, %193, %cst_51 [2] : vector<2x3x128xf32> to vector<2x3xf32>
    %195 = vector.shape_cast %194 : vector<2x3xf32> to vector<2x3x1xf32>
    %196 = vector.extract_strided_slice %195 {offsets = [0, 0, 0], sizes = [2, 1, 1], strides = [1, 1, 1]} : vector<2x3x1xf32> to vector<2x1x1xf32>
    %197 = vector.shape_cast %196 : vector<2x1x1xf32> to vector<2x1xf32>
    %198 = vector.extract_strided_slice %195 {offsets = [0, 1, 0], sizes = [2, 1, 1], strides = [1, 1, 1]} : vector<2x3x1xf32> to vector<2x1x1xf32>
    %199 = vector.shape_cast %198 : vector<2x1x1xf32> to vector<2x1xf32>
    %200 = vector.extract_strided_slice %195 {offsets = [0, 2, 0], sizes = [2, 1, 1], strides = [1, 1, 1]} : vector<2x3x1xf32> to vector<2x1x1xf32>
    %201 = vector.shape_cast %200 : vector<2x1x1xf32> to vector<2x1xf32>
    %202 = vector.broadcast %197 : vector<2x1xf32> to vector<2x128xf32>
    %203 = arith.subf %2, %202 : vector<2x128xf32>
    %204 = arith.mulf %203, %203 : vector<2x128xf32>
    %205 = vector.broadcast %199 : vector<2x1xf32> to vector<2x128xf32>
    %206 = arith.subf %4, %205 : vector<2x128xf32>
    %207 = arith.mulf %206, %206 : vector<2x128xf32>
    %208 = arith.addf %204, %207 : vector<2x128xf32>
    %209 = vector.broadcast %201 : vector<2x1xf32> to vector<2x128xf32>
    %210 = arith.subf %6, %209 : vector<2x128xf32>
    %211 = arith.mulf %210, %210 : vector<2x128xf32>
    %212 = arith.addf %208, %211 : vector<2x128xf32>
    %c0_52 = arith.constant 0 : index
    %c4 = arith.constant 4 : index
    %c0_53 = arith.constant 0 : index
    %213 = vector.load %arg5[%c0_52, %c4, %c0_53] : memref<2x8x128xf32, #tpu.memory_space<vmem>>, vector<2x1x128xf32>
    %214 = vector.shape_cast %213 : vector<2x1x128xf32> to vector<2x128xf32>
    %215 = vector.shape_cast %212 : vector<2x128xf32> to vector<2x1x128xf32>
    tpu.vector_store %arg5[%c0_52, %c4, %c0_53], %215 {strides = array<i32>} : memref<2x8x128xf32, #tpu.memory_space<vmem>>, vector<2x1x128xf32>,
    %cst_54 = arith.constant 1.000000e+00 : f32
    %cst_55 = arith.constant 0.000000e+00 : f32
    %216 = vector.broadcast %cst_54 : f32 to vector<2x128xf32>
    %217 = vector.broadcast %cst_55 : f32 to vector<2x128xf32>
    %218 = arith.select %188, %216, %217 : vector<2x128xi1>, vector<2x128xf32>
    %c0_56 = arith.constant 0 : index
    %c4_57 = arith.constant 4 : index
    %c0_58 = arith.constant 0 : index
    %219 = vector.load %arg6[%c0_56, %c4_57, %c0_58] : memref<2x8x128xf32, #tpu.memory_space<vmem>>, vector<2x1x128xf32>
    %220 = vector.shape_cast %219 : vector<2x1x128xf32> to vector<2x128xf32>
    %221 = vector.shape_cast %218 : vector<2x128xf32> to vector<2x1x128xf32>
    tpu.vector_store %arg6[%c0_56, %c4_57, %c0_58], %221 {strides = array<i32>} : memref<2x8x128xf32, #tpu.memory_space<vmem>>, vector<2x1x128xf32>,
    %222 = arith.minimumf %178, %212 : vector<2x128xf32>
    %cst_59 = arith.constant dense<0xFF800000> : vector<2xf32>
    %223 = vector.multi_reduction <maximumf>, %222, %cst_59 [1] : vector<2x128xf32> to vector<2xf32>
    %224 = vector.shape_cast %223 : vector<2xf32> to vector<2x1xf32>
    %225 = vector.broadcast %224 : vector<2x1xf32> to vector<2x128xf32>
    %226 = arith.cmpf oge, %222, %225 : vector<2x128xf32>
    %c128_i32_60 = arith.constant 128 : i32
    %227 = vector.broadcast %c128_i32_60 : i32 to vector<2x128xi32>
    %228 = arith.select %226, %7, %227 : vector<2x128xi1>, vector<2x128xi32>
    %cst_61 = arith.constant dense<2147483647> : vector<2xi32>
    %229 = vector.multi_reduction <minsi>, %228, %cst_61 [1] : vector<2x128xi32> to vector<2xi32>
    %230 = vector.shape_cast %229 : vector<2xi32> to vector<2x1xi32>
    %231 = vector.broadcast %230 : vector<2x1xi32> to vector<2x128xi32>
    %232 = arith.cmpi eq, %7, %231 : vector<2x128xi32>
    %233 = vector.shape_cast %232 : vector<2x128xi1> to vector<2x1x128xi1>
    %cst_62 = arith.constant 0.000000e+00 : f32
    %234 = vector.shape_cast %233 : vector<2x1x128xi1> to vector<2x1x128xi1>
    %235 = vector.broadcast %234 : vector<2x1x128xi1> to vector<2x3x128xi1>
    %236 = vector.broadcast %cst_62 : f32 to vector<2x3x128xf32>
    %237 = arith.select %235, %0, %236 : vector<2x3x128xi1>, vector<2x3x128xf32>
    %cst_63 = arith.constant dense<0.000000e+00> : vector<2x3xf32>
    %238 = vector.multi_reduction <add>, %237, %cst_63 [2] : vector<2x3x128xf32> to vector<2x3xf32>
    %239 = vector.shape_cast %238 : vector<2x3xf32> to vector<2x3x1xf32>
    %240 = vector.extract_strided_slice %239 {offsets = [0, 0, 0], sizes = [2, 1, 1], strides = [1, 1, 1]} : vector<2x3x1xf32> to vector<2x1x1xf32>
    %241 = vector.shape_cast %240 : vector<2x1x1xf32> to vector<2x1xf32>
    %242 = vector.extract_strided_slice %239 {offsets = [0, 1, 0], sizes = [2, 1, 1], strides = [1, 1, 1]} : vector<2x3x1xf32> to vector<2x1x1xf32>
    %243 = vector.shape_cast %242 : vector<2x1x1xf32> to vector<2x1xf32>
    %244 = vector.extract_strided_slice %239 {offsets = [0, 2, 0], sizes = [2, 1, 1], strides = [1, 1, 1]} : vector<2x3x1xf32> to vector<2x1x1xf32>
    %245 = vector.shape_cast %244 : vector<2x1x1xf32> to vector<2x1xf32>
    %246 = vector.broadcast %241 : vector<2x1xf32> to vector<2x128xf32>
    %247 = arith.subf %2, %246 : vector<2x128xf32>
    %248 = arith.mulf %247, %247 : vector<2x128xf32>
    %249 = vector.broadcast %243 : vector<2x1xf32> to vector<2x128xf32>
    %250 = arith.subf %4, %249 : vector<2x128xf32>
    %251 = arith.mulf %250, %250 : vector<2x128xf32>
    %252 = arith.addf %248, %251 : vector<2x128xf32>
    %253 = vector.broadcast %245 : vector<2x1xf32> to vector<2x128xf32>
    %254 = arith.subf %6, %253 : vector<2x128xf32>
    %255 = arith.mulf %254, %254 : vector<2x128xf32>
    %256 = arith.addf %252, %255 : vector<2x128xf32>
    %c0_64 = arith.constant 0 : index
    %c5 = arith.constant 5 : index
    %c0_65 = arith.constant 0 : index
    %257 = vector.load %arg5[%c0_64, %c5, %c0_65] : memref<2x8x128xf32, #tpu.memory_space<vmem>>, vector<2x1x128xf32>
    %258 = vector.shape_cast %257 : vector<2x1x128xf32> to vector<2x128xf32>
    %259 = vector.shape_cast %256 : vector<2x128xf32> to vector<2x1x128xf32>
    tpu.vector_store %arg5[%c0_64, %c5, %c0_65], %259 {strides = array<i32>} : memref<2x8x128xf32, #tpu.memory_space<vmem>>, vector<2x1x128xf32>,
    %cst_66 = arith.constant 1.000000e+00 : f32
    %cst_67 = arith.constant 0.000000e+00 : f32
    %260 = vector.broadcast %cst_66 : f32 to vector<2x128xf32>
    %261 = vector.broadcast %cst_67 : f32 to vector<2x128xf32>
    %262 = arith.select %232, %260, %261 : vector<2x128xi1>, vector<2x128xf32>
    %c0_68 = arith.constant 0 : index
    %c5_69 = arith.constant 5 : index
    %c0_70 = arith.constant 0 : index
    %263 = vector.load %arg6[%c0_68, %c5_69, %c0_70] : memref<2x8x128xf32, #tpu.memory_space<vmem>>, vector<2x1x128xf32>
    %264 = vector.shape_cast %263 : vector<2x1x128xf32> to vector<2x128xf32>
    %265 = vector.shape_cast %262 : vector<2x128xf32> to vector<2x1x128xf32>
    tpu.vector_store %arg6[%c0_68, %c5_69, %c0_70], %265 {strides = array<i32>} : memref<2x8x128xf32, #tpu.memory_space<vmem>>, vector<2x1x128xf32>,
    %266 = arith.minimumf %222, %256 : vector<2x128xf32>
    %cst_71 = arith.constant dense<0xFF800000> : vector<2xf32>
    %267 = vector.multi_reduction <maximumf>, %266, %cst_71 [1] : vector<2x128xf32> to vector<2xf32>
    %268 = vector.shape_cast %267 : vector<2xf32> to vector<2x1xf32>
    %269 = vector.broadcast %268 : vector<2x1xf32> to vector<2x128xf32>
    %270 = arith.cmpf oge, %266, %269 : vector<2x128xf32>
    %c128_i32_72 = arith.constant 128 : i32
    %271 = vector.broadcast %c128_i32_72 : i32 to vector<2x128xi32>
    %272 = arith.select %270, %7, %271 : vector<2x128xi1>, vector<2x128xi32>
    %cst_73 = arith.constant dense<2147483647> : vector<2xi32>
    %273 = vector.multi_reduction <minsi>, %272, %cst_73 [1] : vector<2x128xi32> to vector<2xi32>
    %274 = vector.shape_cast %273 : vector<2xi32> to vector<2x1xi32>
    %275 = vector.broadcast %274 : vector<2x1xi32> to vector<2x128xi32>
    %276 = arith.cmpi eq, %7, %275 : vector<2x128xi32>
    %277 = vector.shape_cast %276 : vector<2x128xi1> to vector<2x1x128xi1>
    %cst_74 = arith.constant 0.000000e+00 : f32
    %278 = vector.shape_cast %277 : vector<2x1x128xi1> to vector<2x1x128xi1>
    %279 = vector.broadcast %278 : vector<2x1x128xi1> to vector<2x3x128xi1>
    %280 = vector.broadcast %cst_74 : f32 to vector<2x3x128xf32>
    %281 = arith.select %279, %0, %280 : vector<2x3x128xi1>, vector<2x3x128xf32>
    %cst_75 = arith.constant dense<0.000000e+00> : vector<2x3xf32>
    %282 = vector.multi_reduction <add>, %281, %cst_75 [2] : vector<2x3x128xf32> to vector<2x3xf32>
    %283 = vector.shape_cast %282 : vector<2x3xf32> to vector<2x3x1xf32>
    %284 = vector.extract_strided_slice %283 {offsets = [0, 0, 0], sizes = [2, 1, 1], strides = [1, 1, 1]} : vector<2x3x1xf32> to vector<2x1x1xf32>
    %285 = vector.shape_cast %284 : vector<2x1x1xf32> to vector<2x1xf32>
    %286 = vector.extract_strided_slice %283 {offsets = [0, 1, 0], sizes = [2, 1, 1], strides = [1, 1, 1]} : vector<2x3x1xf32> to vector<2x1x1xf32>
    %287 = vector.shape_cast %286 : vector<2x1x1xf32> to vector<2x1xf32>
    %288 = vector.extract_strided_slice %283 {offsets = [0, 2, 0], sizes = [2, 1, 1], strides = [1, 1, 1]} : vector<2x3x1xf32> to vector<2x1x1xf32>
    %289 = vector.shape_cast %288 : vector<2x1x1xf32> to vector<2x1xf32>
    %290 = vector.broadcast %285 : vector<2x1xf32> to vector<2x128xf32>
    %291 = arith.subf %2, %290 : vector<2x128xf32>
    %292 = arith.mulf %291, %291 : vector<2x128xf32>
    %293 = vector.broadcast %287 : vector<2x1xf32> to vector<2x128xf32>
    %294 = arith.subf %4, %293 : vector<2x128xf32>
    %295 = arith.mulf %294, %294 : vector<2x128xf32>
    %296 = arith.addf %292, %295 : vector<2x128xf32>
    %297 = vector.broadcast %289 : vector<2x1xf32> to vector<2x128xf32>
    %298 = arith.subf %6, %297 : vector<2x128xf32>
    %299 = arith.mulf %298, %298 : vector<2x128xf32>
    %300 = arith.addf %296, %299 : vector<2x128xf32>
    %c0_76 = arith.constant 0 : index
    %c6 = arith.constant 6 : index
    %c0_77 = arith.constant 0 : index
    %301 = vector.load %arg5[%c0_76, %c6, %c0_77] : memref<2x8x128xf32, #tpu.memory_space<vmem>>, vector<2x1x128xf32>
    %302 = vector.shape_cast %301 : vector<2x1x128xf32> to vector<2x128xf32>
    %303 = vector.shape_cast %300 : vector<2x128xf32> to vector<2x1x128xf32>
    tpu.vector_store %arg5[%c0_76, %c6, %c0_77], %303 {strides = array<i32>} : memref<2x8x128xf32, #tpu.memory_space<vmem>>, vector<2x1x128xf32>,
    %cst_78 = arith.constant 1.000000e+00 : f32
    %cst_79 = arith.constant 0.000000e+00 : f32
    %304 = vector.broadcast %cst_78 : f32 to vector<2x128xf32>
    %305 = vector.broadcast %cst_79 : f32 to vector<2x128xf32>
    %306 = arith.select %276, %304, %305 : vector<2x128xi1>, vector<2x128xf32>
    %c0_80 = arith.constant 0 : index
    %c6_81 = arith.constant 6 : index
    %c0_82 = arith.constant 0 : index
    %307 = vector.load %arg6[%c0_80, %c6_81, %c0_82] : memref<2x8x128xf32, #tpu.memory_space<vmem>>, vector<2x1x128xf32>
    %308 = vector.shape_cast %307 : vector<2x1x128xf32> to vector<2x128xf32>
    %309 = vector.shape_cast %306 : vector<2x128xf32> to vector<2x1x128xf32>
    tpu.vector_store %arg6[%c0_80, %c6_81, %c0_82], %309 {strides = array<i32>} : memref<2x8x128xf32, #tpu.memory_space<vmem>>, vector<2x1x128xf32>,
    %310 = arith.minimumf %266, %300 : vector<2x128xf32>
    %cst_83 = arith.constant dense<0xFF800000> : vector<2xf32>
    %311 = vector.multi_reduction <maximumf>, %310, %cst_83 [1] : vector<2x128xf32> to vector<2xf32>
    %312 = vector.shape_cast %311 : vector<2xf32> to vector<2x1xf32>
    %313 = vector.broadcast %312 : vector<2x1xf32> to vector<2x128xf32>
    %314 = arith.cmpf oge, %310, %313 : vector<2x128xf32>
    %c128_i32_84 = arith.constant 128 : i32
    %315 = vector.broadcast %c128_i32_84 : i32 to vector<2x128xi32>
    %316 = arith.select %314, %7, %315 : vector<2x128xi1>, vector<2x128xi32>
    %cst_85 = arith.constant dense<2147483647> : vector<2xi32>
    %317 = vector.multi_reduction <minsi>, %316, %cst_85 [1] : vector<2x128xi32> to vector<2xi32>
    %318 = vector.shape_cast %317 : vector<2xi32> to vector<2x1xi32>
    %319 = vector.broadcast %318 : vector<2x1xi32> to vector<2x128xi32>
    %320 = arith.cmpi eq, %7, %319 : vector<2x128xi32>
    %321 = vector.shape_cast %320 : vector<2x128xi1> to vector<2x1x128xi1>
    %cst_86 = arith.constant 0.000000e+00 : f32
    %322 = vector.shape_cast %321 : vector<2x1x128xi1> to vector<2x1x128xi1>
    %323 = vector.broadcast %322 : vector<2x1x128xi1> to vector<2x3x128xi1>
    %324 = vector.broadcast %cst_86 : f32 to vector<2x3x128xf32>
    %325 = arith.select %323, %0, %324 : vector<2x3x128xi1>, vector<2x3x128xf32>
    %cst_87 = arith.constant dense<0.000000e+00> : vector<2x3xf32>
    %326 = vector.multi_reduction <add>, %325, %cst_87 [2] : vector<2x3x128xf32> to vector<2x3xf32>
    %327 = vector.shape_cast %326 : vector<2x3xf32> to vector<2x3x1xf32>
    %328 = vector.extract_strided_slice %327 {offsets = [0, 0, 0], sizes = [2, 1, 1], strides = [1, 1, 1]} : vector<2x3x1xf32> to vector<2x1x1xf32>
    %329 = vector.shape_cast %328 : vector<2x1x1xf32> to vector<2x1xf32>
    %330 = vector.extract_strided_slice %327 {offsets = [0, 1, 0], sizes = [2, 1, 1], strides = [1, 1, 1]} : vector<2x3x1xf32> to vector<2x1x1xf32>
    %331 = vector.shape_cast %330 : vector<2x1x1xf32> to vector<2x1xf32>
    %332 = vector.extract_strided_slice %327 {offsets = [0, 2, 0], sizes = [2, 1, 1], strides = [1, 1, 1]} : vector<2x3x1xf32> to vector<2x1x1xf32>
    %333 = vector.shape_cast %332 : vector<2x1x1xf32> to vector<2x1xf32>
    %334 = vector.broadcast %329 : vector<2x1xf32> to vector<2x128xf32>
    %335 = arith.subf %2, %334 : vector<2x128xf32>
    %336 = arith.mulf %335, %335 : vector<2x128xf32>
    %337 = vector.broadcast %331 : vector<2x1xf32> to vector<2x128xf32>
    %338 = arith.subf %4, %337 : vector<2x128xf32>
    %339 = arith.mulf %338, %338 : vector<2x128xf32>
    %340 = arith.addf %336, %339 : vector<2x128xf32>
    %341 = vector.broadcast %333 : vector<2x1xf32> to vector<2x128xf32>
    %342 = arith.subf %6, %341 : vector<2x128xf32>
    %343 = arith.mulf %342, %342 : vector<2x128xf32>
    %344 = arith.addf %340, %343 : vector<2x128xf32>
    %c0_88 = arith.constant 0 : index
    %c7 = arith.constant 7 : index
    %c0_89 = arith.constant 0 : index
    %345 = vector.load %arg5[%c0_88, %c7, %c0_89] : memref<2x8x128xf32, #tpu.memory_space<vmem>>, vector<2x1x128xf32>
    %346 = vector.shape_cast %345 : vector<2x1x128xf32> to vector<2x128xf32>
    %347 = vector.shape_cast %344 : vector<2x128xf32> to vector<2x1x128xf32>
    tpu.vector_store %arg5[%c0_88, %c7, %c0_89], %347 {strides = array<i32>} : memref<2x8x128xf32, #tpu.memory_space<vmem>>, vector<2x1x128xf32>,
    %cst_90 = arith.constant 1.000000e+00 : f32
    %cst_91 = arith.constant 0.000000e+00 : f32
    %348 = vector.broadcast %cst_90 : f32 to vector<2x128xf32>
    %349 = vector.broadcast %cst_91 : f32 to vector<2x128xf32>
    %350 = arith.select %320, %348, %349 : vector<2x128xi1>, vector<2x128xf32>
    %c0_92 = arith.constant 0 : index
    %c7_93 = arith.constant 7 : index
    %c0_94 = arith.constant 0 : index
    %351 = vector.load %arg6[%c0_92, %c7_93, %c0_94] : memref<2x8x128xf32, #tpu.memory_space<vmem>>, vector<2x1x128xf32>
    %352 = vector.shape_cast %351 : vector<2x1x128xf32> to vector<2x128xf32>
    %353 = vector.shape_cast %350 : vector<2x128xf32> to vector<2x1x128xf32>
    tpu.vector_store %arg6[%c0_92, %c7_93, %c0_94], %353 {strides = array<i32>} : memref<2x8x128xf32, #tpu.memory_space<vmem>>, vector<2x1x128xf32>,
    %354 = tpu.concatenate %19, %63, %107, %151, %195, %239, %283, %327 in 2 : vector<2x3x1xf32>, vector<2x3x1xf32>, vector<2x3x1xf32>, vector<2x3x1xf32>, vector<2x3x1xf32>, vector<2x3x1xf32>, vector<2x3x1xf32>, vector<2x3x1xf32> -> vector<2x3x8xf32>
    %c0_95 = arith.constant 0 : index
    %c0_96 = arith.constant 0 : index
    %c0_97 = arith.constant 0 : index
    %355 = vector.load %arg3[%c0_95, %c0_96, %c0_97] : memref<2x3x8xf32, #tpu.memory_space<vmem>>, vector<2x3x8xf32>
    tpu.vector_store %arg3[%c0_95, %c0_96, %c0_97], %354 {strides = array<i32>} : memref<2x3x8xf32, #tpu.memory_space<vmem>>, vector<2x3x8xf32>,
    %c0_98 = arith.constant 0 : index
    %c0_99 = arith.constant 0 : index
    %c0_100 = arith.constant 0 : index
    %356 = vector.load %arg5[%c0_98, %c0_99, %c0_100] : memref<2x8x128xf32, #tpu.memory_space<vmem>>, vector<2x8x128xf32>
    %c0_101 = arith.constant 0 : index
    %c0_102 = arith.constant 0 : index
    %c0_103 = arith.constant 0 : index
    %357 = vector.load %arg6[%c0_101, %c0_102, %c0_103] : memref<2x8x128xf32, #tpu.memory_space<vmem>>, vector<2x8x128xf32>
    %cst_104 = arith.constant dense<0x7F800000> : vector<2x8xf32>
    %358 = vector.multi_reduction <minimumf>, %356, %cst_104 [2] : vector<2x8x128xf32> to vector<2x8xf32>
    %359 = vector.shape_cast %358 : vector<2x8xf32> to vector<2x8x1xf32>
    %360 = vector.broadcast %359 : vector<2x8x1xf32> to vector<2x8x128xf32>
    %361 = arith.cmpf ole, %356, %360 : vector<2x8x128xf32>
    %c128_i32_105 = arith.constant 128 : i32
    %362 = vector.broadcast %c128_i32_105 : i32 to vector<2x8x128xi32>
    %363 = arith.select %361, %8, %362 : vector<2x8x128xi1>, vector<2x8x128xi32>
    %cst_106 = arith.constant dense<2147483647> : vector<2x8xi32>
    %364 = vector.multi_reduction <minsi>, %363, %cst_106 [2] : vector<2x8x128xi32> to vector<2x8xi32>
    %365 = vector.shape_cast %364 : vector<2x8xi32> to vector<2x8x1xi32>
    %366 = vector.broadcast %365 : vector<2x8x1xi32> to vector<2x8x128xi32>
    %367 = arith.cmpi eq, %8, %366 : vector<2x8x128xi32>
    %cst_107 = arith.constant 1.000000e+30 : f32
    %368 = vector.broadcast %cst_107 : f32 to vector<2x8x128xf32>
    %369 = arith.select %367, %368, %356 : vector<2x8x128xi1>, vector<2x8x128xf32>
    %cst_108 = arith.constant 1.000000e+00 : f32
    %cst_109 = arith.constant 0.000000e+00 : f32
    %370 = vector.broadcast %cst_108 : f32 to vector<2x8x128xf32>
    %371 = vector.broadcast %cst_109 : f32 to vector<2x8x128xf32>
    %372 = arith.select %367, %370, %371 : vector<2x8x128xi1>, vector<2x8x128xf32>
    %373 = arith.subf %372, %357 : vector<2x8x128xf32>
    %c0_110 = arith.constant 0 : index
    %c0_111 = arith.constant 0 : index
    %c0_112 = arith.constant 0 : index
    %374 = vector.load %arg4[%c0_110, %c0_111, %c0_112] : memref<2x128x128xf32, #tpu.memory_space<vmem>>, vector<2x8x128xf32>
    tpu.vector_store %arg4[%c0_110, %c0_111, %c0_112], %373 {strides = array<i32>} : memref<2x128x128xf32, #tpu.memory_space<vmem>>, vector<2x8x128xf32>,
    %cst_113 = arith.constant dense<0x7F800000> : vector<2x8xf32>
    %375 = vector.multi_reduction <minimumf>, %369, %cst_113 [2] : vector<2x8x128xf32> to vector<2x8xf32>
    %376 = vector.shape_cast %375 : vector<2x8xf32> to vector<2x8x1xf32>
    %377 = vector.broadcast %376 : vector<2x8x1xf32> to vector<2x8x128xf32>
    %378 = arith.cmpf ole, %369, %377 : vector<2x8x128xf32>
    %c128_i32_114 = arith.constant 128 : i32
    %379 = vector.broadcast %c128_i32_114 : i32 to vector<2x8x128xi32>
    %380 = arith.select %378, %8, %379 : vector<2x8x128xi1>, vector<2x8x128xi32>
    %cst_115 = arith.constant dense<2147483647> : vector<2x8xi32>
    %381 = vector.multi_reduction <minsi>, %380, %cst_115 [2] : vector<2x8x128xi32> to vector<2x8xi32>
    %382 = vector.shape_cast %381 : vector<2x8xi32> to vector<2x8x1xi32>
    %383 = vector.broadcast %382 : vector<2x8x1xi32> to vector<2x8x128xi32>
    %384 = arith.cmpi eq, %8, %383 : vector<2x8x128xi32>
    %cst_116 = arith.constant 1.000000e+30 : f32
    %385 = vector.broadcast %cst_116 : f32 to vector<2x8x128xf32>
    %386 = arith.select %384, %385, %369 : vector<2x8x128xi1>, vector<2x8x128xf32>
    %cst_117 = arith.constant 1.000000e+00 : f32
    %cst_118 = arith.constant 0.000000e+00 : f32
    %387 = vector.broadcast %cst_117 : f32 to vector<2x8x128xf32>
    %388 = vector.broadcast %cst_118 : f32 to vector<2x8x128xf32>
    %389 = arith.select %384, %387, %388 : vector<2x8x128xi1>, vector<2x8x128xf32>
    %390 = arith.subf %389, %357 : vector<2x8x128xf32>
    %c0_119 = arith.constant 0 : index
    %c8 = arith.constant 8 : index
    %c0_120 = arith.constant 0 : index
    %391 = vector.load %arg4[%c0_119, %c8, %c0_120] : memref<2x128x128xf32, #tpu.memory_space<vmem>>, vector<2x8x128xf32>
    tpu.vector_store %arg4[%c0_119, %c8, %c0_120], %390 {strides = array<i32>} : memref<2x128x128xf32, #tpu.memory_space<vmem>>, vector<2x8x128xf32>,
    %cst_121 = arith.constant dense<0x7F800000> : vector<2x8xf32>
    %392 = vector.multi_reduction <minimumf>, %386, %cst_121 [2] : vector<2x8x128xf32> to vector<2x8xf32>
    %393 = vector.shape_cast %392 : vector<2x8xf32> to vector<2x8x1xf32>
    %394 = vector.broadcast %393 : vector<2x8x1xf32> to vector<2x8x128xf32>
    %395 = arith.cmpf ole, %386, %394 : vector<2x8x128xf32>
    %c128_i32_122 = arith.constant 128 : i32
    %396 = vector.broadcast %c128_i32_122 : i32 to vector<2x8x128xi32>
    %397 = arith.select %395, %8, %396 : vector<2x8x128xi1>, vector<2x8x128xi32>
    %cst_123 = arith.constant dense<2147483647> : vector<2x8xi32>
    %398 = vector.multi_reduction <minsi>, %397, %cst_123 [2] : vector<2x8x128xi32> to vector<2x8xi32>
    %399 = vector.shape_cast %398 : vector<2x8xi32> to vector<2x8x1xi32>
    %400 = vector.broadcast %399 : vector<2x8x1xi32> to vector<2x8x128xi32>
    %401 = arith.cmpi eq, %8, %400 : vector<2x8x128xi32>
    %cst_124 = arith.constant 1.000000e+30 : f32
    %402 = vector.broadcast %cst_124 : f32 to vector<2x8x128xf32>
    %403 = arith.select %401, %402, %386 : vector<2x8x128xi1>, vector<2x8x128xf32>
    %cst_125 = arith.constant 1.000000e+00 : f32
    %cst_126 = arith.constant 0.000000e+00 : f32
    %404 = vector.broadcast %cst_125 : f32 to vector<2x8x128xf32>
    %405 = vector.broadcast %cst_126 : f32 to vector<2x8x128xf32>
    %406 = arith.select %401, %404, %405 : vector<2x8x128xi1>, vector<2x8x128xf32>
    %407 = arith.subf %406, %357 : vector<2x8x128xf32>
    %c0_127 = arith.constant 0 : index
    %c16 = arith.constant 16 : index
    %c0_128 = arith.constant 0 : index
    %408 = vector.load %arg4[%c0_127, %c16, %c0_128] : memref<2x128x128xf32, #tpu.memory_space<vmem>>, vector<2x8x128xf32>
    tpu.vector_store %arg4[%c0_127, %c16, %c0_128], %407 {strides = array<i32>} : memref<2x128x128xf32, #tpu.memory_space<vmem>>, vector<2x8x128xf32>,
    %cst_129 = arith.constant dense<0x7F800000> : vector<2x8xf32>
    %409 = vector.multi_reduction <minimumf>, %403, %cst_129 [2] : vector<2x8x128xf32> to vector<2x8xf32>
    %410 = vector.shape_cast %409 : vector<2x8xf32> to vector<2x8x1xf32>
    %411 = vector.broadcast %410 : vector<2x8x1xf32> to vector<2x8x128xf32>
    %412 = arith.cmpf ole, %403, %411 : vector<2x8x128xf32>
    %c128_i32_130 = arith.constant 128 : i32
    %413 = vector.broadcast %c128_i32_130 : i32 to vector<2x8x128xi32>
    %414 = arith.select %412, %8, %413 : vector<2x8x128xi1>, vector<2x8x128xi32>
    %cst_131 = arith.constant dense<2147483647> : vector<2x8xi32>
    %415 = vector.multi_reduction <minsi>, %414, %cst_131 [2] : vector<2x8x128xi32> to vector<2x8xi32>
    %416 = vector.shape_cast %415 : vector<2x8xi32> to vector<2x8x1xi32>
    %417 = vector.broadcast %416 : vector<2x8x1xi32> to vector<2x8x128xi32>
    %418 = arith.cmpi eq, %8, %417 : vector<2x8x128xi32>
    %cst_132 = arith.constant 1.000000e+30 : f32
    %419 = vector.broadcast %cst_132 : f32 to vector<2x8x128xf32>
    %420 = arith.select %418, %419, %403 : vector<2x8x128xi1>, vector<2x8x128xf32>
    %cst_133 = arith.constant 1.000000e+00 : f32
    %cst_134 = arith.constant 0.000000e+00 : f32
    %421 = vector.broadcast %cst_133 : f32 to vector<2x8x128xf32>
    %422 = vector.broadcast %cst_134 : f32 to vector<2x8x128xf32>
    %423 = arith.select %418, %421, %422 : vector<2x8x128xi1>, vector<2x8x128xf32>
    %424 = arith.subf %423, %357 : vector<2x8x128xf32>
    %c0_135 = arith.constant 0 : index
    %c24 = arith.constant 24 : index
    %c0_136 = arith.constant 0 : index
    %425 = vector.load %arg4[%c0_135, %c24, %c0_136] : memref<2x128x128xf32, #tpu.memory_space<vmem>>, vector<2x8x128xf32>
    tpu.vector_store %arg4[%c0_135, %c24, %c0_136], %424 {strides = array<i32>} : memref<2x128x128xf32, #tpu.memory_space<vmem>>, vector<2x8x128xf32>,
    %cst_137 = arith.constant dense<0x7F800000> : vector<2x8xf32>
    %426 = vector.multi_reduction <minimumf>, %420, %cst_137 [2] : vector<2x8x128xf32> to vector<2x8xf32>
    %427 = vector.shape_cast %426 : vector<2x8xf32> to vector<2x8x1xf32>
    %428 = vector.broadcast %427 : vector<2x8x1xf32> to vector<2x8x128xf32>
    %429 = arith.cmpf ole, %420, %428 : vector<2x8x128xf32>
    %c128_i32_138 = arith.constant 128 : i32
    %430 = vector.broadcast %c128_i32_138 : i32 to vector<2x8x128xi32>
    %431 = arith.select %429, %8, %430 : vector<2x8x128xi1>, vector<2x8x128xi32>
    %cst_139 = arith.constant dense<2147483647> : vector<2x8xi32>
    %432 = vector.multi_reduction <minsi>, %431, %cst_139 [2] : vector<2x8x128xi32> to vector<2x8xi32>
    %433 = vector.shape_cast %432 : vector<2x8xi32> to vector<2x8x1xi32>
    %434 = vector.broadcast %433 : vector<2x8x1xi32> to vector<2x8x128xi32>
    %435 = arith.cmpi eq, %8, %434 : vector<2x8x128xi32>
    %cst_140 = arith.constant 1.000000e+30 : f32
    %436 = vector.broadcast %cst_140 : f32 to vector<2x8x128xf32>
    %437 = arith.select %435, %436, %420 : vector<2x8x128xi1>, vector<2x8x128xf32>
    %cst_141 = arith.constant 1.000000e+00 : f32
    %cst_142 = arith.constant 0.000000e+00 : f32
    %438 = vector.broadcast %cst_141 : f32 to vector<2x8x128xf32>
    %439 = vector.broadcast %cst_142 : f32 to vector<2x8x128xf32>
    %440 = arith.select %435, %438, %439 : vector<2x8x128xi1>, vector<2x8x128xf32>
    %441 = arith.subf %440, %357 : vector<2x8x128xf32>
    %c0_143 = arith.constant 0 : index
    %c32 = arith.constant 32 : index
    %c0_144 = arith.constant 0 : index
    %442 = vector.load %arg4[%c0_143, %c32, %c0_144] : memref<2x128x128xf32, #tpu.memory_space<vmem>>, vector<2x8x128xf32>
    tpu.vector_store %arg4[%c0_143, %c32, %c0_144], %441 {strides = array<i32>} : memref<2x128x128xf32, #tpu.memory_space<vmem>>, vector<2x8x128xf32>,
    %cst_145 = arith.constant dense<0x7F800000> : vector<2x8xf32>
    %443 = vector.multi_reduction <minimumf>, %437, %cst_145 [2] : vector<2x8x128xf32> to vector<2x8xf32>
    %444 = vector.shape_cast %443 : vector<2x8xf32> to vector<2x8x1xf32>
    %445 = vector.broadcast %444 : vector<2x8x1xf32> to vector<2x8x128xf32>
    %446 = arith.cmpf ole, %437, %445 : vector<2x8x128xf32>
    %c128_i32_146 = arith.constant 128 : i32
    %447 = vector.broadcast %c128_i32_146 : i32 to vector<2x8x128xi32>
    %448 = arith.select %446, %8, %447 : vector<2x8x128xi1>, vector<2x8x128xi32>
    %cst_147 = arith.constant dense<2147483647> : vector<2x8xi32>
    %449 = vector.multi_reduction <minsi>, %448, %cst_147 [2] : vector<2x8x128xi32> to vector<2x8xi32>
    %450 = vector.shape_cast %449 : vector<2x8xi32> to vector<2x8x1xi32>
    %451 = vector.broadcast %450 : vector<2x8x1xi32> to vector<2x8x128xi32>
    %452 = arith.cmpi eq, %8, %451 : vector<2x8x128xi32>
    %cst_148 = arith.constant 1.000000e+30 : f32
    %453 = vector.broadcast %cst_148 : f32 to vector<2x8x128xf32>
    %454 = arith.select %452, %453, %437 : vector<2x8x128xi1>, vector<2x8x128xf32>
    %cst_149 = arith.constant 1.000000e+00 : f32
    %cst_150 = arith.constant 0.000000e+00 : f32
    %455 = vector.broadcast %cst_149 : f32 to vector<2x8x128xf32>
    %456 = vector.broadcast %cst_150 : f32 to vector<2x8x128xf32>
    %457 = arith.select %452, %455, %456 : vector<2x8x128xi1>, vector<2x8x128xf32>
    %458 = arith.subf %457, %357 : vector<2x8x128xf32>
    %c0_151 = arith.constant 0 : index
    %c40 = arith.constant 40 : index
    %c0_152 = arith.constant 0 : index
    %459 = vector.load %arg4[%c0_151, %c40, %c0_152] : memref<2x128x128xf32, #tpu.memory_space<vmem>>, vector<2x8x128xf32>
    tpu.vector_store %arg4[%c0_151, %c40, %c0_152], %458 {strides = array<i32>} : memref<2x128x128xf32, #tpu.memory_space<vmem>>, vector<2x8x128xf32>,
    %cst_153 = arith.constant dense<0x7F800000> : vector<2x8xf32>
    %460 = vector.multi_reduction <minimumf>, %454, %cst_153 [2] : vector<2x8x128xf32> to vector<2x8xf32>
    %461 = vector.shape_cast %460 : vector<2x8xf32> to vector<2x8x1xf32>
    %462 = vector.broadcast %461 : vector<2x8x1xf32> to vector<2x8x128xf32>
    %463 = arith.cmpf ole, %454, %462 : vector<2x8x128xf32>
    %c128_i32_154 = arith.constant 128 : i32
    %464 = vector.broadcast %c128_i32_154 : i32 to vector<2x8x128xi32>
    %465 = arith.select %463, %8, %464 : vector<2x8x128xi1>, vector<2x8x128xi32>
    %cst_155 = arith.constant dense<2147483647> : vector<2x8xi32>
    %466 = vector.multi_reduction <minsi>, %465, %cst_155 [2] : vector<2x8x128xi32> to vector<2x8xi32>
    %467 = vector.shape_cast %466 : vector<2x8xi32> to vector<2x8x1xi32>
    %468 = vector.broadcast %467 : vector<2x8x1xi32> to vector<2x8x128xi32>
    %469 = arith.cmpi eq, %8, %468 : vector<2x8x128xi32>
    %cst_156 = arith.constant 1.000000e+30 : f32
    %470 = vector.broadcast %cst_156 : f32 to vector<2x8x128xf32>
    %471 = arith.select %469, %470, %454 : vector<2x8x128xi1>, vector<2x8x128xf32>
    %cst_157 = arith.constant 1.000000e+00 : f32
    %cst_158 = arith.constant 0.000000e+00 : f32
    %472 = vector.broadcast %cst_157 : f32 to vector<2x8x128xf32>
    %473 = vector.broadcast %cst_158 : f32 to vector<2x8x128xf32>
    %474 = arith.select %469, %472, %473 : vector<2x8x128xi1>, vector<2x8x128xf32>
    %475 = arith.subf %474, %357 : vector<2x8x128xf32>
    %c0_159 = arith.constant 0 : index
    %c48 = arith.constant 48 : index
    %c0_160 = arith.constant 0 : index
    %476 = vector.load %arg4[%c0_159, %c48, %c0_160] : memref<2x128x128xf32, #tpu.memory_space<vmem>>, vector<2x8x128xf32>
    tpu.vector_store %arg4[%c0_159, %c48, %c0_160], %475 {strides = array<i32>} : memref<2x128x128xf32, #tpu.memory_space<vmem>>, vector<2x8x128xf32>,
    %cst_161 = arith.constant dense<0x7F800000> : vector<2x8xf32>
    %477 = vector.multi_reduction <minimumf>, %471, %cst_161 [2] : vector<2x8x128xf32> to vector<2x8xf32>
    %478 = vector.shape_cast %477 : vector<2x8xf32> to vector<2x8x1xf32>
    %479 = vector.broadcast %478 : vector<2x8x1xf32> to vector<2x8x128xf32>
    %480 = arith.cmpf ole, %471, %479 : vector<2x8x128xf32>
    %c128_i32_162 = arith.constant 128 : i32
    %481 = vector.broadcast %c128_i32_162 : i32 to vector<2x8x128xi32>
    %482 = arith.select %480, %8, %481 : vector<2x8x128xi1>, vector<2x8x128xi32>
    %cst_163 = arith.constant dense<2147483647> : vector<2x8xi32>
    %483 = vector.multi_reduction <minsi>, %482, %cst_163 [2] : vector<2x8x128xi32> to vector<2x8xi32>
    %484 = vector.shape_cast %483 : vector<2x8xi32> to vector<2x8x1xi32>
    %485 = vector.broadcast %484 : vector<2x8x1xi32> to vector<2x8x128xi32>
    %486 = arith.cmpi eq, %8, %485 : vector<2x8x128xi32>
    %cst_164 = arith.constant 1.000000e+30 : f32
    %487 = vector.broadcast %cst_164 : f32 to vector<2x8x128xf32>
    %488 = arith.select %486, %487, %471 : vector<2x8x128xi1>, vector<2x8x128xf32>
    %cst_165 = arith.constant 1.000000e+00 : f32
    %cst_166 = arith.constant 0.000000e+00 : f32
    %489 = vector.broadcast %cst_165 : f32 to vector<2x8x128xf32>
    %490 = vector.broadcast %cst_166 : f32 to vector<2x8x128xf32>
    %491 = arith.select %486, %489, %490 : vector<2x8x128xi1>, vector<2x8x128xf32>
    %492 = arith.subf %491, %357 : vector<2x8x128xf32>
    %c0_167 = arith.constant 0 : index
    %c56 = arith.constant 56 : index
    %c0_168 = arith.constant 0 : index
    %493 = vector.load %arg4[%c0_167, %c56, %c0_168] : memref<2x128x128xf32, #tpu.memory_space<vmem>>, vector<2x8x128xf32>
    tpu.vector_store %arg4[%c0_167, %c56, %c0_168], %492 {strides = array<i32>} : memref<2x128x128xf32, #tpu.memory_space<vmem>>, vector<2x8x128xf32>,
    %cst_169 = arith.constant dense<0x7F800000> : vector<2x8xf32>
    %494 = vector.multi_reduction <minimumf>, %488, %cst_169 [2] : vector<2x8x128xf32> to vector<2x8xf32>
    %495 = vector.shape_cast %494 : vector<2x8xf32> to vector<2x8x1xf32>
    %496 = vector.broadcast %495 : vector<2x8x1xf32> to vector<2x8x128xf32>
    %497 = arith.cmpf ole, %488, %496 : vector<2x8x128xf32>
    %c128_i32_170 = arith.constant 128 : i32
    %498 = vector.broadcast %c128_i32_170 : i32 to vector<2x8x128xi32>
    %499 = arith.select %497, %8, %498 : vector<2x8x128xi1>, vector<2x8x128xi32>
    %cst_171 = arith.constant dense<2147483647> : vector<2x8xi32>
    %500 = vector.multi_reduction <minsi>, %499, %cst_171 [2] : vector<2x8x128xi32> to vector<2x8xi32>
    %501 = vector.shape_cast %500 : vector<2x8xi32> to vector<2x8x1xi32>
    %502 = vector.broadcast %501 : vector<2x8x1xi32> to vector<2x8x128xi32>
    %503 = arith.cmpi eq, %8, %502 : vector<2x8x128xi32>
    %cst_172 = arith.constant 1.000000e+30 : f32
    %504 = vector.broadcast %cst_172 : f32 to vector<2x8x128xf32>
    %505 = arith.select %503, %504, %488 : vector<2x8x128xi1>, vector<2x8x128xf32>
    %cst_173 = arith.constant 1.000000e+00 : f32
    %cst_174 = arith.constant 0.000000e+00 : f32
    %506 = vector.broadcast %cst_173 : f32 to vector<2x8x128xf32>
    %507 = vector.broadcast %cst_174 : f32 to vector<2x8x128xf32>
    %508 = arith.select %503, %506, %507 : vector<2x8x128xi1>, vector<2x8x128xf32>
    %509 = arith.subf %508, %357 : vector<2x8x128xf32>
    %c0_175 = arith.constant 0 : index
    %c64 = arith.constant 64 : index
    %c0_176 = arith.constant 0 : index
    %510 = vector.load %arg4[%c0_175, %c64, %c0_176] : memref<2x128x128xf32, #tpu.memory_space<vmem>>, vector<2x8x128xf32>
    tpu.vector_store %arg4[%c0_175, %c64, %c0_176], %509 {strides = array<i32>} : memref<2x128x128xf32, #tpu.memory_space<vmem>>, vector<2x8x128xf32>,
    %cst_177 = arith.constant dense<0x7F800000> : vector<2x8xf32>
    %511 = vector.multi_reduction <minimumf>, %505, %cst_177 [2] : vector<2x8x128xf32> to vector<2x8xf32>
    %512 = vector.shape_cast %511 : vector<2x8xf32> to vector<2x8x1xf32>
    %513 = vector.broadcast %512 : vector<2x8x1xf32> to vector<2x8x128xf32>
    %514 = arith.cmpf ole, %505, %513 : vector<2x8x128xf32>
    %c128_i32_178 = arith.constant 128 : i32
    %515 = vector.broadcast %c128_i32_178 : i32 to vector<2x8x128xi32>
    %516 = arith.select %514, %8, %515 : vector<2x8x128xi1>, vector<2x8x128xi32>
    %cst_179 = arith.constant dense<2147483647> : vector<2x8xi32>
    %517 = vector.multi_reduction <minsi>, %516, %cst_179 [2] : vector<2x8x128xi32> to vector<2x8xi32>
    %518 = vector.shape_cast %517 : vector<2x8xi32> to vector<2x8x1xi32>
    %519 = vector.broadcast %518 : vector<2x8x1xi32> to vector<2x8x128xi32>
    %520 = arith.cmpi eq, %8, %519 : vector<2x8x128xi32>
    %cst_180 = arith.constant 1.000000e+30 : f32
    %521 = vector.broadcast %cst_180 : f32 to vector<2x8x128xf32>
    %522 = arith.select %520, %521, %505 : vector<2x8x128xi1>, vector<2x8x128xf32>
    %cst_181 = arith.constant 1.000000e+00 : f32
    %cst_182 = arith.constant 0.000000e+00 : f32
    %523 = vector.broadcast %cst_181 : f32 to vector<2x8x128xf32>
    %524 = vector.broadcast %cst_182 : f32 to vector<2x8x128xf32>
    %525 = arith.select %520, %523, %524 : vector<2x8x128xi1>, vector<2x8x128xf32>
    %526 = arith.subf %525, %357 : vector<2x8x128xf32>
    %c0_183 = arith.constant 0 : index
    %c72 = arith.constant 72 : index
    %c0_184 = arith.constant 0 : index
    %527 = vector.load %arg4[%c0_183, %c72, %c0_184] : memref<2x128x128xf32, #tpu.memory_space<vmem>>, vector<2x8x128xf32>
    tpu.vector_store %arg4[%c0_183, %c72, %c0_184], %526 {strides = array<i32>} : memref<2x128x128xf32, #tpu.memory_space<vmem>>, vector<2x8x128xf32>,
    %cst_185 = arith.constant dense<0x7F800000> : vector<2x8xf32>
    %528 = vector.multi_reduction <minimumf>, %522, %cst_185 [2] : vector<2x8x128xf32> to vector<2x8xf32>
    %529 = vector.shape_cast %528 : vector<2x8xf32> to vector<2x8x1xf32>
    %530 = vector.broadcast %529 : vector<2x8x1xf32> to vector<2x8x128xf32>
    %531 = arith.cmpf ole, %522, %530 : vector<2x8x128xf32>
    %c128_i32_186 = arith.constant 128 : i32
    %532 = vector.broadcast %c128_i32_186 : i32 to vector<2x8x128xi32>
    %533 = arith.select %531, %8, %532 : vector<2x8x128xi1>, vector<2x8x128xi32>
    %cst_187 = arith.constant dense<2147483647> : vector<2x8xi32>
    %534 = vector.multi_reduction <minsi>, %533, %cst_187 [2] : vector<2x8x128xi32> to vector<2x8xi32>
    %535 = vector.shape_cast %534 : vector<2x8xi32> to vector<2x8x1xi32>
    %536 = vector.broadcast %535 : vector<2x8x1xi32> to vector<2x8x128xi32>
    %537 = arith.cmpi eq, %8, %536 : vector<2x8x128xi32>
    %cst_188 = arith.constant 1.000000e+30 : f32
    %538 = vector.broadcast %cst_188 : f32 to vector<2x8x128xf32>
    %539 = arith.select %537, %538, %522 : vector<2x8x128xi1>, vector<2x8x128xf32>
    %cst_189 = arith.constant 1.000000e+00 : f32
    %cst_190 = arith.constant 0.000000e+00 : f32
    %540 = vector.broadcast %cst_189 : f32 to vector<2x8x128xf32>
    %541 = vector.broadcast %cst_190 : f32 to vector<2x8x128xf32>
    %542 = arith.select %537, %540, %541 : vector<2x8x128xi1>, vector<2x8x128xf32>
    %543 = arith.subf %542, %357 : vector<2x8x128xf32>
    %c0_191 = arith.constant 0 : index
    %c80 = arith.constant 80 : index
    %c0_192 = arith.constant 0 : index
    %544 = vector.load %arg4[%c0_191, %c80, %c0_192] : memref<2x128x128xf32, #tpu.memory_space<vmem>>, vector<2x8x128xf32>
    tpu.vector_store %arg4[%c0_191, %c80, %c0_192], %543 {strides = array<i32>} : memref<2x128x128xf32, #tpu.memory_space<vmem>>, vector<2x8x128xf32>,
    %cst_193 = arith.constant dense<0x7F800000> : vector<2x8xf32>
    %545 = vector.multi_reduction <minimumf>, %539, %cst_193 [2] : vector<2x8x128xf32> to vector<2x8xf32>
    %546 = vector.shape_cast %545 : vector<2x8xf32> to vector<2x8x1xf32>
    %547 = vector.broadcast %546 : vector<2x8x1xf32> to vector<2x8x128xf32>
    %548 = arith.cmpf ole, %539, %547 : vector<2x8x128xf32>
    %c128_i32_194 = arith.constant 128 : i32
    %549 = vector.broadcast %c128_i32_194 : i32 to vector<2x8x128xi32>
    %550 = arith.select %548, %8, %549 : vector<2x8x128xi1>, vector<2x8x128xi32>
    %cst_195 = arith.constant dense<2147483647> : vector<2x8xi32>
    %551 = vector.multi_reduction <minsi>, %550, %cst_195 [2] : vector<2x8x128xi32> to vector<2x8xi32>
    %552 = vector.shape_cast %551 : vector<2x8xi32> to vector<2x8x1xi32>
    %553 = vector.broadcast %552 : vector<2x8x1xi32> to vector<2x8x128xi32>
    %554 = arith.cmpi eq, %8, %553 : vector<2x8x128xi32>
    %cst_196 = arith.constant 1.000000e+30 : f32
    %555 = vector.broadcast %cst_196 : f32 to vector<2x8x128xf32>
    %556 = arith.select %554, %555, %539 : vector<2x8x128xi1>, vector<2x8x128xf32>
    %cst_197 = arith.constant 1.000000e+00 : f32
    %cst_198 = arith.constant 0.000000e+00 : f32
    %557 = vector.broadcast %cst_197 : f32 to vector<2x8x128xf32>
    %558 = vector.broadcast %cst_198 : f32 to vector<2x8x128xf32>
    %559 = arith.select %554, %557, %558 : vector<2x8x128xi1>, vector<2x8x128xf32>
    %560 = arith.subf %559, %357 : vector<2x8x128xf32>
    %c0_199 = arith.constant 0 : index
    %c88 = arith.constant 88 : index
    %c0_200 = arith.constant 0 : index
    %561 = vector.load %arg4[%c0_199, %c88, %c0_200] : memref<2x128x128xf32, #tpu.memory_space<vmem>>, vector<2x8x128xf32>
    tpu.vector_store %arg4[%c0_199, %c88, %c0_200], %560 {strides = array<i32>} : memref<2x128x128xf32, #tpu.memory_space<vmem>>, vector<2x8x128xf32>,
    %cst_201 = arith.constant dense<0x7F800000> : vector<2x8xf32>
    %562 = vector.multi_reduction <minimumf>, %556, %cst_201 [2] : vector<2x8x128xf32> to vector<2x8xf32>
    %563 = vector.shape_cast %562 : vector<2x8xf32> to vector<2x8x1xf32>
    %564 = vector.broadcast %563 : vector<2x8x1xf32> to vector<2x8x128xf32>
    %565 = arith.cmpf ole, %556, %564 : vector<2x8x128xf32>
    %c128_i32_202 = arith.constant 128 : i32
    %566 = vector.broadcast %c128_i32_202 : i32 to vector<2x8x128xi32>
    %567 = arith.select %565, %8, %566 : vector<2x8x128xi1>, vector<2x8x128xi32>
    %cst_203 = arith.constant dense<2147483647> : vector<2x8xi32>
    %568 = vector.multi_reduction <minsi>, %567, %cst_203 [2] : vector<2x8x128xi32> to vector<2x8xi32>
    %569 = vector.shape_cast %568 : vector<2x8xi32> to vector<2x8x1xi32>
    %570 = vector.broadcast %569 : vector<2x8x1xi32> to vector<2x8x128xi32>
    %571 = arith.cmpi eq, %8, %570 : vector<2x8x128xi32>
    %cst_204 = arith.constant 1.000000e+30 : f32
    %572 = vector.broadcast %cst_204 : f32 to vector<2x8x128xf32>
    %573 = arith.select %571, %572, %556 : vector<2x8x128xi1>, vector<2x8x128xf32>
    %cst_205 = arith.constant 1.000000e+00 : f32
    %cst_206 = arith.constant 0.000000e+00 : f32
    %574 = vector.broadcast %cst_205 : f32 to vector<2x8x128xf32>
    %575 = vector.broadcast %cst_206 : f32 to vector<2x8x128xf32>
    %576 = arith.select %571, %574, %575 : vector<2x8x128xi1>, vector<2x8x128xf32>
    %577 = arith.subf %576, %357 : vector<2x8x128xf32>
    %c0_207 = arith.constant 0 : index
    %c96 = arith.constant 96 : index
    %c0_208 = arith.constant 0 : index
    %578 = vector.load %arg4[%c0_207, %c96, %c0_208] : memref<2x128x128xf32, #tpu.memory_space<vmem>>, vector<2x8x128xf32>
    tpu.vector_store %arg4[%c0_207, %c96, %c0_208], %577 {strides = array<i32>} : memref<2x128x128xf32, #tpu.memory_space<vmem>>, vector<2x8x128xf32>,
    %cst_209 = arith.constant dense<0x7F800000> : vector<2x8xf32>
    %579 = vector.multi_reduction <minimumf>, %573, %cst_209 [2] : vector<2x8x128xf32> to vector<2x8xf32>
    %580 = vector.shape_cast %579 : vector<2x8xf32> to vector<2x8x1xf32>
    %581 = vector.broadcast %580 : vector<2x8x1xf32> to vector<2x8x128xf32>
    %582 = arith.cmpf ole, %573, %581 : vector<2x8x128xf32>
    %c128_i32_210 = arith.constant 128 : i32
    %583 = vector.broadcast %c128_i32_210 : i32 to vector<2x8x128xi32>
    %584 = arith.select %582, %8, %583 : vector<2x8x128xi1>, vector<2x8x128xi32>
    %cst_211 = arith.constant dense<2147483647> : vector<2x8xi32>
    %585 = vector.multi_reduction <minsi>, %584, %cst_211 [2] : vector<2x8x128xi32> to vector<2x8xi32>
    %586 = vector.shape_cast %585 : vector<2x8xi32> to vector<2x8x1xi32>
    %587 = vector.broadcast %586 : vector<2x8x1xi32> to vector<2x8x128xi32>
    %588 = arith.cmpi eq, %8, %587 : vector<2x8x128xi32>
    %cst_212 = arith.constant 1.000000e+30 : f32
    %589 = vector.broadcast %cst_212 : f32 to vector<2x8x128xf32>
    %590 = arith.select %588, %589, %573 : vector<2x8x128xi1>, vector<2x8x128xf32>
    %cst_213 = arith.constant 1.000000e+00 : f32
    %cst_214 = arith.constant 0.000000e+00 : f32
    %591 = vector.broadcast %cst_213 : f32 to vector<2x8x128xf32>
    %592 = vector.broadcast %cst_214 : f32 to vector<2x8x128xf32>
    %593 = arith.select %588, %591, %592 : vector<2x8x128xi1>, vector<2x8x128xf32>
    %594 = arith.subf %593, %357 : vector<2x8x128xf32>
    %c0_215 = arith.constant 0 : index
    %c104 = arith.constant 104 : index
    %c0_216 = arith.constant 0 : index
    %595 = vector.load %arg4[%c0_215, %c104, %c0_216] : memref<2x128x128xf32, #tpu.memory_space<vmem>>, vector<2x8x128xf32>
    tpu.vector_store %arg4[%c0_215, %c104, %c0_216], %594 {strides = array<i32>} : memref<2x128x128xf32, #tpu.memory_space<vmem>>, vector<2x8x128xf32>,
    %cst_217 = arith.constant dense<0x7F800000> : vector<2x8xf32>
    %596 = vector.multi_reduction <minimumf>, %590, %cst_217 [2] : vector<2x8x128xf32> to vector<2x8xf32>
    %597 = vector.shape_cast %596 : vector<2x8xf32> to vector<2x8x1xf32>
    %598 = vector.broadcast %597 : vector<2x8x1xf32> to vector<2x8x128xf32>
    %599 = arith.cmpf ole, %590, %598 : vector<2x8x128xf32>
    %c128_i32_218 = arith.constant 128 : i32
    %600 = vector.broadcast %c128_i32_218 : i32 to vector<2x8x128xi32>
    %601 = arith.select %599, %8, %600 : vector<2x8x128xi1>, vector<2x8x128xi32>
    %cst_219 = arith.constant dense<2147483647> : vector<2x8xi32>
    %602 = vector.multi_reduction <minsi>, %601, %cst_219 [2] : vector<2x8x128xi32> to vector<2x8xi32>
    %603 = vector.shape_cast %602 : vector<2x8xi32> to vector<2x8x1xi32>
    %604 = vector.broadcast %603 : vector<2x8x1xi32> to vector<2x8x128xi32>
    %605 = arith.cmpi eq, %8, %604 : vector<2x8x128xi32>
    %cst_220 = arith.constant 1.000000e+30 : f32
    %606 = vector.broadcast %cst_220 : f32 to vector<2x8x128xf32>
    %607 = arith.select %605, %606, %590 : vector<2x8x128xi1>, vector<2x8x128xf32>
    %cst_221 = arith.constant 1.000000e+00 : f32
    %cst_222 = arith.constant 0.000000e+00 : f32
    %608 = vector.broadcast %cst_221 : f32 to vector<2x8x128xf32>
    %609 = vector.broadcast %cst_222 : f32 to vector<2x8x128xf32>
    %610 = arith.select %605, %608, %609 : vector<2x8x128xi1>, vector<2x8x128xf32>
    %611 = arith.subf %610, %357 : vector<2x8x128xf32>
    %c0_223 = arith.constant 0 : index
    %c112 = arith.constant 112 : index
    %c0_224 = arith.constant 0 : index
    %612 = vector.load %arg4[%c0_223, %c112, %c0_224] : memref<2x128x128xf32, #tpu.memory_space<vmem>>, vector<2x8x128xf32>
    tpu.vector_store %arg4[%c0_223, %c112, %c0_224], %611 {strides = array<i32>} : memref<2x128x128xf32, #tpu.memory_space<vmem>>, vector<2x8x128xf32>,
    %cst_225 = arith.constant dense<0x7F800000> : vector<2x8xf32>
    %613 = vector.multi_reduction <minimumf>, %607, %cst_225 [2] : vector<2x8x128xf32> to vector<2x8xf32>
    %614 = vector.shape_cast %613 : vector<2x8xf32> to vector<2x8x1xf32>
    %615 = vector.broadcast %614 : vector<2x8x1xf32> to vector<2x8x128xf32>
    %616 = arith.cmpf ole, %607, %615 : vector<2x8x128xf32>
    %c128_i32_226 = arith.constant 128 : i32
    %617 = vector.broadcast %c128_i32_226 : i32 to vector<2x8x128xi32>
    %618 = arith.select %616, %8, %617 : vector<2x8x128xi1>, vector<2x8x128xi32>
    %cst_227 = arith.constant dense<2147483647> : vector<2x8xi32>
    %619 = vector.multi_reduction <minsi>, %618, %cst_227 [2] : vector<2x8x128xi32> to vector<2x8xi32>
    %620 = vector.shape_cast %619 : vector<2x8xi32> to vector<2x8x1xi32>
    %621 = vector.broadcast %620 : vector<2x8x1xi32> to vector<2x8x128xi32>
    %622 = arith.cmpi eq, %8, %621 : vector<2x8x128xi32>
    %cst_228 = arith.constant 1.000000e+00 : f32
    %cst_229 = arith.constant 0.000000e+00 : f32
    %623 = vector.broadcast %cst_228 : f32 to vector<2x8x128xf32>
    %624 = vector.broadcast %cst_229 : f32 to vector<2x8x128xf32>
    %625 = arith.select %622, %623, %624 : vector<2x8x128xi1>, vector<2x8x128xf32>
    %626 = arith.subf %625, %357 : vector<2x8x128xf32>
    %c0_230 = arith.constant 0 : index
    %c120 = arith.constant 120 : index
    %c0_231 = arith.constant 0 : index
    %627 = vector.load %arg4[%c0_230, %c120, %c0_231] : memref<2x128x128xf32, #tpu.memory_space<vmem>>, vector<2x8x128xf32>
    tpu.vector_store %arg4[%c0_230, %c120, %c0_231], %626 {strides = array<i32>} : memref<2x128x128xf32, #tpu.memory_space<vmem>>, vector<2x8x128xf32>,
    %c0_232 = arith.constant 0 : index
    %c0_233 = arith.constant 0 : index
    %c0_234 = arith.constant 0 : index
    %628 = vector.load %arg4[%c0_232, %c0_233, %c0_234] : memref<2x128x128xf32, #tpu.memory_space<vmem>>, vector<2x128x128xf32>
    %629 = vector.extract_strided_slice %0 {offsets = [0, 0, 0], sizes = [1, 3, 128], strides = [1, 1, 1]} : vector<2x3x128xf32> to vector<1x3x128xf32>
    %630 = vector.shape_cast %629 : vector<1x3x128xf32> to vector<3x128xf32>
    %631 = vector.extract_strided_slice %628 {offsets = [0, 0, 0], sizes = [1, 128, 128], strides = [1, 1, 1]} : vector<2x128x128xf32> to vector<1x128x128xf32>
    %632 = vector.shape_cast %631 : vector<1x128x128xf32> to vector<128x128xf32>
    %cst_235 = arith.constant dense<0.000000e+00> : vector<3x128xf32>
    %633 = tpu.matmul %630, %632, %cst_235 {dimension_numbers = #tpu.dot_dimension_numbers<[1], [1], [0], [0], [0, 0, 1, 0], [], []>} : vector<3x128xf32>, vector<128x128xf32>, vector<3x128xf32> -> vector<3x128xf32>
    %c0_236 = arith.constant 0 : index
    %c0_237 = arith.constant 0 : index
    %c0_238 = arith.constant 0 : index
    %634 = vector.load %arg2[%c0_236, %c0_237, %c0_238] : memref<2x3x128xf32, #tpu.memory_space<vmem>>, vector<1x3x128xf32>
    %635 = vector.shape_cast %634 : vector<1x3x128xf32> to vector<3x128xf32>
    %636 = vector.shape_cast %633 : vector<3x128xf32> to vector<1x3x128xf32>
    tpu.vector_store %arg2[%c0_236, %c0_237, %c0_238], %636 {strides = array<i32>} : memref<2x3x128xf32, #tpu.memory_space<vmem>>, vector<1x3x128xf32>,
    %637 = vector.extract_strided_slice %0 {offsets = [1, 0, 0], sizes = [1, 3, 128], strides = [1, 1, 1]} : vector<2x3x128xf32> to vector<1x3x128xf32>
    %638 = vector.shape_cast %637 : vector<1x3x128xf32> to vector<3x128xf32>
    %639 = vector.extract_strided_slice %628 {offsets = [1, 0, 0], sizes = [1, 128, 128], strides = [1, 1, 1]} : vector<2x128x128xf32> to vector<1x128x128xf32>
    %640 = vector.shape_cast %639 : vector<1x128x128xf32> to vector<128x128xf32>
    %cst_239 = arith.constant dense<0.000000e+00> : vector<3x128xf32>
    %641 = tpu.matmul %638, %640, %cst_239 {dimension_numbers = #tpu.dot_dimension_numbers<[1], [1], [0], [0], [0, 0, 1, 0], [], []>} : vector<3x128xf32>, vector<128x128xf32>, vector<3x128xf32> -> vector<3x128xf32>
    %c1_240 = arith.constant 1 : index
    %c0_241 = arith.constant 0 : index
    %c0_242 = arith.constant 0 : index
    %642 = vector.load %arg2[%c1_240, %c0_241, %c0_242] : memref<2x3x128xf32, #tpu.memory_space<vmem>>, vector<1x3x128xf32>
    %643 = vector.shape_cast %642 : vector<1x3x128xf32> to vector<3x128xf32>
    %644 = vector.shape_cast %641 : vector<3x128xf32> to vector<1x3x128xf32>
    tpu.vector_store %arg2[%c1_240, %c0_241, %c0_242], %644 {strides = array<i32>} : memref<2x3x128xf32, #tpu.memory_space<vmem>>, vector<1x3x128xf32>,
    return
  }
  func.func @transform_0(%arg0: i32) -> (i32, i32, i32) {
    %c0_i32 = arith.constant 0 : i32
    %c0_i32_0 = arith.constant 0 : i32
    %c0_i32_1 = arith.constant 0 : i32
    return %arg0, %c0_i32, %c0_i32_0 : i32, i32, i32
  }
  func.func @transform_1(%arg0: i32) -> (i32, i32, i32) {
    %c0_i32 = arith.constant 0 : i32
    %c0_i32_0 = arith.constant 0 : i32
    %c0_i32_1 = arith.constant 0 : i32
    return %arg0, %c0_i32, %c0_i32_0 : i32, i32, i32
  }
  func.func @transform_2(%arg0: i32) -> (i32, i32, i32) {
    %c0_i32 = arith.constant 0 : i32
    %c0_i32_0 = arith.constant 0 : i32
    %c0_i32_1 = arith.constant 0 : i32
    return %arg0, %c0_i32, %c0_i32_0 : i32, i32, i32
  }
}

</mosaic_0001>

<bundles_post_ra>
// kernel: tpu_custom_call.1
= control target key start
LH: loop header
LB: loop body
LE: loop exit
PB: predicated region body
PF: predicated region fallthrough
CT: control target
= control target key end

     0   :  { %v12_v0 = vlaneseq  ;;  %v2088_v1 = vmov 1966171168   ;;  %v2089_v5 = vmov 0.0   ;;  %v2090_v7 = vmov 0   ;;  %s2867_s0 = inlined_call_operand.vmem [shape: f32[2,3,128], index: 0, kind: input, shape index: {}]   ;;  %s2868_s2 = inlined_call_operand.vmem [shape: f32[2,3,8], index: 2, kind: output, shape index: {1}]   ;;  %s2869_s1 = inlined_call_operand.vmem [shape: f32[2,3,128], index: 1, kind: output, shape index: {0}]  }
   0x1   :  { %v17_v2 = vunpack.c.l.s4 %v2088_v1  ;;  %2010 = vmatprep.subr.mxu0 %v2089_v5  ;;  %2045 = vmatprep.subr.mxu1 %v2089_v5  ;;  %v2128_v21 = vld [vmem:[%s2867_s0 + $0x4] sm:$0x7]  ;;  %v2134_v23 = vld [vmem:[%s2867_s0] sm:$0x7]  ;;  %vm54_vm4 = vcmask 1042432   ;;  %vm114_vm6 = vcmask 1041409  }
   0x2   :  { %v2107_v3 = vand.u32 127, %v12_v0  ;;  %v20_v4 = vshrl.u32 %v12_v0, 7  ;;  %vm117_vm7 = vcmask 1041408  }
   0x3   :  { %v18_v6 = vunpack.c.0.s8 %v17_v2 }
   0x4   :  { %vm14_vm0 = vcmp.eq.s32.totalorder %v2107_v3, 0  ;;  %v2120_v17 = vsub.s32 0, %v20_v4 }
   0x5   :  { %v15_v8 = vsel %vm14_vm0, 1, %v2090_v7  ;;  %v2113_v9 = vsub.s32 %v18_v6, %v20_v4  ;;  %v81_v10 = vsel %vm14_vm0, 1.0, %v2089_v5 }
   0x7   :  { %v22_v11 = vrot.slane %v15_v8, %v2113_v9  ;;  %v89_v12 = vrot.slane %v81_v10, %v2113_v9 }
   0x9   :  { %v23_v13 = vcombine.high %v22_v11, %v22_v11  ;;  %v90_v14 = vcombine.high %v89_v12, %v89_v12  ;;  %1959 = vst.sshfl [vmem:[#allocation4] sm:$0x1 pattern:$0x73625140] %v89_v12  ;;  %v30_v15 = vrot.slane %v22_v11, %v2113_v9 }
   0xb   :  { %v37_v16 = vrot.slane %v23_v13, %v2113_v9  ;;  %1960 = vst.sshfl [vmem:[#allocation4 + $0x8] sm:$0x1 pattern:$0x73625140] %v90_v14  ;;  %vm38_vm1 = vcmp.ne.s32.totalorder %v30_v15, 0 }
   0xc   :  { %v40_v18 = vsel %vm38_vm1, 1, %v2090_v7 }
   0xd   :  { %vm39_vm2 = vcmp.ne.s32.totalorder %v37_v16, 0  ;;  %v45_v19 = vrot.slane %v40_v18, %v2120_v17 }
   0xe   :  { %v41_v20 = vsel %vm39_vm2, 1, %v2090_v7 }
   0xf   :  { %v49_v22 = vrot.slane %v41_v20, %v2120_v17  ;;  %vm50_vm3 = vcmp.eq.s32.totalorder %v45_v19, 1 }
  0x10   :  { %v52_v25 = vsel %vm50_vm3, %v2134_v23, 0.0 }
  0x11   :  { %vm51_vm5 = vcmp.eq.s32.totalorder %v49_v22, 1  ;;  %v55_v27 = vsel %vm54_vm4, %v52_v25, 0.0 }
  0x12   :  { %v53_v24 = vsel %vm51_vm5, %v2128_v21, 0.0 }
  0x13   :  { %v58_v26 = vsel %vm54_vm4, %v53_v24, 0.0 }
  0x14   :  { %59 = vadd.xlane.f32.xlu0 %v58_v26 }
  0x18   :  { %56 = vadd.xlane.f32.xlu0 %v55_v27 }
  0x9d   :  { %v2140_v28 = vpop.xlane.xlu0 %59 }
  0x9e   :  { %v62_v29 = vsub.f32 %v2128_v21, %v2140_v28 }
  0xa0   :  { %v64_v30 = vmul.f32 %v62_v29, %v62_v29 }
  0xa1   :  { %v2144_v31 = vpop.xlane.xlu0 %56 }
  0xa2   :  { %v68_v32 = vrot.slane %v64_v30, 1  ;;  %v61_v33 = vsub.f32 %v2134_v23, %v2144_v31  ;;  %v74_v35 = vrot.slane %v64_v30, 2 }
  0xa4   :  { %v72_v34 = vadd.f32 %v68_v32, %v64_v30  ;;  %v63_v36 = vmul.f32 %v61_v33, %v61_v33 }
  0xa6   :  { %v78_v37 = vadd.f32 %v74_v35, %v72_v34  ;;  %v67_v38 = vrot.slane %v63_v36, 1  ;;  %v73_v40 = vrot.slane %v63_v36, 2 }
  0xa8   :  { %80 = vst [vmem:[#allocation3 + $0x8] sm:$0x1] %v78_v37  ;;  %v71_v39 = vadd.f32 %v67_v38, %v63_v36  ;;  %v2148_v41 = vmin.f32 %v78_v37, 1e+10 }
  0xaa   :  { %v77_v42 = vadd.f32 %v73_v40, %v71_v39  ;;  %v113_v44 = vrot.slane %v2148_v41, 7 }
  0xac   :  { %v2150_v43 = vmin.f32 %v77_v42, 1e+10  ;;  %79 = vst [vmem:[#allocation3] sm:$0x1] %v77_v42 }
  0xae   :  { %v115_v45 = vsel %vm114_vm6, %v113_v44, %v2150_v43 }
  0xaf   :  { %v118_v46 = vsel %vm117_vm7, %v115_v45, -inf }
  0xb0   :  { %119 = vmax.xlane.f32.xlu1 %v118_v46 }
 0x139   :  { %v120_v47 = vpop.xlane.xlu1 %119 }
 0x13a   :  { %v122_v48 = vrot.slane %v120_v47, 1  ;;  %vm125_vm8 = vcmp.ge.f32.partialorder %v2150_v43, %v120_v47 }
 0x13b   :  { %v127_v51 = vsel %vm125_vm8, %v2107_v3, 128 }
 0x13c   :  { %vm126_vm9 = vcmp.ge.f32.partialorder %v2148_v41, %v122_v48 }
 0x13d   :  { %v128_v49 = vsel %vm126_vm9, %v2107_v3, 128 }
 0x13e   :  { %v129_v50 = vrot.slane %v128_v49, 7 }
 0x140   :  { %v130_v52 = vsel %vm114_vm6, %v129_v50, %v127_v51 }
 0x141   :  { %v131_v53 = vsel %vm117_vm7, %v130_v52, 2147483647 }
 0x142   :  { %v133_v54 = vshra.s32 %v131_v53, 16  ;;  %v132_v56 = vand.u32 65535, %v131_v53 }
 0x144   :  { %v135_v55 = vcvt.s32.f32 %v133_v54  ;;  %v134_v58 = vcvt.s32.f32 %v132_v56 }
 0x146   :  { %136 = vmin.xlane.f32.xlu1 %v135_v55 }
 0x1cf   :  { %v137_v57 = vpop.xlane.xlu1 %136 }
 0x1d0   :  { %vm138_vm10 = vcmp.eq.f32.partialorder %v135_v55, %v137_v57  ;;  %v143_v60 = vcvt.f32.s32 %v137_v57 }
 0x1d1   :  { %v139_v59 = vsel %vm138_vm10, %v134_v58, inf }
 0x1d2   :  { %140 = vmin.xlane.f32.xlu0 %v139_v59  ;;  %v144_v62 = vshll.u32 %v143_v60, 16 }
 0x25b   :  { %v141_v61 = vpop.xlane.xlu0 %140 }
 0x25c   :  { %v142_v63 = vcvt.f32.s32 %v141_v61 }
 0x25e   :  { %v145_v0 = vadd.s32 %v144_v62, %v142_v63 }
 0x260   :  { %vm146_vm11 = vcmp.eq.s32.totalorder %v2107_v3, %v145_v0 }
 0x261   :  { %v147_v1 = vsel %vm146_vm11, 1, %v2090_v7  ;;  %v212_v2 = vsel %vm146_vm11, 1.0, %v2089_v5 }
 0x262   :  { %v220_v4 = vrot.slane %v212_v2, %v2113_v9  ;;  %v154_v6 = vrot.slane %v147_v1, %v2113_v9 }
 0x264   :  { %v221_v8 = vcombine.high %v220_v4, %v220_v4  ;;  %1961 = vst.sshfl [vmem:[#allocation4 + $0x1] sm:$0x1 pattern:$0x73625140] %v220_v4  ;;  %v162_v10 = vrot.slane %v154_v6, %v2113_v9  ;;  %v155_v11 = vcombine.high %v154_v6, %v154_v6 }
 0x266   :  { %1962 = vst.sshfl [vmem:[#allocation4 + $0x9] sm:$0x1 pattern:$0x73625140] %v221_v8  ;;  %vm170_vm12 = vcmp.ne.s32.totalorder %v162_v10, 0  ;;  %v169_v12 = vrot.slane %v155_v11, %v2113_v9 }
 0x267   :  { %v172_v13 = vsel %vm170_vm12, 1, %v2090_v7 }
 0x268   :  { %v177_v14 = vrot.slane %v172_v13, %v2120_v17  ;;  %vm171_vm13 = vcmp.ne.s32.totalorder %v169_v12, 0 }
 0x269   :  { %v173_v15 = vsel %vm171_vm13, 1, %v2090_v7 }
 0x26a   :  { %vm182_vm14 = vcmp.eq.s32.totalorder %v177_v14, 1  ;;  %v181_v16 = vrot.slane %v173_v15, %v2120_v17 }
 0x26b   :  { %v184_v18 = vsel %vm182_vm14, %v2134_v23, 0.0 }
 0x26c   :  { %v186_v19 = vsel %vm54_vm4, %v184_v18, 0.0  ;;  %vm183_vm15 = vcmp.eq.s32.totalorder %v181_v16, 1 }
 0x26d   :  { %187 = vadd.xlane.f32.xlu0 %v186_v19  ;;  %v185_v20 = vsel %vm183_vm15, %v2128_v21, 0.0 }
 0x26e   :  { %v189_v22 = vsel %vm54_vm4, %v185_v20, 0.0 }
 0x26f   :  { %190 = vadd.xlane.f32.xlu1 %v189_v22 }
 0x2f6   :  { %v2177_v24 = vpop.xlane.xlu0 %187 }
 0x2f7   :  { %v192_v25 = vsub.f32 %v2134_v23, %v2177_v24 }
 0x2f8   :  { %v2181_v26 = vpop.xlane.xlu1 %190 }
 0x2f9   :  { %v194_v27 = vmul.f32 %v192_v25, %v192_v25  ;;  %v193_v29 = vsub.f32 %v2128_v21, %v2181_v26 }
 0x2fb   :  { %v198_v30 = vrot.slane %v194_v27, 1  ;;  %v195_v32 = vmul.f32 %v193_v29, %v193_v29  ;;  %v204_v34 = vrot.slane %v194_v27, 2 }
 0x2fd   :  { %v202_v33 = vadd.f32 %v198_v30, %v194_v27  ;;  %v199_v35 = vrot.slane %v195_v32, 1  ;;  %v205_v37 = vrot.slane %v195_v32, 2 }
 0x2ff   :  { %v203_v36 = vadd.f32 %v199_v35, %v195_v32  ;;  %v208_v38 = vadd.f32 %v204_v34, %v202_v33 }
 0x301   :  { %v209_v39 = vadd.f32 %v205_v37, %v203_v36  ;;  %210 = vst [vmem:[#allocation3 + $0x1] sm:$0x1] %v208_v38  ;;  %v2189_v42 = vmin.f32 %v2150_v43, %v208_v38 }
 0x303   :  { %211 = vst [vmem:[#allocation3 + $0x9] sm:$0x1] %v209_v39  ;;  %v2186_v40 = vmin.f32 %v2148_v41, %v209_v39 }
 0x305   :  { %v244_v44 = vrot.slane %v2186_v40, 7 }
 0x307   :  { %v245_v45 = vsel %vm114_vm6, %v244_v44, %v2189_v42 }
 0x308   :  { %v247_v46 = vsel %vm117_vm7, %v245_v45, -inf }
 0x309   :  { %248 = vmax.xlane.f32.xlu1 %v247_v46 }
 0x392   :  { %v249_v47 = vpop.xlane.xlu1 %248 }
 0x393   :  { %v251_v48 = vrot.slane %v249_v47, 1  ;;  %vm254_vm0 = vcmp.ge.f32.partialorder %v2189_v42, %v249_v47 }
 0x394   :  { %v256_v43 = vsel %vm254_vm0, %v2107_v3, 128 }
 0x395   :  { %vm255_vm1 = vcmp.ge.f32.partialorder %v2186_v40, %v251_v48 }
 0x396   :  { %v257_v41 = vsel %vm255_vm1, %v2107_v3, 128 }
 0x397   :  { %v258_v49 = vrot.slane %v257_v41, 7 }
 0x399   :  { %v259_v50 = vsel %vm114_vm6, %v258_v49, %v256_v43 }
 0x39a   :  { %v260_v51 = vsel %vm117_vm7, %v259_v50, 2147483647 }
 0x39b   :  { %v262_v52 = vshra.s32 %v260_v51, 16  ;;  %v261_v54 = vand.u32 65535, %v260_v51 }
 0x39d   :  { %v264_v53 = vcvt.s32.f32 %v262_v52  ;;  %v263_v56 = vcvt.s32.f32 %v261_v54 }
 0x39f   :  { %265 = vmin.xlane.f32.xlu0 %v264_v53 }
 0x428   :  { %v266_v55 = vpop.xlane.xlu0 %265 }
 0x429   :  { %vm267_vm2 = vcmp.eq.f32.partialorder %v264_v53, %v266_v55  ;;  %v272_v58 = vcvt.f32.s32 %v266_v55 }
 0x42a   :  { %v268_v57 = vsel %vm267_vm2, %v263_v56, inf }
 0x42b   :  { %269 = vmin.xlane.f32.xlu1 %v268_v57  ;;  %v273_v60 = vshll.u32 %v272_v58, 16 }
 0x4b4   :  { %v270_v59 = vpop.xlane.xlu1 %269 }
 0x4b5   :  { %v271_v61 = vcvt.f32.s32 %v270_v59 }
 0x4b7   :  { %v274_v62 = vadd.s32 %v273_v60, %v271_v61 }
 0x4b9   :  { %vm275_vm3 = vcmp.eq.s32.totalorder %v2107_v3, %v274_v62 }
 0x4ba   :  { %v276_v63 = vsel %vm275_vm3, 1, %v2090_v7  ;;  %v341_v0 = vsel %vm275_vm3, 1.0, %v2089_v5 }
 0x4bb   :  { %v349_v1 = vrot.slane %v341_v0, %v2113_v9  ;;  %v283_v2 = vrot.slane %v276_v63, %v2113_v9 }
 0x4bd   :  { %v350_v4 = vcombine.high %v349_v1, %v349_v1  ;;  %1963 = vst.sshfl [vmem:[#allocation4 + $0x2] sm:$0x1 pattern:$0x73625140] %v349_v1  ;;  %v291_v6 = vrot.slane %v283_v2, %v2113_v9  ;;  %v284_v8 = vcombine.high %v283_v2, %v283_v2 }
 0x4bf   :  { %1964 = vst.sshfl [vmem:[#allocation4 + $0xa] sm:$0x1 pattern:$0x73625140] %v350_v4  ;;  %vm299_vm5 = vcmp.ne.s32.totalorder %v291_v6, 0  ;;  %v298_v10 = vrot.slane %v284_v8, %v2113_v9 }
 0x4c0   :  { %v301_v11 = vsel %vm299_vm5, 1, %v2090_v7 }
 0x4c1   :  { %v306_v12 = vrot.slane %v301_v11, %v2120_v17  ;;  %vm300_vm8 = vcmp.ne.s32.totalorder %v298_v10, 0 }
 0x4c2   :  { %v302_v13 = vsel %vm300_vm8, 1, %v2090_v7 }
 0x4c3   :  { %vm311_vm9 = vcmp.eq.s32.totalorder %v306_v12, 1  ;;  %v310_v14 = vrot.slane %v302_v13, %v2120_v17 }
 0x4c4   :  { %v313_v15 = vsel %vm311_vm9, %v2134_v23, 0.0 }
 0x4c5   :  { %v315_v16 = vsel %vm54_vm4, %v313_v15, 0.0  ;;  %vm312_vm10 = vcmp.eq.s32.totalorder %v310_v14, 1 }
 0x4c6   :  { %316 = vadd.xlane.f32.xlu1 %v315_v16  ;;  %v314_v18 = vsel %vm312_vm10, %v2128_v21, 0.0 }
 0x4c7   :  { %v318_v19 = vsel %vm54_vm4, %v314_v18, 0.0 }
 0x4c8   :  { %319 = vadd.xlane.f32.xlu0 %v318_v19 }
 0x54f   :  { %v2216_v20 = vpop.xlane.xlu1 %316 }
 0x550   :  { %v321_v22 = vsub.f32 %v2134_v23, %v2216_v20 }
 0x551   :  { %v2220_v25 = vpop.xlane.xlu0 %319 }
 0x552   :  { %v323_v27 = vmul.f32 %v321_v22, %v321_v22  ;;  %v322_v29 = vsub.f32 %v2128_v21, %v2220_v25 }
 0x554   :  { %v327_v30 = vrot.slane %v323_v27, 1  ;;  %v324_v32 = vmul.f32 %v322_v29, %v322_v29  ;;  %v333_v34 = vrot.slane %v323_v27, 2 }
 0x556   :  { %v331_v33 = vadd.f32 %v327_v30, %v323_v27  ;;  %v328_v35 = vrot.slane %v324_v32, 1  ;;  %v334_v37 = vrot.slane %v324_v32, 2 }
 0x558   :  { %v332_v36 = vadd.f32 %v328_v35, %v324_v32  ;;  %v337_v38 = vadd.f32 %v333_v34, %v331_v33 }
 0x55a   :  { %v338_v39 = vadd.f32 %v334_v37, %v332_v36  ;;  %339 = vst [vmem:[#allocation3 + $0x2] sm:$0x1] %v337_v38  ;;  %v2228_v45 = vmin.f32 %v2189_v42, %v337_v38 }
 0x55c   :  { %340 = vst [vmem:[#allocation3 + $0xa] sm:$0x1] %v338_v39  ;;  %v2225_v44 = vmin.f32 %v2186_v40, %v338_v39 }
 0x55e   :  { %v373_v46 = vrot.slane %v2225_v44, 7 }
 0x560   :  { %v374_v47 = vsel %vm114_vm6, %v373_v46, %v2228_v45 }
 0x561   :  { %v376_v48 = vsel %vm117_vm7, %v374_v47, -inf }
 0x562   :  { %377 = vmax.xlane.f32.xlu0 %v376_v48 }
 0x5eb   :  { %v378_v41 = vpop.xlane.xlu0 %377 }
 0x5ec   :  { %v380_v49 = vrot.slane %v378_v41, 1  ;;  %vm383_vm11 = vcmp.ge.f32.partialorder %v2228_v45, %v378_v41 }
 0x5ed   :  { %v385_v42 = vsel %vm383_vm11, %v2107_v3, 128 }
 0x5ee   :  { %vm384_vm12 = vcmp.ge.f32.partialorder %v2225_v44, %v380_v49 }
 0x5ef   :  { %v386_v40 = vsel %vm384_vm12, %v2107_v3, 128 }
 0x5f0   :  { %v387_v43 = vrot.slane %v386_v40, 7 }
 0x5f2   :  { %v388_v50 = vsel %vm114_vm6, %v387_v43, %v385_v42 }
 0x5f3   :  { %v389_v51 = vsel %vm117_vm7, %v388_v50, 2147483647 }
 0x5f4   :  { %v391_v52 = vshra.s32 %v389_v51, 16  ;;  %v390_v54 = vand.u32 65535, %v389_v51 }
 0x5f6   :  { %v393_v53 = vcvt.s32.f32 %v391_v52  ;;  %v392_v56 = vcvt.s32.f32 %v390_v54 }
 0x5f8   :  { %394 = vmin.xlane.f32.xlu1 %v393_v53 }
 0x681   :  { %v395_v55 = vpop.xlane.xlu1 %394 }
 0x682   :  { %vm396_vm13 = vcmp.eq.f32.partialorder %v393_v53, %v395_v55  ;;  %v401_v58 = vcvt.f32.s32 %v395_v55 }
 0x683   :  { %v397_v57 = vsel %vm396_vm13, %v392_v56, inf }
 0x684   :  { %398 = vmin.xlane.f32.xlu0 %v397_v57  ;;  %v402_v60 = vshll.u32 %v401_v58, 16 }
 0x70d   :  { %v399_v59 = vpop.xlane.xlu0 %398 }
 0x70e   :  { %v400_v61 = vcvt.f32.s32 %v399_v59 }
 0x710   :  { %v403_v62 = vadd.s32 %v402_v60, %v400_v61 }
 0x712   :  { %vm404_vm14 = vcmp.eq.s32.totalorder %v2107_v3, %v403_v62 }
 0x713   :  { %v405_v63 = vsel %vm404_vm14, 1, %v2090_v7  ;;  %v470_v0 = vsel %vm404_vm14, 1.0, %v2089_v5 }
 0x714   :  { %v478_v1 = vrot.slane %v470_v0, %v2113_v9  ;;  %v412_v2 = vrot.slane %v405_v63, %v2113_v9 }
 0x716   :  { %v479_v4 = vcombine.high %v478_v1, %v478_v1  ;;  %1965 = vst.sshfl [vmem:[#allocation4 + $0x3] sm:$0x1 pattern:$0x73625140] %v478_v1  ;;  %v420_v6 = vrot.slane %v412_v2, %v2113_v9  ;;  %v413_v8 = vcombine.high %v412_v2, %v412_v2 }
 0x718   :  { %1966 = vst.sshfl [vmem:[#allocation4 + $0xb] sm:$0x1 pattern:$0x73625140] %v479_v4  ;;  %vm428_vm15 = vcmp.ne.s32.totalorder %v420_v6, 0  ;;  %v427_v10 = vrot.slane %v413_v8, %v2113_v9 }
 0x719   :  { %v430_v11 = vsel %vm428_vm15, 1, %v2090_v7 }
 0x71a   :  { %v435_v12 = vrot.slane %v430_v11, %v2120_v17  ;;  %vm429_vm0 = vcmp.ne.s32.totalorder %v427_v10, 0 }
 0x71b   :  { %v431_v13 = vsel %vm429_vm0, 1, %v2090_v7 }
 0x71c   :  { %vm440_vm1 = vcmp.eq.s32.totalorder %v435_v12, 1  ;;  %v439_v14 = vrot.slane %v431_v13, %v2120_v17 }
 0x71d   :  { %v442_v15 = vsel %vm440_vm1, %v2134_v23, 0.0 }
 0x71e   :  { %v444_v16 = vsel %vm54_vm4, %v442_v15, 0.0  ;;  %vm441_vm2 = vcmp.eq.s32.totalorder %v439_v14, 1 }
 0x71f   :  { %445 = vadd.xlane.f32.xlu0 %v444_v16  ;;  %v443_v18 = vsel %vm441_vm2, %v2128_v21, 0.0 }
 0x720   :  { %v447_v19 = vsel %vm54_vm4, %v443_v18, 0.0 }
 0x721   :  { %448 = vadd.xlane.f32.xlu1 %v447_v19 }
 0x7a8   :  { %v2255_v22 = vpop.xlane.xlu0 %445 }
 0x7a9   :  { %v450_v27 = vsub.f32 %v2134_v23, %v2255_v22 }
 0x7aa   :  { %v2259_v29 = vpop.xlane.xlu1 %448 }
 0x7ab   :  { %v452_v30 = vmul.f32 %v450_v27, %v450_v27  ;;  %v451_v32 = vsub.f32 %v2128_v21, %v2259_v29 }
 0x7ad   :  { %v456_v33 = vrot.slane %v452_v30, 1  ;;  %v453_v34 = vmul.f32 %v451_v32, %v451_v32  ;;  %v462_v36 = vrot.slane %v452_v30, 2 }
 0x7af   :  { %v460_v35 = vadd.f32 %v456_v33, %v452_v30  ;;  %v457_v37 = vrot.slane %v453_v34, 1  ;;  %v463_v39 = vrot.slane %v453_v34, 2 }
 0x7b1   :  { %v461_v38 = vadd.f32 %v457_v37, %v453_v34  ;;  %v466_v46 = vadd.f32 %v462_v36, %v460_v35 }
 0x7b3   :  { %v467_v47 = vadd.f32 %v463_v39, %v461_v38  ;;  %468 = vst [vmem:[#allocation3 + $0x3] sm:$0x1] %v466_v46  ;;  %v2267_v41 = vmin.f32 %v2228_v45, %v466_v46 }
 0x7b5   :  { %469 = vst [vmem:[#allocation3 + $0xb] sm:$0x1] %v467_v47  ;;  %v2264_v48 = vmin.f32 %v2225_v44, %v467_v47 }
 0x7b7   :  { %v502_v49 = vrot.slane %v2264_v48, 7 }
 0x7b9   :  { %v503_v40 = vsel %vm114_vm6, %v502_v49, %v2267_v41 }
 0x7ba   :  { %v505_v43 = vsel %vm117_vm7, %v503_v40, -inf }
 0x7bb   :  { %506 = vmax.xlane.f32.xlu1 %v505_v43 }
 0x844   :  { %v507_v42 = vpop.xlane.xlu1 %506 }
 0x845   :  { %v509_v50 = vrot.slane %v507_v42, 1  ;;  %vm512_vm3 = vcmp.ge.f32.partialorder %v2267_v41, %v507_v42 }
 0x846   :  { %v514_v45 = vsel %vm512_vm3, %v2107_v3, 128 }
 0x847   :  { %vm513_vm5 = vcmp.ge.f32.partialorder %v2264_v48, %v509_v50 }
 0x848   :  { %v515_v44 = vsel %vm513_vm5, %v2107_v3, 128 }
 0x849   :  { %v516_v51 = vrot.slane %v515_v44, 7 }
 0x84b   :  { %v517_v52 = vsel %vm114_vm6, %v516_v51, %v514_v45 }
 0x84c   :  { %v518_v53 = vsel %vm117_vm7, %v517_v52, 2147483647 }
 0x84d   :  { %v520_v54 = vshra.s32 %v518_v53, 16  ;;  %v519_v56 = vand.u32 65535, %v518_v53 }
 0x84f   :  { %v522_v55 = vcvt.s32.f32 %v520_v54  ;;  %v521_v58 = vcvt.s32.f32 %v519_v56 }
 0x851   :  { %523 = vmin.xlane.f32.xlu0 %v522_v55 }
 0x8da   :  { %v524_v57 = vpop.xlane.xlu0 %523 }
 0x8db   :  { %vm525_vm8 = vcmp.eq.f32.partialorder %v522_v55, %v524_v57  ;;  %v530_v60 = vcvt.f32.s32 %v524_v57 }
 0x8dc   :  { %v526_v59 = vsel %vm525_vm8, %v521_v58, inf }
 0x8dd   :  { %527 = vmin.xlane.f32.xlu1 %v526_v59  ;;  %v531_v62 = vshll.u32 %v530_v60, 16 }
 0x966   :  { %v528_v61 = vpop.xlane.xlu1 %527 }
 0x967   :  { %v529_v63 = vcvt.f32.s32 %v528_v61 }
 0x969   :  { %v532_v0 = vadd.s32 %v531_v62, %v529_v63 }
 0x96b   :  { %vm533_vm9 = vcmp.eq.s32.totalorder %v2107_v3, %v532_v0 }
 0x96c   :  { %v534_v1 = vsel %vm533_vm9, 1, %v2090_v7  ;;  %v599_v2 = vsel %vm533_vm9, 1.0, %v2089_v5 }
 0x96d   :  { %v607_v4 = vrot.slane %v599_v2, %v2113_v9  ;;  %v541_v6 = vrot.slane %v534_v1, %v2113_v9 }
 0x96f   :  { %v608_v8 = vcombine.high %v607_v4, %v607_v4  ;;  %1967 = vst.sshfl [vmem:[#allocation4 + $0x4] sm:$0x1 pattern:$0x73625140] %v607_v4  ;;  %v549_v10 = vrot.slane %v541_v6, %v2113_v9  ;;  %v542_v11 = vcombine.high %v541_v6, %v541_v6 }
 0x971   :  { %1968 = vst.sshfl [vmem:[#allocation4 + $0xc] sm:$0x1 pattern:$0x73625140] %v608_v8  ;;  %vm557_vm10 = vcmp.ne.s32.totalorder %v549_v10, 0  ;;  %v556_v12 = vrot.slane %v542_v11, %v2113_v9 }
 0x972   :  { %v559_v13 = vsel %vm557_vm10, 1, %v2090_v7 }
 0x973   :  { %v564_v14 = vrot.slane %v559_v13, %v2120_v17  ;;  %vm558_vm11 = vcmp.ne.s32.totalorder %v556_v12, 0 }
 0x974   :  { %v560_v15 = vsel %vm558_vm11, 1, %v2090_v7 }
 0x975   :  { %vm569_vm12 = vcmp.eq.s32.totalorder %v564_v14, 1  ;;  %v568_v16 = vrot.slane %v560_v15, %v2120_v17 }
 0x976   :  { %v571_v18 = vsel %vm569_vm12, %v2134_v23, 0.0 }
 0x977   :  { %v573_v19 = vsel %vm54_vm4, %v571_v18, 0.0  ;;  %vm570_vm13 = vcmp.eq.s32.totalorder %v568_v16, 1 }
 0x978   :  { %574 = vadd.xlane.f32.xlu1 %v573_v19  ;;  %v572_v27 = vsel %vm570_vm13, %v2128_v21, 0.0 }
 0x979   :  { %v576_v30 = vsel %vm54_vm4, %v572_v27, 0.0 }
 0x97a   :  { %577 = vadd.xlane.f32.xlu0 %v576_v30 }
 0xa01   :  { %v2294_v32 = vpop.xlane.xlu1 %574 }
 0xa02   :  { %v579_v33 = vsub.f32 %v2134_v23, %v2294_v32 }
 0xa03   :  { %v2298_v34 = vpop.xlane.xlu0 %577 }
 0xa04   :  { %v581_v35 = vmul.f32 %v579_v33, %v579_v33  ;;  %v580_v36 = vsub.f32 %v2128_v21, %v2298_v34 }
 0xa06   :  { %v585_v37 = vrot.slane %v581_v35, 1  ;;  %v582_v38 = vmul.f32 %v580_v36, %v580_v36  ;;  %v591_v46 = vrot.slane %v581_v35, 2 }
 0xa08   :  { %v589_v39 = vadd.f32 %v585_v37, %v581_v35  ;;  %v586_v47 = vrot.slane %v582_v38, 1  ;;  %v592_v40 = vrot.slane %v582_v38, 2 }
 0xa0a   :  { %v590_v49 = vadd.f32 %v586_v47, %v582_v38  ;;  %v595_v43 = vadd.f32 %v591_v46, %v589_v39 }
 0xa0c   :  { %v596_v42 = vadd.f32 %v592_v40, %v590_v49  ;;  %597 = vst [vmem:[#allocation3 + $0x4] sm:$0x1] %v595_v43  ;;  %v2306_v44 = vmin.f32 %v2267_v41, %v595_v43 }
 0xa0e   :  { %598 = vst [vmem:[#allocation3 + $0xc] sm:$0x1] %v596_v42  ;;  %v2303_v50 = vmin.f32 %v2264_v48, %v596_v42 }
 0xa10   :  { %v631_v51 = vrot.slane %v2303_v50, 7 }
 0xa12   :  { %v632_v45 = vsel %vm114_vm6, %v631_v51, %v2306_v44 }
 0xa13   :  { %v634_v52 = vsel %vm117_vm7, %v632_v45, -inf }
 0xa14   :  { %635 = vmax.xlane.f32.xlu0 %v634_v52 }
 0xa9d   :  { %v636_v53 = vpop.xlane.xlu0 %635 }
 0xa9e   :  { %v638_v54 = vrot.slane %v636_v53, 1  ;;  %vm641_vm14 = vcmp.ge.f32.partialorder %v2306_v44, %v636_v53 }
 0xa9f   :  { %v643_v41 = vsel %vm641_vm14, %v2107_v3, 128 }
 0xaa0   :  { %vm642_vm15 = vcmp.ge.f32.partialorder %v2303_v50, %v638_v54 }
 0xaa1   :  { %v644_v48 = vsel %vm642_vm15, %v2107_v3, 128 }
 0xaa2   :  { %v645_v55 = vrot.slane %v644_v48, 7 }
 0xaa4   :  { %v646_v56 = vsel %vm114_vm6, %v645_v55, %v643_v41 }
 0xaa5   :  { %v647_v57 = vsel %vm117_vm7, %v646_v56, 2147483647 }
 0xaa6   :  { %v649_v58 = vshra.s32 %v647_v57, 16  ;;  %v648_v60 = vand.u32 65535, %v647_v57 }
 0xaa8   :  { %v651_v59 = vcvt.s32.f32 %v649_v58  ;;  %v650_v62 = vcvt.s32.f32 %v648_v60 }
 0xaaa   :  { %652 = vmin.xlane.f32.xlu1 %v651_v59 }
 0xb33   :  { %v653_v61 = vpop.xlane.xlu1 %652 }
 0xb34   :  { %vm654_vm0 = vcmp.eq.f32.partialorder %v651_v59, %v653_v61  ;;  %v659_v0 = vcvt.f32.s32 %v653_v61 }
 0xb35   :  { %v655_v63 = vsel %vm654_vm0, %v650_v62, inf }
 0xb36   :  { %656 = vmin.xlane.f32.xlu0 %v655_v63  ;;  %v660_v2 = vshll.u32 %v659_v0, 16 }
 0xbbf   :  { %v657_v1 = vpop.xlane.xlu0 %656 }
 0xbc0   :  { %v658_v4 = vcvt.f32.s32 %v657_v1 }
 0xbc2   :  { %v661_v6 = vadd.s32 %v660_v2, %v658_v4 }
 0xbc4   :  { %vm662_vm1 = vcmp.eq.s32.totalorder %v2107_v3, %v661_v6 }
 0xbc5   :  { %v663_v8 = vsel %vm662_vm1, 1, %v2090_v7  ;;  %v728_v10 = vsel %vm662_vm1, 1.0, %v2089_v5 }
 0xbc6   :  { %v736_v11 = vrot.slane %v728_v10, %v2113_v9  ;;  %v670_v12 = vrot.slane %v663_v8, %v2113_v9 }
 0xbc8   :  { %v737_v13 = vcombine.high %v736_v11, %v736_v11  ;;  %1969 = vst.sshfl [vmem:[#allocation4 + $0x5] sm:$0x1 pattern:$0x73625140] %v736_v11  ;;  %v678_v14 = vrot.slane %v670_v12, %v2113_v9  ;;  %v671_v15 = vcombine.high %v670_v12, %v670_v12 }
 0xbca   :  { %1970 = vst.sshfl [vmem:[#allocation4 + $0xd] sm:$0x1 pattern:$0x73625140] %v737_v13  ;;  %vm686_vm2 = vcmp.ne.s32.totalorder %v678_v14, 0  ;;  %v685_v16 = vrot.slane %v671_v15, %v2113_v9 }
 0xbcb   :  { %v688_v18 = vsel %vm686_vm2, 1, %v2090_v7 }
 0xbcc   :  { %v693_v19 = vrot.slane %v688_v18, %v2120_v17  ;;  %vm687_vm3 = vcmp.ne.s32.totalorder %v685_v16, 0 }
 0xbcd   :  { %v689_v27 = vsel %vm687_vm3, 1, %v2090_v7 }
 0xbce   :  { %vm698_vm5 = vcmp.eq.s32.totalorder %v693_v19, 1  ;;  %v697_v30 = vrot.slane %v689_v27, %v2120_v17 }
 0xbcf   :  { %v700_v33 = vsel %vm698_vm5, %v2134_v23, 0.0 }
 0xbd0   :  { %v702_v35 = vsel %vm54_vm4, %v700_v33, 0.0  ;;  %vm699_vm8 = vcmp.eq.s32.totalorder %v697_v30, 1 }
 0xbd1   :  { %703 = vadd.xlane.f32.xlu0 %v702_v35  ;;  %v701_v36 = vsel %vm699_vm8, %v2128_v21, 0.0 }
 0xbd2   :  { %v705_v37 = vsel %vm54_vm4, %v701_v36, 0.0 }
 0xbd3   :  { %706 = vadd.xlane.f32.xlu1 %v705_v37 }
 0xc5a   :  { %v2333_v38 = vpop.xlane.xlu0 %703 }
 0xc5b   :  { %v708_v39 = vsub.f32 %v2134_v23, %v2333_v38 }
 0xc5c   :  { %v2337_v46 = vpop.xlane.xlu1 %706 }
 0xc5d   :  { %v710_v47 = vmul.f32 %v708_v39, %v708_v39  ;;  %v709_v49 = vsub.f32 %v2128_v21, %v2337_v46 }
 0xc5f   :  { %v714_v40 = vrot.slane %v710_v47, 1  ;;  %v711_v43 = vmul.f32 %v709_v49, %v709_v49  ;;  %v720_v51 = vrot.slane %v710_v47, 2 }
 0xc61   :  { %v718_v42 = vadd.f32 %v714_v40, %v710_v47  ;;  %v715_v45 = vrot.slane %v711_v43, 1  ;;  %v721_v53 = vrot.slane %v711_v43, 2 }
 0xc63   :  { %v719_v52 = vadd.f32 %v715_v45, %v711_v43  ;;  %v724_v54 = vadd.f32 %v720_v51, %v718_v42 }
 0xc65   :  { %v725_v48 = vadd.f32 %v721_v53, %v719_v52  ;;  %726 = vst [vmem:[#allocation3 + $0x5] sm:$0x1] %v724_v54  ;;  %v2345_v41 = vmin.f32 %v2306_v44, %v724_v54 }
 0xc67   :  { %727 = vst [vmem:[#allocation3 + $0xd] sm:$0x1] %v725_v48  ;;  %v2342_v55 = vmin.f32 %v2303_v50, %v725_v48 }
 0xc69   :  { %v760_v56 = vrot.slane %v2342_v55, 7 }
 0xc6b   :  { %v761_v57 = vsel %vm114_vm6, %v760_v56, %v2345_v41 }
 0xc6c   :  { %v763_v58 = vsel %vm117_vm7, %v761_v57, -inf }
 0xc6d   :  { %764 = vmax.xlane.f32.xlu1 %v763_v58 }
 0xcf6   :  { %v765_v59 = vpop.xlane.xlu1 %764 }
 0xcf7   :  { %v767_v60 = vrot.slane %v765_v59, 1  ;;  %vm770_vm9 = vcmp.ge.f32.partialorder %v2345_v41, %v765_v59 }
 0xcf8   :  { %v772_v44 = vsel %vm770_vm9, %v2107_v3, 128 }
 0xcf9   :  { %vm771_vm10 = vcmp.ge.f32.partialorder %v2342_v55, %v767_v60 }
 0xcfa   :  { %v773_v50 = vsel %vm771_vm10, %v2107_v3, 128  ;;  %vm1014_vm10 = vcmask 7168  }
 0xcfb   :  { %v774_v61 = vrot.slane %v773_v50, 7 }
 0xcfd   :  { %v775_v62 = vsel %vm114_vm6, %v774_v61, %v772_v44 }
 0xcfe   :  { %v776_v63 = vsel %vm117_vm7, %v775_v62, 2147483647 }
 0xcff   :  { %v778_v0 = vshra.s32 %v776_v63, 16  ;;  %v777_v2 = vand.u32 65535, %v776_v63 }
 0xd01   :  { %v780_v1 = vcvt.s32.f32 %v778_v0  ;;  %v779_v6 = vcvt.s32.f32 %v777_v2 }
 0xd03   :  { %781 = vmin.xlane.f32.xlu0 %v780_v1 }
 0xd8c   :  { %v782_v4 = vpop.xlane.xlu0 %781 }
 0xd8d   :  { %vm783_vm11 = vcmp.eq.f32.partialorder %v780_v1, %v782_v4  ;;  %v788_v10 = vcvt.f32.s32 %v782_v4 }
 0xd8e   :  { %v784_v8 = vsel %vm783_vm11, %v779_v6, inf  ;;  %vm1017_vm11 = vcmask 15360  }
 0xd8f   :  { %785 = vmin.xlane.f32.xlu1 %v784_v8  ;;  %v789_v12 = vshll.u32 %v788_v10, 16 }
 0xe18   :  { %v786_v11 = vpop.xlane.xlu1 %785 }
 0xe19   :  { %v787_v13 = vcvt.f32.s32 %v786_v11 }
 0xe1b   :  { %v790_v14 = vadd.s32 %v789_v12, %v787_v13 }
 0xe1d   :  { %vm791_vm12 = vcmp.eq.s32.totalorder %v2107_v3, %v790_v14 }
 0xe1e   :  { %v792_v15 = vsel %vm791_vm12, 1, %v2090_v7  ;;  %v857_v16 = vsel %vm791_vm12, 1.0, %v2089_v5  ;;  %vm1020_vm12 = vcmask 23552  }
 0xe1f   :  { %v865_v18 = vrot.slane %v857_v16, %v2113_v9  ;;  %v799_v19 = vrot.slane %v792_v15, %v2113_v9 }
 0xe21   :  { %v866_v27 = vcombine.high %v865_v18, %v865_v18  ;;  %1971 = vst.sshfl [vmem:[#allocation4 + $0x6] sm:$0x1 pattern:$0x73625140] %v865_v18  ;;  %v807_v30 = vrot.slane %v799_v19, %v2113_v9  ;;  %v800_v33 = vcombine.high %v799_v19, %v799_v19 }
 0xe23   :  { %1972 = vst.sshfl [vmem:[#allocation4 + $0xe] sm:$0x1 pattern:$0x73625140] %v866_v27  ;;  %vm815_vm13 = vcmp.ne.s32.totalorder %v807_v30, 0  ;;  %v814_v35 = vrot.slane %v800_v33, %v2113_v9 }
 0xe24   :  { %v817_v36 = vsel %vm815_vm13, 1, %v2090_v7  ;;  %vm1023_vm13 = vcmask 31744  }
 0xe25   :  { %v822_v37 = vrot.slane %v817_v36, %v2120_v17  ;;  %vm816_vm14 = vcmp.ne.s32.totalorder %v814_v35, 0 }
 0xe26   :  { %v818_v39 = vsel %vm816_vm14, 1, %v2090_v7  ;;  %vm1026_vm14 = vcmask 39936  }
 0xe27   :  { %vm827_vm15 = vcmp.eq.s32.totalorder %v822_v37, 1  ;;  %v826_v47 = vrot.slane %v818_v39, %v2120_v17 }
 0xe28   :  { %v829_v49 = vsel %vm827_vm15, %v2134_v23, 0.0  ;;  %vm1029_vm15 = vcmask 48128  }
 0xe29   :  { %v831_v40 = vsel %vm54_vm4, %v829_v49, 0.0  ;;  %vm828_vm0 = vcmp.eq.s32.totalorder %v826_v47, 1 }
 0xe2a   :  { %832 = vadd.xlane.f32.xlu1 %v831_v40  ;;  %v830_v43 = vsel %vm828_vm0, %v2128_v21, 0.0  ;;  %vm1035_vm0 = vcmask 59392  }
 0xe2b   :  { %v834_v42 = vsel %vm54_vm4, %v830_v43, 0.0 }
 0xe2c   :  { %835 = vadd.xlane.f32.xlu0 %v834_v42 }
 0xeb3   :  { %v2372_v51 = vpop.xlane.xlu1 %832 }
 0xeb4   :  { %v837_v45 = vsub.f32 %v2134_v23, %v2372_v51 }
 0xeb5   :  { %v2376_v52 = vpop.xlane.xlu0 %835 }
 0xeb6   :  { %v839_v53 = vmul.f32 %v837_v45, %v837_v45  ;;  %v838_v54 = vsub.f32 %v2128_v21, %v2376_v52 }
 0xeb8   :  { %v843_v48 = vrot.slane %v839_v53, 1  ;;  %v840_v56 = vmul.f32 %v838_v54, %v838_v54  ;;  %v849_v58 = vrot.slane %v839_v53, 2 }
 0xeba   :  { %v847_v57 = vadd.f32 %v843_v48, %v839_v53  ;;  %v844_v59 = vrot.slane %v840_v56, 1  ;;  %v850_v50 = vrot.slane %v840_v56, 2 }
 0xebc   :  { %v848_v60 = vadd.f32 %v844_v59, %v840_v56  ;;  %v853_v61 = vadd.f32 %v849_v58, %v847_v57 }
 0xebe   :  { %v854_v44 = vadd.f32 %v850_v50, %v848_v60  ;;  %855 = vst [vmem:[#allocation3 + $0x6] sm:$0x1] %v853_v61  ;;  %v885_v63 = vmin.f32 %v2345_v41, %v853_v61 }
 0xec0   :  { %v886_v62 = vmin.f32 %v2342_v55, %v854_v44  ;;  %856 = vst [vmem:[#allocation3 + $0xe] sm:$0x1] %v854_v44 }
 0xec2   :  { %v889_v0 = vrot.slane %v886_v62, 7 }
 0xec4   :  { %v890_v1 = vsel %vm114_vm6, %v889_v0, %v885_v63 }
 0xec5   :  { %v892_v2 = vsel %vm117_vm7, %v890_v1, -inf }
 0xec6   :  { %893 = vmax.xlane.f32.xlu0 %v892_v2 }
 0xf4f   :  { %v894_v4 = vpop.xlane.xlu0 %893 }
 0xf50   :  { %v896_v6 = vrot.slane %v894_v4, 1  ;;  %vm899_vm1 = vcmp.ge.f32.partialorder %v885_v63, %v894_v4 }
 0xf51   :  { %v901_v11 = vsel %vm899_vm1, %v2107_v3, 128 }
 0xf52   :  { %vm900_vm2 = vcmp.ge.f32.partialorder %v886_v62, %v896_v6 }
 0xf53   :  { %v902_v8 = vsel %vm900_vm2, %v2107_v3, 128 }
 0xf54   :  { %v903_v10 = vrot.slane %v902_v8, 7 }
 0xf56   :  { %v904_v55 = vsel %vm114_vm6, %v903_v10, %v901_v11 }
 0xf57   :  { %v905_v12 = vsel %vm117_vm7, %v904_v55, 2147483647 }
 0xf58   :  { %v907_v41 = vshra.s32 %v905_v12, 16  ;;  %v906_v14 = vand.u32 65535, %v905_v12 }
 0xf5a   :  { %v909_v13 = vcvt.s32.f32 %v907_v41  ;;  %v908_v16 = vcvt.s32.f32 %v906_v14 }
 0xf5c   :  { %910 = vmin.xlane.f32.xlu1 %v909_v13 }
 0xfe5   :  { %v911_v15 = vpop.xlane.xlu1 %910 }
 0xfe6   :  { %vm912_vm3 = vcmp.eq.f32.partialorder %v909_v13, %v911_v15  ;;  %v917_v19 = vcvt.f32.s32 %v911_v15 }
 0xfe7   :  { %v913_v18 = vsel %vm912_vm3, %v908_v16, inf }
 0xfe8   :  { %914 = vmin.xlane.f32.xlu0 %v913_v18  ;;  %v918_v30 = vshll.u32 %v917_v19, 16 }
0x1071   :  { %v915_v27 = vpop.xlane.xlu0 %914 }
0x1072   :  { %v916_v33 = vcvt.f32.s32 %v915_v27 }
0x1074   :  { %v919_v35 = vadd.s32 %v918_v30, %v916_v33 }
0x1076   :  { %vm920_vm5 = vcmp.eq.s32.totalorder %v2107_v3, %v919_v35 }
0x1077   :  { %v921_v36 = vsel %vm920_vm5, 1, %v2090_v7  ;;  %v986_v37 = vsel %vm920_vm5, 1.0, %v2089_v5 }
0x1078   :  { %v994_v39 = vrot.slane %v986_v37, %v2113_v9  ;;  %v928_v47 = vrot.slane %v921_v36, %v2113_v9 }
0x107a   :  { %v995_v49 = vcombine.high %v994_v39, %v994_v39  ;;  %1973 = vst.sshfl [vmem:[#allocation4 + $0x7] sm:$0x1 pattern:$0x73625140] %v994_v39  ;;  %v936_v40 = vrot.slane %v928_v47, %v2113_v9  ;;  %v929_v43 = vcombine.high %v928_v47, %v928_v47 }
0x107c   :  { %1974 = vst.sshfl [vmem:[#allocation4 + $0xf] sm:$0x1 pattern:$0x73625140] %v995_v49  ;;  %vm944_vm6 = vcmp.ne.s32.totalorder %v936_v40, 0  ;;  %v943_v42 = vrot.slane %v929_v43, %v2113_v9 }
0x107d   :  { %v946_v45 = vsel %vm944_vm6, 1, %v2090_v7 }
0x107e   :  { %v951_v53 = vrot.slane %v946_v45, %v2120_v17  ;;  %vm945_vm7 = vcmp.ne.s32.totalorder %v943_v42, 0 }
0x107f   :  { %v947_v54 = vsel %vm945_vm7, 1, %v2090_v7  ;;  %v1015_v7 = vsel %vm1014_vm10, %v2144_v31, %v2177_v24 }
0x1080   :  { %vm956_vm8 = vcmp.eq.s32.totalorder %v951_v53, 1  ;;  %v955_v48 = vrot.slane %v947_v54, %v2120_v17  ;;  %v1018_v17 = vsel %vm1017_vm11, %v1015_v7, %v2216_v20 }
0x1081   :  { %v958_v56 = vsel %vm956_vm8, %v2134_v23, 0.0  ;;  %v1016_v23 = vsel %vm1014_vm10, %v2140_v28, %v2181_v26  ;;  %v1021_v59 = vsel %vm1020_vm12, %v1018_v17, %v2255_v22  ;;  %v2084_v26 = vld [vmem:[%s2867_s0] sm:$0x7] }
0x1082   :  { %v960_v57 = vsel %vm54_vm4, %v958_v56, 0.0  ;;  %vm957_vm9 = vcmp.eq.s32.totalorder %v955_v48, 1  ;;  %v1024_v60 = vsel %vm1023_vm13, %v1021_v59, %v2294_v32 }
0x1083   :  { %961 = vadd.xlane.f32.xlu1 %v960_v57  ;;  %v959_v58 = vsel %vm957_vm9, %v2128_v21, 0.0  ;;  %v1019_v21 = vsel %vm1017_vm11, %v1016_v23, %v2220_v25  ;;  %v1027_v61 = vsel %vm1026_vm14, %v1024_v60, %v2333_v38  ;;  %v2085_v38 = vld [vmem:[%s2867_s0 + $0x4] sm:$0x7] }
0x1084   :  { %v963_v9 = vsel %vm54_vm4, %v959_v58, 0.0  ;;  %vm1032_vm4 = vcmask 56320   ;;  %v1022_v50 = vsel %vm1020_vm12, %v1019_v21, %v2259_v29  ;;  %v1030_v24 = vsel %vm1029_vm15, %v1027_v61, %v2372_v51 }
0x1085   :  { %964 = vadd.xlane.f32.xlu0 %v963_v9  ;;  %v1025_v31 = vsel %vm1023_vm13, %v1022_v50, %v2298_v34 }
0x1086   :  { %v1028_v28 = vsel %vm1026_vm14, %v1025_v31, %v2337_v46 }
0x1087   :  { %v1031_v32 = vsel %vm1029_vm15, %v1028_v28, %v2376_v52 }
0x110c   :  { %v962_v20 = vpop.xlane.xlu1 %961 }
0x110d   :  { %v966_v25 = vsub.f32 %v2084_v26, %v962_v20  ;;  %v1033_v22 = vsel %vm1032_vm4, %v1030_v24, %v962_v20 }
0x110e   :  { %1036 = vst.msk [vmem:[%s2868_s2] sm:$0x7] %vm1035_vm0, %v1033_v22  ;;  %v965_v29 = vpop.xlane.xlu0 %964 }
0x110f   :  { %v968_v34 = vmul.f32 %v966_v25, %v966_v25  ;;  %v967_v46 = vsub.f32 %v2085_v38, %v965_v29  ;;  %v1034_v51 = vsel %vm1032_vm4, %v1031_v32, %v965_v29 }
0x1110   :  { %1037 = vst.msk [vmem:[%s2868_s2 + $0x4] sm:$0x7] %vm1035_vm0, %v1034_v51 }
0x1111   :  { %v972_v44 = vrot.slane %v968_v34, 1  ;;  %v969_v62 = vmul.f32 %v967_v46, %v967_v46  ;;  %v978_v63 = vrot.slane %v968_v34, 2 }
0x1113   :  { %v976_v52 = vadd.f32 %v972_v44, %v968_v34  ;;  %v973_v0 = vrot.slane %v969_v62, 1  ;;  %v979_v4 = vrot.slane %v969_v62, 2 }
0x1115   :  { %v982_v1 = vadd.f32 %v978_v63, %v976_v52  ;;  %v977_v2 = vadd.f32 %v973_v0, %v969_v62 }
0x1117   :  { %984 = vst [vmem:[#allocation3 + $0x7] sm:$0x1] %v982_v1  ;;  %v983_v6 = vadd.f32 %v979_v4, %v977_v2 }
0x1119   :  { %985 = vst [vmem:[#allocation3 + $0xf] sm:$0x1] %v983_v6 }
0x111e   :  { %v1038_v8 = vld [vmem:[#allocation3] sm:$0xff] }
0x111f   :  { %1042 = vmin.xlane.f32.xlu1 %v1038_v8 }
0x1120   :  { %v1039_v10 = vld [vmem:[#allocation3 + $0x8] sm:$0xff] }
0x1121   :  { %1044 = vmin.xlane.f32.xlu0 %v1039_v10 }
0x11a8   :  { %v1043_v11 = vpop.xlane.xlu1 %1042 }
0x11a9   :  { %vm1046_vm1 = vcmp.le.f32.partialorder %v1038_v8, %v1043_v11 }
0x11aa   :  { %v1048_v55 = vsel %vm1046_vm1, %v2107_v3, 128  ;;  %v1045_v12 = vpop.xlane.xlu0 %1044 }
0x11ab   :  { %vm1047_vm2 = vcmp.le.f32.partialorder %v1039_v10, %v1045_v12  ;;  %v1051_v41 = vshra.s32 %v1048_v55, 16  ;;  %v1050_v18 = vand.u32 65535, %v1048_v55 }
0x11ac   :  { %v1049_v13 = vsel %vm1047_vm2, %v2107_v3, 128 }
0x11ad   :  { %v1053_v14 = vcvt.s32.f32 %v1051_v41  ;;  %v1065_v15 = vshra.s32 %v1049_v13, 16  ;;  %v1064_v19 = vand.u32 65535, %v1049_v13  ;;  %v1052_v30 = vcvt.s32.f32 %v1050_v18 }
0x11af   :  { %1054 = vmin.xlane.f32.xlu1 %v1053_v14  ;;  %v1067_v16 = vcvt.s32.f32 %v1065_v15  ;;  %v1066_v36 = vcvt.s32.f32 %v1064_v19 }
0x11b1   :  { %1068 = vmin.xlane.f32.xlu0 %v1067_v16 }
0x1238   :  { %v1055_v27 = vpop.xlane.xlu1 %1054 }
0x1239   :  { %vm1056_vm3 = vcmp.eq.f32.partialorder %v1053_v14, %v1055_v27  ;;  %v1061_v39 = vcvt.f32.s32 %v1055_v27 }
0x123a   :  { %v1069_v33 = vpop.xlane.xlu0 %1068  ;;  %v1057_v35 = vsel %vm1056_vm3, %v1052_v30, inf }
0x123b   :  { %1058 = vmin.xlane.f32.xlu1 %v1057_v35  ;;  %vm1070_vm5 = vcmp.eq.f32.partialorder %v1067_v16, %v1069_v33  ;;  %v1075_v47 = vcvt.f32.s32 %v1069_v33  ;;  %v1062_v40 = vshll.u32 %v1061_v39, 16 }
0x123c   :  { %v1071_v37 = vsel %vm1070_vm5, %v1066_v36, inf }
0x123d   :  { %1072 = vmin.xlane.f32.xlu0 %v1071_v37  ;;  %v1076_v45 = vshll.u32 %v1075_v47, 16 }
0x12c4   :  { %v1059_v49 = vpop.xlane.xlu1 %1058 }
0x12c5   :  { %v1060_v43 = vcvt.f32.s32 %v1059_v49 }
0x12c6   :  { %v1073_v42 = vpop.xlane.xlu0 %1072 }
0x12c7   :  { %v2433_v53 = vadd.s32 %v1062_v40, %v1060_v43  ;;  %v1074_v54 = vcvt.f32.s32 %v1073_v42 }
0x12c9   :  { %v2435_v48 = vadd.s32 %v1076_v45, %v1074_v54  ;;  %vm2871_vm6 = vcmp.eq.s32.totalorder %v2107_v3, %v2433_v53 }
0x12ca   :  { %v1080_v56 = vsel %vm2871_vm6, 1e+30, %v1038_v8 }
0x12cb   :  { %1088 = vmin.xlane.f32.xlu1 %v1080_v56  ;;  %vm2870_vm7 = vcmp.eq.s32.totalorder %v2107_v3, %v2435_v48 }
0x12cc   :  { %v1081_v57 = vsel %vm2870_vm7, 1e+30, %v1039_v10 }
0x12cd   :  { %1090 = vmin.xlane.f32.xlu0 %v1081_v57 }
0x1354   :  { %v1089_v58 = vpop.xlane.xlu1 %1088 }
0x1355   :  { %vm1092_vm8 = vcmp.le.f32.partialorder %v1080_v56, %v1089_v58 }
0x1356   :  { %v1094_v9 = vsel %vm1092_vm8, %v2107_v3, 128  ;;  %v1091_v7 = vpop.xlane.xlu0 %1090 }
0x1357   :  { %vm1093_vm9 = vcmp.le.f32.partialorder %v1081_v57, %v1091_v7  ;;  %v1097_v17 = vshra.s32 %v1094_v9, 16  ;;  %v1096_v50 = vand.u32 65535, %v1094_v9 }
0x1358   :  { %v1095_v23 = vsel %vm1093_vm9, %v2107_v3, 128 }
0x1359   :  { %v1099_v59 = vcvt.s32.f32 %v1097_v17  ;;  %v1111_v21 = vshra.s32 %v1095_v23, 16  ;;  %v1110_v61 = vand.u32 65535, %v1095_v23  ;;  %v1098_v24 = vcvt.s32.f32 %v1096_v50 }
0x135b   :  { %1100 = vmin.xlane.f32.xlu1 %v1099_v59  ;;  %v1113_v60 = vcvt.s32.f32 %v1111_v21  ;;  %v1112_v26 = vcvt.s32.f32 %v1110_v61 }
0x135d   :  { %1114 = vmin.xlane.f32.xlu0 %v1113_v60 }
0x13e4   :  { %v1101_v31 = vpop.xlane.xlu1 %1100 }
0x13e5   :  { %vm1102_vm10 = vcmp.eq.f32.partialorder %v1099_v59, %v1101_v31  ;;  %v1107_v22 = vcvt.f32.s32 %v1101_v31 }
0x13e6   :  { %v1115_v20 = vpop.xlane.xlu0 %1114  ;;  %v1103_v28 = vsel %vm1102_vm10, %v1098_v24, inf }
0x13e7   :  { %1104 = vmin.xlane.f32.xlu1 %v1103_v28  ;;  %vm1116_vm11 = vcmp.eq.f32.partialorder %v1113_v60, %v1115_v20  ;;  %v1121_v32 = vcvt.f32.s32 %v1115_v20  ;;  %v1108_v34 = vshll.u32 %v1107_v22, 16 }
0x13e8   :  { %v1117_v25 = vsel %vm1116_vm11, %v1112_v26, inf }
0x13e9   :  { %1118 = vmin.xlane.f32.xlu0 %v1117_v25  ;;  %v1122_v51 = vshll.u32 %v1121_v32, 16 }
0x1470   :  { %v1105_v29 = vpop.xlane.xlu1 %1104 }
0x1471   :  { %v1106_v38 = vcvt.f32.s32 %v1105_v29 }
0x1472   :  { %v1119_v46 = vpop.xlane.xlu0 %1118 }
0x1473   :  { %v2449_v44 = vadd.s32 %v1108_v34, %v1106_v38  ;;  %v1120_v62 = vcvt.f32.s32 %v1119_v46 }
0x1475   :  { %v2451_v52 = vadd.s32 %v1122_v51, %v1120_v62  ;;  %vm2873_vm12 = vcmp.eq.s32.totalorder %v2107_v3, %v2449_v44 }
0x1476   :  { %v1126_v63 = vsel %vm2873_vm12, 1e+30, %v1080_v56 }
0x1477   :  { %1134 = vmin.xlane.f32.xlu1 %v1126_v63  ;;  %vm2872_vm13 = vcmp.eq.s32.totalorder %v2107_v3, %v2451_v52 }
0x1478   :  { %v1127_v0 = vsel %vm2872_vm13, 1e+30, %v1081_v57 }
0x1479   :  { %1136 = vmin.xlane.f32.xlu0 %v1127_v0 }
0x1500   :  { %v1135_v1 = vpop.xlane.xlu1 %1134 }
0x1501   :  { %vm1138_vm14 = vcmp.le.f32.partialorder %v1126_v63, %v1135_v1 }
0x1502   :  { %v1140_v2 = vsel %vm1138_vm14, %v2107_v3, 128  ;;  %v1137_v4 = vpop.xlane.xlu0 %1136 }
0x1503   :  { %vm1139_vm15 = vcmp.le.f32.partialorder %v1127_v0, %v1137_v4  ;;  %v1143_v6 = vshra.s32 %v1140_v2, 16  ;;  %v1142_v12 = vand.u32 65535, %v1140_v2 }
0x1504   :  { %v1141_v8 = vsel %vm1139_vm15, %v2107_v3, 128 }
0x1505   :  { %v1145_v10 = vcvt.s32.f32 %v1143_v6  ;;  %v1157_v11 = vshra.s32 %v1141_v8, 16  ;;  %v1156_v41 = vand.u32 65535, %v1141_v8  ;;  %v1144_v14 = vcvt.s32.f32 %v1142_v12 }
0x1507   :  { %1146 = vmin.xlane.f32.xlu1 %v1145_v10  ;;  %v1159_v55 = vcvt.s32.f32 %v1157_v11  ;;  %v1158_v18 = vcvt.s32.f32 %v1156_v41 }
0x1509   :  { %1160 = vmin.xlane.f32.xlu0 %v1159_v55 }
0x1590   :  { %v1147_v13 = vpop.xlane.xlu1 %1146 }
0x1591   :  { %vm1148_vm4 = vcmp.eq.f32.partialorder %v1145_v10, %v1147_v13  ;;  %v1153_v27 = vcvt.f32.s32 %v1147_v13 }
0x1592   :  { %v1161_v15 = vpop.xlane.xlu0 %1160  ;;  %v1149_v16 = vsel %vm1148_vm4, %v1144_v14, inf }
0x1593   :  { %1150 = vmin.xlane.f32.xlu1 %v1149_v16  ;;  %vm1162_vm0 = vcmp.eq.f32.partialorder %v1159_v55, %v1161_v15  ;;  %v1167_v30 = vcvt.f32.s32 %v1161_v15  ;;  %v1154_v35 = vshll.u32 %v1153_v27, 16 }
0x1594   :  { %v1163_v19 = vsel %vm1162_vm0, %v1158_v18, inf }
0x1595   :  { %1164 = vmin.xlane.f32.xlu0 %v1163_v19  ;;  %v1168_v39 = vshll.u32 %v1167_v30, 16 }
0x161c   :  { %v1151_v33 = vpop.xlane.xlu1 %1150 }
0x161d   :  { %v1152_v36 = vcvt.f32.s32 %v1151_v33 }
0x161e   :  { %v1165_v37 = vpop.xlane.xlu0 %1164 }
0x161f   :  { %v2465_v47 = vadd.s32 %v1154_v35, %v1152_v36  ;;  %v1166_v49 = vcvt.f32.s32 %v1165_v37 }
0x1621   :  { %v2467_v40 = vadd.s32 %v1168_v39, %v1166_v49  ;;  %vm2875_vm1 = vcmp.eq.s32.totalorder %v2107_v3, %v2465_v47 }
0x1622   :  { %v1172_v43 = vsel %vm2875_vm1, 1e+30, %v1126_v63 }
0x1623   :  { %1180 = vmin.xlane.f32.xlu1 %v1172_v43  ;;  %vm2874_vm2 = vcmp.eq.s32.totalorder %v2107_v3, %v2467_v40 }
0x1624   :  { %v1173_v42 = vsel %vm2874_vm2, 1e+30, %v1127_v0 }
0x1625   :  { %1182 = vmin.xlane.f32.xlu0 %v1173_v42 }
0x16ac   :  { %v1181_v45 = vpop.xlane.xlu1 %1180 }
0x16ad   :  { %vm1184_vm3 = vcmp.le.f32.partialorder %v1172_v43, %v1181_v45 }
0x16ae   :  { %v1186_v54 = vsel %vm1184_vm3, %v2107_v3, 128  ;;  %v1183_v56 = vpop.xlane.xlu0 %1182 }
0x16af   :  { %vm1185_vm5 = vcmp.le.f32.partialorder %v1173_v42, %v1183_v56  ;;  %v1189_v57 = vshra.s32 %v1186_v54, 16  ;;  %v1188_v23 = vand.u32 65535, %v1186_v54 }
0x16b0   :  { %v1187_v58 = vsel %vm1185_vm5, %v2107_v3, 128 }
0x16b1   :  { %v1191_v9 = vcvt.s32.f32 %v1189_v57  ;;  %v1203_v7 = vshra.s32 %v1187_v58, 16  ;;  %v1202_v59 = vand.u32 65535, %v1187_v58  ;;  %v1190_v60 = vcvt.s32.f32 %v1188_v23 }
0x16b3   :  { %1192 = vmin.xlane.f32.xlu1 %v1191_v9  ;;  %v1205_v17 = vcvt.s32.f32 %v1203_v7  ;;  %v1204_v31 = vcvt.s32.f32 %v1202_v59 }
0x16b5   :  { %1206 = vmin.xlane.f32.xlu0 %v1205_v17 }
0x173c   :  { %v1193_v21 = vpop.xlane.xlu1 %1192 }
0x173d   :  { %vm1194_vm8 = vcmp.eq.f32.partialorder %v1191_v9, %v1193_v21  ;;  %v1199_v20 = vcvt.f32.s32 %v1193_v21 }
0x173e   :  { %v1207_v50 = vpop.xlane.xlu0 %1206  ;;  %v1195_v61 = vsel %vm1194_vm8, %v1190_v60, inf }
0x173f   :  { %1196 = vmin.xlane.f32.xlu1 %v1195_v61  ;;  %vm1208_vm9 = vcmp.eq.f32.partialorder %v1205_v17, %v1207_v50  ;;  %v1213_v28 = vcvt.f32.s32 %v1207_v50  ;;  %v1200_v25 = vshll.u32 %v1199_v20, 16 }
0x1740   :  { %v1209_v24 = vsel %vm1208_vm9, %v1204_v31, inf }
0x1741   :  { %1210 = vmin.xlane.f32.xlu0 %v1209_v24  ;;  %v1214_v29 = vshll.u32 %v1213_v28, 16 }
0x17c8   :  { %v1197_v26 = vpop.xlane.xlu1 %1196 }
0x17c9   :  { %v1198_v22 = vcvt.f32.s32 %v1197_v26 }
0x17ca   :  { %v1211_v32 = vpop.xlane.xlu0 %1210 }
0x17cb   :  { %v2481_v34 = vadd.s32 %v1200_v25, %v1198_v22  ;;  %v1212_v38 = vcvt.f32.s32 %v1211_v32 }
0x17cd   :  { %v2483_v46 = vadd.s32 %v1214_v29, %v1212_v38  ;;  %vm2877_vm10 = vcmp.eq.s32.totalorder %v2107_v3, %v2481_v34 }
0x17ce   :  { %v1218_v51 = vsel %vm2877_vm10, 1e+30, %v1172_v43 }
0x17cf   :  { %1226 = vmin.xlane.f32.xlu1 %v1218_v51  ;;  %vm2876_vm11 = vcmp.eq.s32.totalorder %v2107_v3, %v2483_v46 }
0x17d0   :  { %v1219_v62 = vsel %vm2876_vm11, 1e+30, %v1173_v42 }
0x17d1   :  { %1228 = vmin.xlane.f32.xlu0 %v1219_v62 }
0x1858   :  { %v1227_v63 = vpop.xlane.xlu1 %1226 }
0x1859   :  { %vm1230_vm14 = vcmp.le.f32.partialorder %v1218_v51, %v1227_v63 }
0x185a   :  { %v1232_v0 = vsel %vm1230_vm14, %v2107_v3, 128  ;;  %v1229_v1 = vpop.xlane.xlu0 %1228 }
0x185b   :  { %vm1231_vm15 = vcmp.le.f32.partialorder %v1219_v62, %v1229_v1  ;;  %v1235_v2 = vshra.s32 %v1232_v0, 16  ;;  %v1234_v11 = vand.u32 65535, %v1232_v0 }
0x185c   :  { %v1233_v4 = vsel %vm1231_vm15, %v2107_v3, 128 }
0x185d   :  { %v1237_v6 = vcvt.s32.f32 %v1235_v2  ;;  %v1249_v8 = vshra.s32 %v1233_v4, 16  ;;  %v1248_v55 = vand.u32 65535, %v1233_v4  ;;  %v1236_v41 = vcvt.s32.f32 %v1234_v11 }
0x185f   :  { %1238 = vmin.xlane.f32.xlu1 %v1237_v6  ;;  %v1251_v10 = vcvt.s32.f32 %v1249_v8  ;;  %v1250_v15 = vcvt.s32.f32 %v1248_v55 }
0x1861   :  { %1252 = vmin.xlane.f32.xlu0 %v1251_v10 }
0x18e8   :  { %v1239_v12 = vpop.xlane.xlu1 %1238 }
0x18e9   :  { %vm1240_vm4 = vcmp.eq.f32.partialorder %v1237_v6, %v1239_v12  ;;  %v1245_v18 = vcvt.f32.s32 %v1239_v12 }
0x18ea   :  { %v1253_v13 = vpop.xlane.xlu0 %1252  ;;  %v1241_v14 = vsel %vm1240_vm4, %v1236_v41, inf }
0x18eb   :  { %1242 = vmin.xlane.f32.xlu1 %v1241_v14  ;;  %vm1254_vm0 = vcmp.eq.f32.partialorder %v1251_v10, %v1253_v13  ;;  %v1259_v19 = vcvt.f32.s32 %v1253_v13  ;;  %v1246_v30 = vshll.u32 %v1245_v18, 16 }
0x18ec   :  { %v1255_v16 = vsel %vm1254_vm0, %v1250_v15, inf }
0x18ed   :  { %1256 = vmin.xlane.f32.xlu0 %v1255_v16  ;;  %v1260_v36 = vshll.u32 %v1259_v19, 16 }
0x1974   :  { %v1243_v27 = vpop.xlane.xlu1 %1242 }
0x1975   :  { %v1244_v33 = vcvt.f32.s32 %v1243_v27 }
0x1976   :  { %v1257_v35 = vpop.xlane.xlu0 %1256 }
0x1977   :  { %v2497_v37 = vadd.s32 %v1246_v30, %v1244_v33  ;;  %v1258_v39 = vcvt.f32.s32 %v1257_v35 }
0x1979   :  { %v2499_v49 = vadd.s32 %v1260_v36, %v1258_v39  ;;  %vm2879_vm3 = vcmp.eq.s32.totalorder %v2107_v3, %v2497_v37 }
0x197a   :  { %v1264_v43 = vsel %vm2879_vm3, 1e+30, %v1218_v51 }
0x197b   :  { %1272 = vmin.xlane.f32.xlu1 %v1264_v43  ;;  %vm2878_vm5 = vcmp.eq.s32.totalorder %v2107_v3, %v2499_v49 }
0x197c   :  { %v1265_v42 = vsel %vm2878_vm5, 1e+30, %v1219_v62 }
0x197d   :  { %1274 = vmin.xlane.f32.xlu0 %v1265_v42 }
0x1a04   :  { %v1273_v45 = vpop.xlane.xlu1 %1272 }
0x1a05   :  { %vm1276_vm8 = vcmp.le.f32.partialorder %v1264_v43, %v1273_v45 }
0x1a06   :  { %v1278_v54 = vsel %vm1276_vm8, %v2107_v3, 128  ;;  %v1275_v56 = vpop.xlane.xlu0 %1274 }
0x1a07   :  { %vm1277_vm9 = vcmp.le.f32.partialorder %v1265_v42, %v1275_v56  ;;  %v1281_v57 = vshra.s32 %v1278_v54, 16  ;;  %v1280_v23 = vand.u32 65535, %v1278_v54 }
0x1a08   :  { %v1279_v58 = vsel %vm1277_vm9, %v2107_v3, 128 }
0x1a09   :  { %v1283_v9 = vcvt.s32.f32 %v1281_v57  ;;  %v1295_v7 = vshra.s32 %v1279_v58, 16  ;;  %v1294_v59 = vand.u32 65535, %v1279_v58  ;;  %v1282_v60 = vcvt.s32.f32 %v1280_v23 }
0x1a0b   :  { %1284 = vmin.xlane.f32.xlu1 %v1283_v9  ;;  %v1297_v17 = vcvt.s32.f32 %v1295_v7  ;;  %v1296_v31 = vcvt.s32.f32 %v1294_v59 }
0x1a0d   :  { %1298 = vmin.xlane.f32.xlu0 %v1297_v17 }
0x1a94   :  { %v1285_v21 = vpop.xlane.xlu1 %1284 }
0x1a95   :  { %vm1286_vm14 = vcmp.eq.f32.partialorder %v1283_v9, %v1285_v21  ;;  %v1291_v20 = vcvt.f32.s32 %v1285_v21 }
0x1a96   :  { %v1299_v50 = vpop.xlane.xlu0 %1298  ;;  %v1287_v61 = vsel %vm1286_vm14, %v1282_v60, inf }
0x1a97   :  { %1288 = vmin.xlane.f32.xlu1 %v1287_v61  ;;  %vm1300_vm15 = vcmp.eq.f32.partialorder %v1297_v17, %v1299_v50  ;;  %v1305_v28 = vcvt.f32.s32 %v1299_v50  ;;  %v1292_v25 = vshll.u32 %v1291_v20, 16 }
0x1a98   :  { %v1301_v24 = vsel %vm1300_vm15, %v1296_v31, inf }
0x1a99   :  { %1302 = vmin.xlane.f32.xlu0 %v1301_v24  ;;  %v1306_v29 = vshll.u32 %v1305_v28, 16 }
0x1b20   :  { %v1289_v26 = vpop.xlane.xlu1 %1288 }
0x1b21   :  { %v1290_v22 = vcvt.f32.s32 %v1289_v26 }
0x1b22   :  { %v1303_v32 = vpop.xlane.xlu0 %1302 }
0x1b23   :  { %v2513_v38 = vadd.s32 %v1292_v25, %v1290_v22  ;;  %v1304_v51 = vcvt.f32.s32 %v1303_v32 }
0x1b25   :  { %v2515_v62 = vadd.s32 %v1306_v29, %v1304_v51  ;;  %vm2881_vm4 = vcmp.eq.s32.totalorder %v2107_v3, %v2513_v38 }
0x1b26   :  { %v1310_v63 = vsel %vm2881_vm4, 1e+30, %v1264_v43 }
0x1b27   :  { %1318 = vmin.xlane.f32.xlu1 %v1310_v63  ;;  %vm2880_vm0 = vcmp.eq.s32.totalorder %v2107_v3, %v2515_v62 }
0x1b28   :  { %v1311_v0 = vsel %vm2880_vm0, 1e+30, %v1265_v42 }
0x1b29   :  { %1320 = vmin.xlane.f32.xlu0 %v1311_v0 }
0x1bb0   :  { %v1319_v1 = vpop.xlane.xlu1 %1318 }
0x1bb1   :  { %vm1322_vm8 = vcmp.le.f32.partialorder %v1310_v63, %v1319_v1 }
0x1bb2   :  { %v1324_v2 = vsel %vm1322_vm8, %v2107_v3, 128  ;;  %v1321_v4 = vpop.xlane.xlu0 %1320 }
0x1bb3   :  { %vm1323_vm9 = vcmp.le.f32.partialorder %v1311_v0, %v1321_v4  ;;  %v1327_v6 = vshra.s32 %v1324_v2, 16  ;;  %v1326_v12 = vand.u32 65535, %v1324_v2 }
0x1bb4   :  { %v1325_v8 = vsel %vm1323_vm9, %v2107_v3, 128 }
0x1bb5   :  { %v1329_v10 = vcvt.s32.f32 %v1327_v6  ;;  %v1341_v11 = vshra.s32 %v1325_v8, 16  ;;  %v1340_v41 = vand.u32 65535, %v1325_v8  ;;  %v1328_v14 = vcvt.s32.f32 %v1326_v12 }
0x1bb7   :  { %1330 = vmin.xlane.f32.xlu1 %v1329_v10  ;;  %v1343_v55 = vcvt.s32.f32 %v1341_v11  ;;  %v1342_v18 = vcvt.s32.f32 %v1340_v41 }
0x1bb9   :  { %1344 = vmin.xlane.f32.xlu0 %v1343_v55 }
0x1c40   :  { %v1331_v13 = vpop.xlane.xlu1 %1330 }
0x1c41   :  { %vm1332_vm14 = vcmp.eq.f32.partialorder %v1329_v10, %v1331_v13  ;;  %v1337_v27 = vcvt.f32.s32 %v1331_v13 }
0x1c42   :  { %v1345_v15 = vpop.xlane.xlu0 %1344  ;;  %v1333_v16 = vsel %vm1332_vm14, %v1328_v14, inf }
0x1c43   :  { %1334 = vmin.xlane.f32.xlu1 %v1333_v16  ;;  %vm1346_vm15 = vcmp.eq.f32.partialorder %v1343_v55, %v1345_v15  ;;  %v1351_v30 = vcvt.f32.s32 %v1345_v15  ;;  %v1338_v35 = vshll.u32 %v1337_v27, 16 }
0x1c44   :  { %v1347_v19 = vsel %vm1346_vm15, %v1342_v18, inf }
0x1c45   :  { %1348 = vmin.xlane.f32.xlu0 %v1347_v19  ;;  %v1352_v43 = vshll.u32 %v1351_v30, 16 }
0x1ccc   :  { %v1335_v33 = vpop.xlane.xlu1 %1334 }
0x1ccd   :  { %v1336_v36 = vcvt.f32.s32 %v1335_v33 }
0x1cce   :  { %v1349_v39 = vpop.xlane.xlu0 %1348 }
0x1ccf   :  { %v2529_v42 = vadd.s32 %v1338_v35, %v1336_v36  ;;  %v1350_v45 = vcvt.f32.s32 %v1349_v39 }
0x1cd1   :  { %v2531_v54 = vadd.s32 %v1352_v43, %v1350_v45  ;;  %vm2883_vm8 = vcmp.eq.s32.totalorder %v2107_v3, %v2529_v42 }
0x1cd2   :  { %v1356_v56 = vsel %vm2883_vm8, 1e+30, %v1310_v63 }
0x1cd3   :  { %1364 = vmin.xlane.f32.xlu1 %v1356_v56  ;;  %vm2882_vm9 = vcmp.eq.s32.totalorder %v2107_v3, %v2531_v54 }
0x1cd4   :  { %v1357_v57 = vsel %vm2882_vm9, 1e+30, %v1311_v0 }
0x1cd5   :  { %1366 = vmin.xlane.f32.xlu0 %v1357_v57 }
0x1d5c   :  { %v1365_v58 = vpop.xlane.xlu1 %1364 }
0x1d5d   :  { %vm1368_vm14 = vcmp.le.f32.partialorder %v1356_v56, %v1365_v58 }
0x1d5e   :  { %v1370_v9 = vsel %vm1368_vm14, %v2107_v3, 128  ;;  %v1367_v7 = vpop.xlane.xlu0 %1366 }
0x1d5f   :  { %vm1369_vm15 = vcmp.le.f32.partialorder %v1357_v57, %v1367_v7  ;;  %v1373_v17 = vshra.s32 %v1370_v9, 16  ;;  %v1372_v50 = vand.u32 65535, %v1370_v9 }
0x1d60   :  { %v1371_v23 = vsel %vm1369_vm15, %v2107_v3, 128 }
0x1d61   :  { %v1375_v59 = vcvt.s32.f32 %v1373_v17  ;;  %v1387_v21 = vshra.s32 %v1371_v23, 16  ;;  %v1386_v61 = vand.u32 65535, %v1371_v23  ;;  %v1374_v24 = vcvt.s32.f32 %v1372_v50 }
0x1d63   :  { %1376 = vmin.xlane.f32.xlu1 %v1375_v59  ;;  %v1389_v60 = vcvt.s32.f32 %v1387_v21  ;;  %v1388_v26 = vcvt.s32.f32 %v1386_v61 }
0x1d65   :  { %1390 = vmin.xlane.f32.xlu0 %v1389_v60 }
0x1dec   :  { %v1377_v31 = vpop.xlane.xlu1 %1376 }
0x1ded   :  { %vm1378_vm7 = vcmp.eq.f32.partialorder %v1375_v59, %v1377_v31  ;;  %v1383_v22 = vcvt.f32.s32 %v1377_v31 }
0x1dee   :  { %v1391_v20 = vpop.xlane.xlu0 %1390  ;;  %v1379_v28 = vsel %vm1378_vm7, %v1374_v24, inf }
0x1def   :  { %1380 = vmin.xlane.f32.xlu1 %v1379_v28  ;;  %vm1392_vm14 = vcmp.eq.f32.partialorder %v1389_v60, %v1391_v20  ;;  %v1397_v32 = vcvt.f32.s32 %v1391_v20  ;;  %v1384_v51 = vshll.u32 %v1383_v22, 16 }
0x1df0   :  { %v1393_v25 = vsel %vm1392_vm14, %v1388_v26, inf }
0x1df1   :  { %1394 = vmin.xlane.f32.xlu0 %v1393_v25  ;;  %v1398_v1 = vshll.u32 %v1397_v32, 16 }
0x1e78   :  { %v1381_v29 = vpop.xlane.xlu1 %1380 }
0x1e79   :  { %v1382_v63 = vcvt.f32.s32 %v1381_v29 }
0x1e7a   :  { %v1395_v0 = vpop.xlane.xlu0 %1394 }
0x1e7b   :  { %v2545_v2 = vadd.s32 %v1384_v51, %v1382_v63  ;;  %v1396_v4 = vcvt.f32.s32 %v1395_v0 }
0x1e7d   :  { %v2547_v6 = vadd.s32 %v1398_v1, %v1396_v4  ;;  %vm2885_vm7 = vcmp.eq.s32.totalorder %v2107_v3, %v2545_v2 }
0x1e7e   :  { %v1402_v8 = vsel %vm2885_vm7, 1e+30, %v1356_v56 }
0x1e7f   :  { %1410 = vmin.xlane.f32.xlu1 %v1402_v8  ;;  %vm2884_vm15 = vcmp.eq.s32.totalorder %v2107_v3, %v2547_v6 }
0x1e80   :  { %v1403_v10 = vsel %vm2884_vm15, 1e+30, %v1357_v57 }
0x1e81   :  { %1412 = vmin.xlane.f32.xlu0 %v1403_v10 }
0x1f08   :  { %v1411_v11 = vpop.xlane.xlu1 %1410 }
0x1f09   :  { %vm1414_vm14 = vcmp.le.f32.partialorder %v1402_v8, %v1411_v11 }
0x1f0a   :  { %v1416_v55 = vsel %vm1414_vm14, %v2107_v3, 128  ;;  %v1413_v12 = vpop.xlane.xlu0 %1412 }
0x1f0b   :  { %vm1415_vm6 = vcmp.le.f32.partialorder %v1403_v10, %v1413_v12  ;;  %v1419_v41 = vshra.s32 %v1416_v55, 16  ;;  %v1418_v18 = vand.u32 65535, %v1416_v55 }
0x1f0c   :  { %v1417_v13 = vsel %vm1415_vm6, %v2107_v3, 128 }
0x1f0d   :  { %v1421_v14 = vcvt.s32.f32 %v1419_v41  ;;  %v1433_v15 = vshra.s32 %v1417_v13, 16  ;;  %v1432_v19 = vand.u32 65535, %v1417_v13  ;;  %v1420_v30 = vcvt.s32.f32 %v1418_v18 }
0x1f0f   :  { %1422 = vmin.xlane.f32.xlu1 %v1421_v14  ;;  %v1435_v16 = vcvt.s32.f32 %v1433_v15  ;;  %v1434_v36 = vcvt.s32.f32 %v1432_v19 }
0x1f11   :  { %1436 = vmin.xlane.f32.xlu0 %v1435_v16 }
0x1f98   :  { %v1423_v27 = vpop.xlane.xlu1 %1422 }
0x1f99   :  { %vm1424_vm13 = vcmp.eq.f32.partialorder %v1421_v14, %v1423_v27  ;;  %v1429_v43 = vcvt.f32.s32 %v1423_v27 }
0x1f9a   :  { %v1437_v33 = vpop.xlane.xlu0 %1436  ;;  %v1425_v35 = vsel %vm1424_vm13, %v1420_v30, inf }
0x1f9b   :  { %1426 = vmin.xlane.f32.xlu1 %v1425_v35  ;;  %vm1438_vm14 = vcmp.eq.f32.partialorder %v1435_v16, %v1437_v33  ;;  %v1443_v45 = vcvt.f32.s32 %v1437_v33  ;;  %v1430_v57 = vshll.u32 %v1429_v43, 16 }
0x1f9c   :  { %v1439_v39 = vsel %vm1438_vm14, %v1434_v36, inf }
0x1f9d   :  { %1440 = vmin.xlane.f32.xlu0 %v1439_v39  ;;  %v1444_v7 = vshll.u32 %v1443_v45, 16 }
0x2024   :  { %v1427_v56 = vpop.xlane.xlu1 %1426 }
0x2025   :  { %v1428_v58 = vcvt.f32.s32 %v1427_v56 }
0x2026   :  { %v1441_v9 = vpop.xlane.xlu0 %1440 }
0x2027   :  { %v2561_v17 = vadd.s32 %v1430_v57, %v1428_v58  ;;  %v1442_v23 = vcvt.f32.s32 %v1441_v9 }
0x2029   :  { %v2563_v59 = vadd.s32 %v1444_v7, %v1442_v23  ;;  %vm2887_vm6 = vcmp.eq.s32.totalorder %v2107_v3, %v2561_v17 }
0x202a   :  { %v1448_v21 = vsel %vm2887_vm6, 1e+30, %v1402_v8 }
0x202b   :  { %1456 = vmin.xlane.f32.xlu1 %v1448_v21  ;;  %vm2886_vm13 = vcmp.eq.s32.totalorder %v2107_v3, %v2563_v59 }
0x202c   :  { %v1449_v60 = vsel %vm2886_vm13, 1e+30, %v1403_v10 }
0x202d   :  { %1458 = vmin.xlane.f32.xlu0 %v1449_v60 }
0x20b4   :  { %v1457_v50 = vpop.xlane.xlu1 %1456 }
0x20b5   :  { %vm1460_vm14 = vcmp.le.f32.partialorder %v1448_v21, %v1457_v50 }
0x20b6   :  { %v1462_v61 = vsel %vm1460_vm14, %v2107_v3, 128  ;;  %v1459_v31 = vpop.xlane.xlu0 %1458 }
0x20b7   :  { %vm1461_vm12 = vcmp.le.f32.partialorder %v1449_v60, %v1459_v31  ;;  %v1465_v24 = vshra.s32 %v1462_v61, 16  ;;  %v1464_v22 = vand.u32 65535, %v1462_v61 }
0x20b8   :  { %v1463_v20 = vsel %vm1461_vm12, %v2107_v3, 128 }
0x20b9   :  { %v1467_v28 = vcvt.s32.f32 %v1465_v24  ;;  %v1479_v26 = vshra.s32 %v1463_v20, 16  ;;  %v1478_v32 = vand.u32 65535, %v1463_v20  ;;  %v1466_v51 = vcvt.s32.f32 %v1464_v22 }
0x20bb   :  { %1468 = vmin.xlane.f32.xlu1 %v1467_v28  ;;  %v1481_v25 = vcvt.s32.f32 %v1479_v26  ;;  %v1480_v1 = vcvt.s32.f32 %v1478_v32 }
0x20bd   :  { %1482 = vmin.xlane.f32.xlu0 %v1481_v25 }
0x2144   :  { %v1469_v29 = vpop.xlane.xlu1 %1468 }
0x2145   :  { %vm1470_vm2 = vcmp.eq.f32.partialorder %v1467_v28, %v1469_v29  ;;  %v1475_v8 = vcvt.f32.s32 %v1469_v29 }
0x2146   :  { %v1483_v63 = vpop.xlane.xlu0 %1482  ;;  %v1471_v0 = vsel %vm1470_vm2, %v1466_v51, inf }
0x2147   :  { %1472 = vmin.xlane.f32.xlu1 %v1471_v0  ;;  %vm1484_vm14 = vcmp.eq.f32.partialorder %v1481_v25, %v1483_v63  ;;  %v1489_v10 = vcvt.f32.s32 %v1483_v63  ;;  %v1476_v55 = vshll.u32 %v1475_v8, 16 }
0x2148   :  { %v1485_v4 = vsel %vm1484_vm14, %v1480_v1, inf }
0x2149   :  { %1486 = vmin.xlane.f32.xlu0 %v1485_v4  ;;  %v1490_v13 = vshll.u32 %v1489_v10, 16 }
0x21d0   :  { %v1473_v11 = vpop.xlane.xlu1 %1472 }
0x21d1   :  { %v1474_v12 = vcvt.f32.s32 %v1473_v11 }
0x21d2   :  { %v1487_v41 = vpop.xlane.xlu0 %1486 }
0x21d3   :  { %v2577_v14 = vadd.s32 %v1476_v55, %v1474_v12  ;;  %v1488_v15 = vcvt.f32.s32 %v1487_v41 }
0x21d5   :  { %v2579_v16 = vadd.s32 %v1490_v13, %v1488_v15  ;;  %vm1492_vm12 = vcmp.eq.s32.totalorder %v2107_v3, %v2577_v14 }
0x21d6   :  { %v1494_v18 = vsel %vm1492_vm12, 1e+30, %v1448_v21 }
0x21d7   :  { %1502 = vmin.xlane.f32.xlu1 %v1494_v18  ;;  %vm1493_vm2 = vcmp.eq.s32.totalorder %v2107_v3, %v2579_v16 }
0x21d8   :  { %v1495_v19 = vsel %vm1493_vm2, 1e+30, %v1449_v60 }
0x21d9   :  { %1504 = vmin.xlane.f32.xlu0 %v1495_v19 }
0x2260   :  { %v1503_v27 = vpop.xlane.xlu1 %1502 }
0x2261   :  { %vm1506_vm14 = vcmp.le.f32.partialorder %v1494_v18, %v1503_v27 }
0x2262   :  { %v1508_v30 = vsel %vm1506_vm14, %v2107_v3, 128  ;;  %v1505_v33 = vpop.xlane.xlu0 %1504 }
0x2263   :  { %v1511_v35 = vshra.s32 %v1508_v30, 16  ;;  %vm1507_vm1 = vcmp.le.f32.partialorder %v1495_v19, %v1505_v33  ;;  %v1510_v56 = vand.u32 65535, %v1508_v30 }
0x2264   :  { %v1509_v36 = vsel %vm1507_vm1, %v2107_v3, 128 }
0x2265   :  { %v1513_v39 = vcvt.s32.f32 %v1511_v35  ;;  %v1525_v43 = vshra.s32 %v1509_v36, 16  ;;  %v1524_v57 = vand.u32 65535, %v1509_v36  ;;  %v1512_v58 = vcvt.s32.f32 %v1510_v56 }
0x2267   :  { %v1527_v45 = vcvt.s32.f32 %v1525_v43  ;;  %1514 = vmin.xlane.f32.xlu1 %v1513_v39  ;;  %v1526_v7 = vcvt.s32.f32 %v1524_v57 }
0x2269   :  { %1528 = vmin.xlane.f32.xlu0 %v1527_v45 }
0x22f0   :  { %v1515_v9 = vpop.xlane.xlu1 %1514 }
0x22f1   :  { %vm1516_vm11 = vcmp.eq.f32.partialorder %v1513_v39, %v1515_v9  ;;  %v1521_v50 = vcvt.f32.s32 %v1515_v9 }
0x22f2   :  { %v1529_v23 = vpop.xlane.xlu0 %1528  ;;  %v1517_v21 = vsel %vm1516_vm11, %v1512_v58, inf }
0x22f3   :  { %vm1530_vm10 = vcmp.eq.f32.partialorder %v1527_v45, %v1529_v23  ;;  %1518 = vmin.xlane.f32.xlu1 %v1517_v21  ;;  %v1535_v61 = vcvt.f32.s32 %v1529_v23  ;;  %v1522_v24 = vshll.u32 %v1521_v50, 16 }
0x22f4   :  { %v1531_v60 = vsel %vm1530_vm10, %v1526_v7, inf }
0x22f5   :  { %1532 = vmin.xlane.f32.xlu0 %v1531_v60  ;;  %v1536_v26 = vshll.u32 %v1535_v61, 16 }
0x237c   :  { %v1519_v31 = vpop.xlane.xlu1 %1518 }
0x237d   :  { %v1520_v20 = vcvt.f32.s32 %v1519_v31 }
0x237e   :  { %v1533_v28 = vpop.xlane.xlu0 %1532 }
0x237f   :  { %v2593_v25 = vadd.s32 %v1522_v24, %v1520_v20  ;;  %v1534_v22 = vcvt.f32.s32 %v1533_v28 }
0x2381   :  { %v2595_v32 = vadd.s32 %v1536_v26, %v1534_v22  ;;  %vm1538_vm1 = vcmp.eq.s32.totalorder %v2107_v3, %v2593_v25  ;;  %v1496_v25 = vsel %vm1492_vm12, 1.0, %v2089_v5  ;;  %vm2889_vm12 = vcmp.eq.s32.totalorder %v2107_v3, %v2563_v59 }
0x2382   :  { %v1540_v29 = vsel %vm1538_vm1, 1e+30, %v1494_v18  ;;  %v1451_v16 = vsel %vm2889_vm12, 1.0, %v2089_v5  ;;  %vm2905_vm12 = vcmp.eq.s32.totalorder %v2107_v3, %v2435_v48 }
0x2383   :  { %1548 = vmin.xlane.f32.xlu1 %v1540_v29  ;;  %vm1539_vm10 = vcmp.eq.s32.totalorder %v2107_v3, %v2595_v32  ;;  %v1497_v32 = vsel %vm1493_vm2, 1.0, %v2089_v5  ;;  %vm2890_vm2 = vcmp.eq.s32.totalorder %v2107_v3, %v2545_v2 }
0x2384   :  { %v1541_v51 = vsel %vm1539_vm10, 1e+30, %v1495_v19 }
0x2385   :  { %1550 = vmin.xlane.f32.xlu0 %v1541_v51 }
0x240c   :  { %v1549_v63 = vpop.xlane.xlu1 %1548 }
0x240d   :  { %vm1552_vm11 = vcmp.le.f32.partialorder %v1540_v29, %v1549_v63 }
0x240e   :  { %v1554_v0 = vsel %vm1552_vm11, %v2107_v3, 128  ;;  %v1551_v1 = vpop.xlane.xlu0 %1550 }
0x240f   :  { %v1557_v4 = vshra.s32 %v1554_v0, 16  ;;  %vm1553_vm14 = vcmp.le.f32.partialorder %v1541_v51, %v1551_v1  ;;  %v1556_v12 = vand.u32 65535, %v1554_v0 }
0x2410   :  { %v1555_v8 = vsel %vm1553_vm14, %v2107_v3, 128 }
0x2411   :  { %v1559_v10 = vcvt.s32.f32 %v1557_v4  ;;  %v1571_v11 = vshra.s32 %v1555_v8, 16  ;;  %v1570_v41 = vand.u32 65535, %v1555_v8  ;;  %v1558_v13 = vcvt.s32.f32 %v1556_v12 }
0x2413   :  { %v1573_v55 = vcvt.s32.f32 %v1571_v11  ;;  %1560 = vmin.xlane.f32.xlu1 %v1559_v10  ;;  %v1572_v18 = vcvt.s32.f32 %v1570_v41 }
0x2415   :  { %1574 = vmin.xlane.f32.xlu0 %v1573_v55 }
0x249c   :  { %v1561_v15 = vpop.xlane.xlu1 %1560 }
0x249d   :  { %vm1562_vm5 = vcmp.eq.f32.partialorder %v1559_v10, %v1561_v15  ;;  %v1567_v33 = vcvt.f32.s32 %v1561_v15 }
0x249e   :  { %v1575_v19 = vpop.xlane.xlu0 %1574  ;;  %v1563_v27 = vsel %vm1562_vm5, %v1558_v13, inf }
0x249f   :  { %vm1576_vm3 = vcmp.eq.f32.partialorder %v1573_v55, %v1575_v19  ;;  %1564 = vmin.xlane.f32.xlu1 %v1563_v27  ;;  %v1581_v35 = vcvt.f32.s32 %v1575_v19  ;;  %v1568_v39 = vshll.u32 %v1567_v33, 16 }
0x24a0   :  { %v1577_v30 = vsel %vm1576_vm3, %v1572_v18, inf }
0x24a1   :  { %1578 = vmin.xlane.f32.xlu0 %v1577_v30  ;;  %v1582_v56 = vshll.u32 %v1581_v35, 16 }
0x2528   :  { %v1565_v36 = vpop.xlane.xlu1 %1564 }
0x2529   :  { %v1566_v43 = vcvt.f32.s32 %v1565_v36 }
0x252a   :  { %v1579_v45 = vpop.xlane.xlu0 %1578 }
0x252b   :  { %v2609_v57 = vadd.s32 %v1568_v39, %v1566_v43  ;;  %v1580_v58 = vcvt.f32.s32 %v1579_v45 }
0x252d   :  { %v2611_v9 = vadd.s32 %v1582_v56, %v1580_v58  ;;  %vm1584_vm11 = vcmp.eq.s32.totalorder %v2107_v3, %v2609_v57  ;;  %v1542_v57 = vsel %vm1538_vm1, 1.0, %v2089_v5  ;;  %vm2888_vm1 = vcmp.eq.s32.totalorder %v2107_v3, %v2561_v17 }
0x252e   :  { %v1586_v7 = vsel %vm1584_vm11, 1e+30, %v1540_v29  ;;  %v1450_v14 = vsel %vm2888_vm1, 1.0, %v2089_v5  ;;  %v1404_v17 = vsel %vm2890_vm2, 1.0, %v2089_v5  ;;  %vm2904_vm1 = vcmp.eq.s32.totalorder %v2107_v3, %v2433_v53 }
0x252f   :  { %1594 = vmin.xlane.f32.xlu1 %v1586_v7  ;;  %vm1585_vm3 = vcmp.eq.s32.totalorder %v2107_v3, %v2611_v9  ;;  %v1543_v9 = vsel %vm1539_vm10, 1.0, %v2089_v5  ;;  %vm2891_vm10 = vcmp.eq.s32.totalorder %v2107_v3, %v2547_v6 }
0x2530   :  { %v1587_v23 = vsel %vm1585_vm3, 1e+30, %v1541_v51  ;;  %v1405_v59 = vsel %vm2891_vm10, 1.0, %v2089_v5 }
0x2531   :  { %1596 = vmin.xlane.f32.xlu0 %v1587_v23 }
0x25b8   :  { %v1595_v21 = vpop.xlane.xlu1 %1594 }
0x25b9   :  { %vm1598_vm5 = vcmp.le.f32.partialorder %v1586_v7, %v1595_v21 }
0x25ba   :  { %v1600_v60 = vsel %vm1598_vm5, %v2107_v3, 128  ;;  %v1597_v50 = vpop.xlane.xlu0 %1596 }
0x25bb   :  { %v1603_v61 = vshra.s32 %v1600_v60, 16  ;;  %vm1599_vm14 = vcmp.le.f32.partialorder %v1587_v23, %v1597_v50  ;;  %v1602_v26 = vand.u32 65535, %v1600_v60 }
0x25bc   :  { %v1601_v31 = vsel %vm1599_vm14, %v2107_v3, 128 }
0x25bd   :  { %v1605_v24 = vcvt.s32.f32 %v1603_v61  ;;  %v1617_v20 = vshra.s32 %v1601_v31, 16  ;;  %v1616_v22 = vand.u32 65535, %v1601_v31  ;;  %v1604_v29 = vcvt.s32.f32 %v1602_v26 }
0x25bf   :  { %v1619_v28 = vcvt.s32.f32 %v1617_v20  ;;  %1606 = vmin.xlane.f32.xlu1 %v1605_v24  ;;  %v1618_v51 = vcvt.s32.f32 %v1616_v22 }
0x25c1   :  { %1620 = vmin.xlane.f32.xlu0 %v1619_v28 }
0x2648   :  { %v1607_v63 = vpop.xlane.xlu1 %1606 }
0x2649   :  { %vm1608_vm0 = vcmp.eq.f32.partialorder %v1605_v24, %v1607_v63  ;;  %v1613_v8 = vcvt.f32.s32 %v1607_v63 }
0x264a   :  { %v1621_v0 = vpop.xlane.xlu0 %1620  ;;  %v1609_v1 = vsel %vm1608_vm0, %v1604_v29, inf }
0x264b   :  { %vm1622_vm4 = vcmp.eq.f32.partialorder %v1619_v28, %v1621_v0  ;;  %1610 = vmin.xlane.f32.xlu1 %v1609_v1  ;;  %v1627_v10 = vcvt.f32.s32 %v1621_v0  ;;  %v1614_v55 = vshll.u32 %v1613_v8, 16 }
0x264c   :  { %v1623_v4 = vsel %vm1622_vm4, %v1618_v51, inf }
0x264d   :  { %1624 = vmin.xlane.f32.xlu0 %v1623_v4  ;;  %v1628_v13 = vshll.u32 %v1627_v10, 16 }
0x26d4   :  { %v1611_v11 = vpop.xlane.xlu1 %1610 }
0x26d5   :  { %v1612_v12 = vcvt.f32.s32 %v1611_v11 }
0x26d6   :  { %v1625_v41 = vpop.xlane.xlu0 %1624 }
0x26d7   :  { %v2625_v15 = vadd.s32 %v1614_v55, %v1612_v12  ;;  %v1626_v18 = vcvt.f32.s32 %v1625_v41 }
0x26d9   :  { %v2627_v19 = vadd.s32 %v1628_v13, %v1626_v18  ;;  %vm1630_vm5 = vcmp.eq.s32.totalorder %v2107_v3, %v2625_v15  ;;  %v1588_v15 = vsel %vm1584_vm11, 1.0, %v2089_v5  ;;  %vm2892_vm11 = vcmp.eq.s32.totalorder %v2107_v3, %v2529_v42 }
0x26da   :  { %v1632_v27 = vsel %vm1630_vm5, 1e+30, %v1586_v7  ;;  %v1358_v2 = vsel %vm2892_vm11, 1.0, %v2089_v5 }
0x26db   :  { %1640 = vmin.xlane.f32.xlu1 %v1632_v27  ;;  %vm1631_vm4 = vcmp.eq.s32.totalorder %v2107_v3, %v2627_v19  ;;  %v1589_v19 = vsel %vm1585_vm3, 1.0, %v2089_v5  ;;  %vm2893_vm3 = vcmp.eq.s32.totalorder %v2107_v3, %v2531_v54 }
0x26dc   :  { %v1633_v30 = vsel %vm1631_vm4, 1e+30, %v1587_v23  ;;  %v1359_v6 = vsel %vm2893_vm3, 1.0, %v2089_v5 }
0x26dd   :  { %1642 = vmin.xlane.f32.xlu0 %v1633_v30 }
0x2764   :  { %v1641_v33 = vpop.xlane.xlu1 %1640 }
0x2765   :  { %vm1644_vm0 = vcmp.le.f32.partialorder %v1632_v27, %v1641_v33 }
0x2766   :  { %v1646_v35 = vsel %vm1644_vm0, %v2107_v3, 128  ;;  %v1643_v36 = vpop.xlane.xlu0 %1642 }
0x2767   :  { %v1649_v39 = vshra.s32 %v1646_v35, 16  ;;  %vm1645_vm14 = vcmp.le.f32.partialorder %v1633_v30, %v1643_v36  ;;  %v1648_v7 = vand.u32 65535, %v1646_v35 }
0x2768   :  { %v1647_v43 = vsel %vm1645_vm14, %v2107_v3, 128 }
0x2769   :  { %v1651_v45 = vcvt.s32.f32 %v1649_v39  ;;  %v1663_v56 = vshra.s32 %v1647_v43, 16  ;;  %v1662_v21 = vand.u32 65535, %v1647_v43  ;;  %v1650_v60 = vcvt.s32.f32 %v1648_v7 }
0x276b   :  { %v1665_v58 = vcvt.s32.f32 %v1663_v56  ;;  %1652 = vmin.xlane.f32.xlu1 %v1651_v45  ;;  %v1664_v23 = vcvt.s32.f32 %v1662_v21 }
0x276d   :  { %1666 = vmin.xlane.f32.xlu0 %v1665_v58 }
0x27f4   :  { %v1653_v50 = vpop.xlane.xlu1 %1652 }
0x27f5   :  { %vm1654_vm9 = vcmp.eq.f32.partialorder %v1651_v45, %v1653_v50  ;;  %v1659_v20 = vcvt.f32.s32 %v1653_v50 }
0x27f6   :  { %v1667_v61 = vpop.xlane.xlu0 %1666  ;;  %v1655_v31 = vsel %vm1654_vm9, %v1650_v60, inf }
0x27f7   :  { %vm1668_vm8 = vcmp.eq.f32.partialorder %v1665_v58, %v1667_v61  ;;  %1656 = vmin.xlane.f32.xlu1 %v1655_v31  ;;  %v1673_v28 = vcvt.f32.s32 %v1667_v61  ;;  %v1660_v22 = vshll.u32 %v1659_v20, 16 }
0x27f8   :  { %v1669_v24 = vsel %vm1668_vm8, %v1664_v23, inf }
0x27f9   :  { %1670 = vmin.xlane.f32.xlu0 %v1669_v24  ;;  %v1674_v51 = vshll.u32 %v1673_v28, 16 }
0x2880   :  { %v1657_v26 = vpop.xlane.xlu1 %1656 }
0x2881   :  { %v1658_v29 = vcvt.f32.s32 %v1657_v26 }
0x2882   :  { %v1671_v63 = vpop.xlane.xlu0 %1670 }
0x2883   :  { %v2641_v0 = vadd.s32 %v1660_v22, %v1658_v29  ;;  %v1672_v1 = vcvt.f32.s32 %v1671_v63 }
0x2885   :  { %v2643_v4 = vadd.s32 %v1674_v51, %v1672_v1  ;;  %vm1676_vm0 = vcmp.eq.s32.totalorder %v2107_v3, %v2641_v0  ;;  %v1634_v0 = vsel %vm1630_vm5, 1.0, %v2089_v5  ;;  %vm2894_vm5 = vcmp.eq.s32.totalorder %v2107_v3, %v2513_v38 }
0x2886   :  { %v1678_v8 = vsel %vm1676_vm0, 1e+30, %v1632_v27  ;;  %v1312_v42 = vsel %vm2894_vm5, 1.0, %v2089_v5 }
0x2887   :  { %1686 = vmin.xlane.f32.xlu1 %v1678_v8  ;;  %vm1677_vm8 = vcmp.eq.s32.totalorder %v2107_v3, %v2643_v4  ;;  %v1635_v4 = vsel %vm1631_vm4, 1.0, %v2089_v5  ;;  %vm2895_vm4 = vcmp.eq.s32.totalorder %v2107_v3, %v2515_v62 }
0x2888   :  { %v1679_v10 = vsel %vm1677_vm8, 1e+30, %v1633_v30  ;;  %v1313_v54 = vsel %vm2895_vm4, 1.0, %v2089_v5 }
0x2889   :  { %1688 = vmin.xlane.f32.xlu0 %v1679_v10 }
0x2910   :  { %v1687_v11 = vpop.xlane.xlu1 %1686 }
0x2911   :  { %vm1690_vm9 = vcmp.le.f32.partialorder %v1678_v8, %v1687_v11 }
0x2912   :  { %v1692_v55 = vsel %vm1690_vm9, %v2107_v3, 128  ;;  %v1689_v12 = vpop.xlane.xlu0 %1688 }
0x2913   :  { %v1695_v41 = vshra.s32 %v1692_v55, 16  ;;  %vm1691_vm14 = vcmp.le.f32.partialorder %v1679_v10, %v1689_v12  ;;  %v1694_v35 = vand.u32 65535, %v1692_v55 }
0x2914   :  { %v1693_v13 = vsel %vm1691_vm14, %v2107_v3, 128 }
0x2915   :  { %v1697_v18 = vcvt.s32.f32 %v1695_v41  ;;  %v1709_v27 = vshra.s32 %v1693_v13, 16  ;;  %v1708_v36 = vand.u32 65535, %v1693_v13  ;;  %v1696_v39 = vcvt.s32.f32 %v1694_v35 }
0x2917   :  { %v1711_v33 = vcvt.s32.f32 %v1709_v27  ;;  %1698 = vmin.xlane.f32.xlu1 %v1697_v18  ;;  %v1710_v30 = vcvt.s32.f32 %v1708_v36 }
0x2919   :  { %1712 = vmin.xlane.f32.xlu0 %v1711_v33 }
0x29a0   :  { %v1699_v43 = vpop.xlane.xlu1 %1698 }
0x29a1   :  { %vm1700_vm15 = vcmp.eq.f32.partialorder %v1697_v18, %v1699_v43  ;;  %v1705_v7 = vcvt.f32.s32 %v1699_v43 }
0x29a2   :  { %v1713_v45 = vpop.xlane.xlu0 %1712  ;;  %v1701_v56 = vsel %vm1700_vm15, %v1696_v39, inf }
0x29a3   :  { %vm1714_vm7 = vcmp.eq.f32.partialorder %v1711_v33, %v1713_v45  ;;  %1702 = vmin.xlane.f32.xlu1 %v1701_v56  ;;  %v1719_v21 = vcvt.f32.s32 %v1713_v45  ;;  %v1706_v50 = vshll.u32 %v1705_v7, 16 }
0x29a4   :  { %v1715_v58 = vsel %vm1714_vm7, %v1710_v30, inf }
0x29a5   :  { %1716 = vmin.xlane.f32.xlu0 %v1715_v58  ;;  %v1720_v31 = vshll.u32 %v1719_v21, 16 }
0x2a2c   :  { %v1703_v60 = vpop.xlane.xlu1 %1702 }
0x2a2d   :  { %v1704_v23 = vcvt.f32.s32 %v1703_v60 }
0x2a2e   :  { %v1717_v61 = vpop.xlane.xlu0 %1716 }
0x2a2f   :  { %v1707_v24 = vadd.s32 %v1706_v50, %v1704_v23  ;;  %v1718_v20 = vcvt.f32.s32 %v1717_v61  ;;  %v2668_v23 = vld [vmem:[#allocation4] sm:$0xff] }
0x2a31   :  { %v1721_v28 = vadd.s32 %v1720_v31, %v1718_v20  ;;  %vm1722_vm9 = vcmp.eq.s32.totalorder %v2107_v3, %v1707_v24  ;;  %v2673_v20 = vld [vmem:[#allocation4 + $0x8] sm:$0xff]  ;;  %v1680_v24 = vsel %vm1676_vm0, 1.0, %v2089_v5  ;;  %vm2896_vm0 = vcmp.eq.s32.totalorder %v2107_v3, %v2497_v37 }
0x2a32   :  { %v1724_v26 = vsel %vm1722_vm9, 1e+30, %v1678_v8  ;;  %v1266_v38 = vsel %vm2896_vm0, 1.0, %v2089_v5 }
0x2a33   :  { %1732 = vmin.xlane.f32.xlu1 %v1724_v26  ;;  %vm1723_vm15 = vcmp.eq.s32.totalorder %v2107_v3, %v1721_v28  ;;  %v1681_v28 = vsel %vm1677_vm8, 1.0, %v2089_v5  ;;  %vm2897_vm8 = vcmp.eq.s32.totalorder %v2107_v3, %v2499_v49 }
0x2a34   :  { %v1725_v22 = vsel %vm1723_vm15, 1e+30, %v1679_v10  ;;  %v1267_v62 = vsel %vm2897_vm8, 1.0, %v2089_v5 }
0x2a35   :  { %1734 = vmin.xlane.f32.xlu0 %v1725_v22 }
0x2abc   :  { %v1733_v29 = vpop.xlane.xlu1 %1732 }
0x2abd   :  { %vm1736_vm7 = vcmp.le.f32.partialorder %v1724_v26, %v1733_v29  ;;  %v1726_v26 = vsel %vm1722_vm9, 1.0, %v2089_v5  ;;  %vm2898_vm9 = vcmp.eq.s32.totalorder %v2107_v3, %v2481_v34 }
0x2abe   :  { %v1738_v63 = vsel %vm1736_vm7, %v2107_v3, 128  ;;  %v1735_v51 = vpop.xlane.xlu0 %1734  ;;  %vm2091_vm7 = vmmov 0   ;;  %v1220_v37 = vsel %vm2898_vm9, 1.0, %v2089_v5 }
0x2abf   :  { %v1741_v1 = vshra.s32 %v1738_v63, 16  ;;  %vm1737_vm14 = vcmp.le.f32.partialorder %v1725_v22, %v1735_v51  ;;  %v1740_v8 = vand.u32 65535, %v1738_v63  ;;  %2042 = vmatprep.mubr.msk.f32.mxu0 %vm2091_vm7, %v2089_v5  ;;  %2077 = vmatprep.mubr.msk.f32.mxu1 %vm2091_vm7, %v2089_v5  ;;  %v1727_v63 = vsel %vm1723_vm15, 1.0, %v2089_v5 }
0x2ac0   :  { %v1739_v11 = vsel %vm1737_vm14, %v2107_v3, 128  ;;  %v1728_v51 = vsub.f32 %v1726_v26, %v2668_v23  ;;  %vm2899_vm15 = vcmp.eq.s32.totalorder %v2107_v3, %v2483_v46  ;;  %vm2900_vm14 = vcmp.eq.s32.totalorder %v2107_v3, %v2465_v47 }
0x2ac1   :  { %v1743_v55 = vcvt.s32.f32 %v1741_v1  ;;  %v1755_v12 = vshra.s32 %v1739_v11, 16  ;;  %v1754_v13 = vand.u32 65535, %v1739_v11  ;;  %v1742_v18 = vcvt.s32.f32 %v1740_v8 }
0x2ac2   :  { %v1729_v1 = vsub.f32 %v1727_v63, %v2673_v20  ;;  %v1682_v11 = vsub.f32 %v1680_v24, %v2668_v23  ;;  %v1590_v8 = vsub.f32 %v1588_v15, %v2668_v23  ;;  %v1221_v49 = vsel %vm2899_vm15, 1.0, %v2089_v5  ;;  %v2086_v63 = vld [vmem:[%s2867_s0] sm:$0x7] }
0x2ac3   :  { %v1757_v41 = vcvt.s32.f32 %v1755_v12  ;;  %1744 = vmin.xlane.f32.xlu1 %v1743_v55  ;;  %v1756_v10 = vcvt.s32.f32 %v1754_v13  ;;  %v1636_v12 = vsub.f32 %v1634_v0, %v2668_v23  ;;  %v1591_v13 = vsub.f32 %v1589_v19, %v2673_v20 }
0x2ac4   :  { %v1174_v34 = vsel %vm2900_vm14, 1.0, %v2089_v5  ;;  %vm2901_vm7 = vcmp.eq.s32.totalorder %v2107_v3, %v2467_v40 }
0x2ac5   :  { %1758 = vmin.xlane.f32.xlu0 %v1757_v41  ;;  %v1175_v46 = vsel %vm2901_vm7, 1.0, %v2089_v5 }
0x2b4c   :  { %v1745_v27 = vpop.xlane.xlu1 %1744 }
0x2b4d   :  { %vm1746_vm13 = vcmp.eq.f32.partialorder %v1743_v55, %v1745_v27  ;;  %v1751_v39 = vcvt.f32.s32 %v1745_v27  ;;  %v1683_v55 = vsub.f32 %v1681_v28, %v2673_v20  ;;  %v1545_v27 = vsub.f32 %v1543_v9, %v2673_v20 }
0x2b4e   :  { %v1759_v33 = vpop.xlane.xlu0 %1758  ;;  %v1747_v35 = vsel %vm1746_vm13, %v1742_v18, inf  ;;  %v1544_v18 = vsub.f32 %v1542_v57, %v2668_v23 }
0x2b4f   :  { %vm1760_vm6 = vcmp.eq.f32.partialorder %v1757_v41, %v1759_v33  ;;  %1748 = vmin.xlane.f32.xlu1 %v1747_v35  ;;  %v1765_v43 = vcvt.f32.s32 %v1759_v33  ;;  %v1752_v45 = vshll.u32 %v1751_v39, 16  ;;  %v1637_v41 = vsub.f32 %v1635_v4, %v2673_v20 }
0x2b50   :  { %v1761_v36 = vsel %vm1760_vm6, %v1756_v10, inf  ;;  %v1498_v10 = vsub.f32 %v1496_v25, %v2668_v23  ;;  %v1499_v33 = vsub.f32 %v1497_v32, %v2673_v20  ;;  %v1452_v35 = vsub.f32 %v1450_v14, %v2668_v23 }
0x2b51   :  { %1762 = vmin.xlane.f32.xlu0 %v1761_v36  ;;  %v1766_v7 = vshll.u32 %v1765_v43, 16  ;;  %v1453_v36 = vsub.f32 %v1451_v16, %v2673_v20  ;;  %v1406_v39 = vsub.f32 %v1404_v17, %v2668_v23  ;;  %v1407_v43 = vsub.f32 %v1405_v59, %v2673_v20 }
0x2bd8   :  { %v1749_v30 = vpop.xlane.xlu1 %1748 }
0x2bd9   :  { %v1750_v56 = vcvt.f32.s32 %v1749_v30  ;;  %v1360_v30 = vsub.f32 %v1358_v2, %v2668_v23 }
0x2bda   :  { %v1763_v58 = vpop.xlane.xlu0 %1762 }
0x2bdb   :  { %v1753_v21 = vadd.s32 %v1752_v45, %v1750_v56  ;;  %v1764_v60 = vcvt.f32.s32 %v1763_v58  ;;  %v1361_v45 = vsub.f32 %v1359_v6, %v2673_v20  ;;  %v1314_v56 = vsub.f32 %v1312_v42, %v2668_v23 }
0x2bdc   :  { %v1315_v58 = vsub.f32 %v1313_v54, %v2673_v20 }
0x2bdd   :  { %v1767_v50 = vadd.s32 %v1766_v7, %v1764_v60  ;;  %vm1768_vm13 = vcmp.eq.s32.totalorder %v2107_v3, %v1753_v21  ;;  %v1268_v7 = vsub.f32 %v1266_v38, %v2668_v23  ;;  %v1269_v21 = vsub.f32 %v1267_v62, %v2673_v20 }
0x2bde   :  { %v1770_v61 = vsel %vm1768_vm13, 1.0, %v2089_v5  ;;  %v1222_v60 = vsub.f32 %v1220_v37, %v2668_v23  ;;  %vm2902_vm13 = vcmp.eq.s32.totalorder %v2107_v3, %v2449_v44  ;;  %v1082_v44 = vsel %vm2904_vm1, 1.0, %v2089_v5 }
0x2bdf   :  { %v1772_v31 = vsub.f32 %v1770_v61, %v2668_v23  ;;  %vm1769_vm6 = vcmp.eq.s32.totalorder %v2107_v3, %v1767_v50  ;;  %v1223_v50 = vsub.f32 %v1221_v49, %v2673_v20  ;;  %v1176_v61 = vsub.f32 %v1174_v34, %v2668_v23 }
0x2be0   :  { %v1771_v22 = vsel %vm1769_vm6, 1.0, %v2089_v5  ;;  %v1128_v47 = vsel %vm2902_vm13, 1.0, %v2089_v5  ;;  %vm2903_vm6 = vcmp.eq.s32.totalorder %v2107_v3, %v2451_v52  ;;  %v1083_v52 = vsel %vm2905_vm12, 1.0, %v2089_v5  ;;  %v2087_v3 = vld [vmem:[%s2867_s0 + $0x4] sm:$0x7] }
0x2be1   :  { %2011 = vmatpush3.xpose.msra.mxu0 %v1772_v31  ;;  %v1773_v29 = vsub.f32 %v1771_v22, %v2673_v20  ;;  %v1177_v31 = vsub.f32 %v1175_v46, %v2673_v20  ;;  %v1129_v40 = vsel %vm2903_vm6, 1.0, %v2089_v5  ;;  %v1130_v26 = vsub.f32 %v1128_v47, %v2668_v23 }
0x2be2   :  { %2012 = vmatprep.subr.mxu0 %v2089_v5  ;;  %v1131_v22 = vsub.f32 %v1129_v40, %v2673_v20  ;;  %v1085_v53 = vsub.f32 %v1083_v52, %v2673_v20 }
0x2be3   :  { %2046 = vmatpush3.xpose.msra.mxu1 %v1773_v29  ;;  %v1084_v29 = vsub.f32 %v1082_v44, %v2668_v23 }
0x2be4   :  { %2047 = vmatprep.subr.mxu1 %v2089_v5 }
0x2be5   :  { %2013 = vmatpush3.xpose.msra.mxu0 %v1728_v51 }
0x2be6   :  { %2014 = vmatprep.subr.mxu0 %v2089_v5 }
0x2be7   :  { %2048 = vmatpush3.xpose.msra.mxu1 %v1729_v1 }
0x2be8   :  { %2049 = vmatprep.subr.mxu1 %v2089_v5 }
0x2be9   :  { %2015 = vmatpush3.xpose.msra.mxu0 %v1682_v11 }
0x2bea   :  { %2016 = vmatprep.subr.mxu0 %v2089_v5 }
0x2beb   :  { %2050 = vmatpush3.xpose.msra.mxu1 %v1683_v55 }
0x2bec   :  { %2051 = vmatprep.subr.mxu1 %v2089_v5 }
0x2bed   :  { %2017 = vmatpush3.xpose.msra.mxu0 %v1636_v12 }
0x2bee   :  { %2018 = vmatprep.subr.mxu0 %v2089_v5 }
0x2bef   :  { %2052 = vmatpush3.xpose.msra.mxu1 %v1637_v41 }
0x2bf0   :  { %2053 = vmatprep.subr.mxu1 %v2089_v5 }
0x2bf1   :  { %2019 = vmatpush3.xpose.msra.mxu0 %v1590_v8 }
0x2bf2   :  { %2020 = vmatprep.subr.mxu0 %v2089_v5 }
0x2bf3   :  { %2054 = vmatpush3.xpose.msra.mxu1 %v1591_v13 }
0x2bf4   :  { %2055 = vmatprep.subr.mxu1 %v2089_v5 }
0x2bf5   :  { %2021 = vmatpush3.xpose.msra.mxu0 %v1544_v18 }
0x2bf6   :  { %2022 = vmatprep.subr.mxu0 %v2089_v5 }
0x2bf7   :  { %2056 = vmatpush3.xpose.msra.mxu1 %v1545_v27 }
0x2bf8   :  { %2057 = vmatprep.subr.mxu1 %v2089_v5 }
0x2bf9   :  { %2023 = vmatpush3.xpose.msra.mxu0 %v1498_v10 }
0x2bfa   :  { %2024 = vmatprep.subr.mxu0 %v2089_v5 }
0x2bfb   :  { %2058 = vmatpush3.xpose.msra.mxu1 %v1499_v33 }
0x2bfc   :  { %2059 = vmatprep.subr.mxu1 %v2089_v5 }
0x2bfd   :  { %2025 = vmatpush3.xpose.msra.mxu0 %v1452_v35 }
0x2bfe   :  { %2026 = vmatprep.subr.mxu0 %v2089_v5 }
0x2bff   :  { %2060 = vmatpush3.xpose.msra.mxu1 %v1453_v36 }
0x2c00   :  { %2061 = vmatprep.subr.mxu1 %v2089_v5 }
0x2c01   :  { %2027 = vmatpush3.xpose.msra.mxu0 %v1406_v39 }
0x2c02   :  { %2028 = vmatprep.subr.mxu0 %v2089_v5 }
0x2c03   :  { %2062 = vmatpush3.xpose.msra.mxu1 %v1407_v43 }
0x2c04   :  { %2063 = vmatprep.subr.mxu1 %v2089_v5 }
0x2c05   :  { %2029 = vmatpush3.xpose.msra.mxu0 %v1360_v30 }
0x2c06   :  { %2030 = vmatprep.subr.mxu0 %v2089_v5 }
0x2c07   :  { %2064 = vmatpush3.xpose.msra.mxu1 %v1361_v45 }
0x2c08   :  { %2065 = vmatprep.subr.mxu1 %v2089_v5 }
0x2c09   :  { %2031 = vmatpush3.xpose.msra.mxu0 %v1314_v56 }
0x2c0a   :  { %2032 = vmatprep.subr.mxu0 %v2089_v5 }
0x2c0b   :  { %2066 = vmatpush3.xpose.msra.mxu1 %v1315_v58 }
0x2c0c   :  { %2067 = vmatprep.subr.mxu1 %v2089_v5 }
0x2c0d   :  { %2033 = vmatpush3.xpose.msra.mxu0 %v1268_v7 }
0x2c0e   :  { %2034 = vmatprep.subr.mxu0 %v2089_v5 }
0x2c0f   :  { %2068 = vmatpush3.xpose.msra.mxu1 %v1269_v21 }
0x2c10   :  { %2069 = vmatprep.subr.mxu1 %v2089_v5 }
0x2c11   :  { %2035 = vmatpush3.xpose.msra.mxu0 %v1222_v60 }
0x2c12   :  { %2036 = vmatprep.subr.mxu0 %v2089_v5 }
0x2c13   :  { %2070 = vmatpush3.xpose.msra.mxu1 %v1223_v50 }
0x2c14   :  { %2071 = vmatprep.subr.mxu1 %v2089_v5 }
0x2c15   :  { %2037 = vmatpush3.xpose.msra.mxu0 %v1176_v61 }
0x2c16   :  { %2038 = vmatprep.subr.mxu0 %v2089_v5 }
0x2c17   :  { %2072 = vmatpush3.xpose.msra.mxu1 %v1177_v31 }
0x2c18   :  { %2073 = vmatprep.subr.mxu1 %v2089_v5 }
0x2c19   :  { %2039 = vmatpush3.xpose.msra.mxu0 %v1130_v26 }
0x2c1a   :  { %2040 = vmatprep.subr.mxu0 %v2089_v5 }
0x2c1b   :  { %2074 = vmatpush3.xpose.msra.mxu1 %v1131_v22 }
0x2c1c   :  { %2075 = vmatprep.subr.mxu1 %v2089_v5 }
0x2c1d   :  { %2041 = vmatpush3.xpose.msra.mxu0 %v1084_v29 }
0x2c1f   :  { %2076 = vmatpush3.xpose.msra.mxu1 %v1085_v53 }
0x2c20   :  { %2043 = vmatmul.mubr.f32.vlgmr.msra.gmra.mxu0 %v2086_v63 }
0x2c22   :  { %2078 = vmatmul.mubr.f32.vlgmr.msra.gmra.mxu1 %v2087_v3 }
0x2ce0   :  { %v1874_v48 = vpop.f32.mrf.mxu0 }
0x2ce1   :  { %1878 = vst [vmem:[%s2869_s1] sm:$0x7] %v1874_v48 }
0x2ce2   :  { %v2044_v5 = vpop.f32.mrf.mxu0  ;;  %v1945_v23 = vpop.f32.mrf.mxu1 }
0x2ce3   :  { %1975 = vst [vmem:[%s2869_s1 + $0x4] sm:$0x7] %v1945_v23 }
0x2ce4   :  { %v2079_v20 = vpop.f32.mrf.mxu1 }

</bundles_post_ra>
